<compile_context>
chip_gen: v7x
topology: tpu7x:2x2x1
jax: 0.10.0
libtpu: 0.0.40
codegen_flags: <defaults>
</compile_context>

<pallas_src>
import math
from functools import partial

import jax
import jax.numpy as jnp
from jax.experimental import pallas as pl
from jax.experimental.pallas import tpu as pltpu

D_MODEL = 256
N_HEADS = 8
HEAD_DIM = D_MODEL // N_HEADS
D_FF = 1024
N_LAYERS = 6
LN_EPS = 1e-5
CLS_HIDDEN = 128
NEG_INF = -1e30


def _layernorm(y, g, b):
    # post-norm residual: biased variance, eps=1e-5 (matches torch LayerNorm)
    mean = jnp.mean(y, axis=-1, keepdims=True)
    var = jnp.mean(jnp.square(y - mean), axis=-1, keepdims=True)
    return (y - mean) * jax.lax.rsqrt(var + LN_EPS) * g + b


# --------------------------- fused model kernel ------------------------------

def _fused_model_kernel(B, L,
                        x_ref, emb_w_ref, emb_b_ref, pe_ref, mask_ref,
                        in_w_ref, in_b_ref, out_w_ref, out_b_ref,
                        ff_w1_ref, ff_b1_ref, ff_w2_ref, ff_b2_ref,
                        ln1_g_ref, ln1_b_ref, ln2_g_ref, ln2_b_ref,
                        pool_ref, cls_w1_ref, cls_b1_ref, cls_w2_ref, cls_b2_ref,
                        o_ref, x_sc):
    E, H, Dh = D_MODEL, N_HEADS, HEAD_DIM
    SN = B * L
    layer = pl.program_id(0)

    # -------- prologue (layer 0): embedding + positional encoding ------------
    @pl.when(layer == 0)
    def _():
        emb = (jnp.dot(x_ref[...], emb_w_ref[...],
                       preferred_element_type=jnp.float32) + emb_b_ref[...])
        # flat row order is b*L + l -> repeat pe (L, E) over the B groups
        pe_full = jnp.concatenate([pe_ref[...]] * B, axis=0)
        x_sc[...] = emb + pe_full

    x = x_sc[...]                                       # (SN, E) f32, resident

    # -------- multi-head self-attention (stacked heads, single matmul) -------
    xb = x.astype(jnp.bfloat16)
    # Q columns of in_w / in_b carry the 1/sqrt(Dh) scale (folded at prep time)
    qkv = (jnp.dot(xb, in_w_ref[...],
                   preferred_element_type=jnp.float32) + in_b_ref[...])  # (SN, 3E)

    def stack_heads(t):                                 # (SN, E) -> (H*SN, Dh)
        return jnp.concatenate(
            [t[:, h * Dh:(h + 1) * Dh] for h in range(H)], axis=0)

    qs = stack_heads(qkv[:, :E]).astype(jnp.bfloat16)
    ks = stack_heads(qkv[:, E:2 * E]).astype(jnp.bfloat16)
    vs = stack_heads(qkv[:, 2 * E:]).astype(jnp.bfloat16)

    dn_nt = (((1,), (1,)), ((), ()))                    # q @ k^T
    s = jax.lax.dot_general(qs, ks, dn_nt,
                            preferred_element_type=jnp.float32)   # (H*SN, H*SN)
    s = s + mask_ref[...]          # additive mask: same head AND same "batch" col
    m = jnp.max(s, axis=-1, keepdims=True)
    p = jnp.exp(s - m)
    p = p * pl.reciprocal(jnp.sum(p, axis=-1, keepdims=True), approx=True)
    ov = jnp.dot(p.astype(jnp.bfloat16), vs,
                 preferred_element_type=jnp.float32)              # (H*SN, Dh)
    o = jnp.concatenate([ov[h * SN:(h + 1) * SN, :] for h in range(H)],
                        axis=1)                                   # (SN, E)

    attn = (jnp.dot(o.astype(jnp.bfloat16), out_w_ref[...],
                    preferred_element_type=jnp.float32) + out_b_ref[...])
    # TODO(synk): encoder dropout(p=0.1) is identity in eval mode.
    h1 = _layernorm(x + attn, ln1_g_ref[...], ln1_b_ref[...])

    # -------- feed-forward ----------------------------------------------------
    f = (jnp.dot(h1.astype(jnp.bfloat16), ff_w1_ref[...],
                 preferred_element_type=jnp.float32) + ff_b1_ref[...])
    f = jnp.maximum(f, 0.0)
    f = (jnp.dot(f.astype(jnp.bfloat16), ff_w2_ref[...],
                 preferred_element_type=jnp.float32) + ff_b2_ref[...])
    h2 = _layernorm(h1 + f, ln2_g_ref[...], ln2_b_ref[...])

    x_sc[...] = h2                 # carry to next layer (next grid step)

    # -------- epilogue (last layer): mean over dim=1 + classifier -------------
    @pl.when(layer == N_LAYERS - 1)
    def _():
        pooled = jnp.dot(pool_ref[...], h2,
                         preferred_element_type=jnp.float32)      # (B, E)
        hc = (jnp.dot(pooled, cls_w1_ref[...],
                      preferred_element_type=jnp.float32) + cls_b1_ref[...])
        hc = jnp.maximum(hc, 0.0)
        # TODO(synk): classifier Dropout(0.5) is identity in eval mode.
        o_ref[...] = (jnp.dot(hc, cls_w2_ref[...],
                              preferred_element_type=jnp.float32) + cls_b2_ref[...])


# ------------------------------- model glue ----------------------------------

def make_positional_encoding(d_model, max_len):
    position = jnp.arange(max_len, dtype=jnp.float32)[:, None]
    div_term = jnp.exp(jnp.arange(0, d_model, 2, dtype=jnp.float32) *
                       (-math.log(10000.0) / d_model))
    ang = position * div_term                              # (max_len, d/2)
    pe = jnp.stack([jnp.sin(ang), jnp.cos(ang)], axis=-1)  # interleave sin/cos
    return pe.reshape(max_len, d_model)


def init_params(key, sequence_length, num_classes):
    keys = iter(jax.random.split(key, 32))

    def w(shape, scale=0.02):
        return (scale * jax.random.normal(next(keys), shape)).astype(jnp.float32)

    params = {
        'emb_w': w((4, D_MODEL)), 'emb_b': w((D_MODEL,)),
        'cls_w1': w((D_MODEL, CLS_HIDDEN)), 'cls_b1': w((CLS_HIDDEN,)),
        'cls_w2': w((CLS_HIDDEN, num_classes)), 'cls_b2': w((num_classes,)),
        'pe': make_positional_encoding(D_MODEL, sequence_length),
    }

    # Per-layer encoder weights stacked along a leading (N_LAYERS,) axis so the
    # fused kernel can stream them with BlockSpec index_map=(l,0,0).  Matmul
    # weights are stored bf16 (MXU operands); biases / LN params stay f32.
    # The attention scale 1/sqrt(HEAD_DIM) is folded into the Q columns of the
    # in-projection weight/bias at parameter-prep time.
    in_w = w((N_LAYERS, D_MODEL, 3 * D_MODEL))
    in_b = w((N_LAYERS, 1, 3 * D_MODEL))
    scale = 1.0 / math.sqrt(HEAD_DIM)
    in_w = in_w.at[:, :, :D_MODEL].multiply(scale)
    in_b = in_b.at[:, :, :D_MODEL].multiply(scale)

    params['encoder'] = {
        'in_w': in_w.astype(jnp.bfloat16),
        'in_b': in_b,
        'out_w': w((N_LAYERS, D_MODEL, D_MODEL)).astype(jnp.bfloat16),
        'out_b': w((N_LAYERS, 1, D_MODEL)),
        'ff_w1': w((N_LAYERS, D_MODEL, D_FF)).astype(jnp.bfloat16),
        'ff_b1': w((N_LAYERS, 1, D_FF)),
        'ff_w2': w((N_LAYERS, D_FF, D_MODEL)).astype(jnp.bfloat16),
        'ff_b2': w((N_LAYERS, 1, D_MODEL)),
        'ln1_g': jnp.ones((N_LAYERS, 1, D_MODEL), jnp.float32),
        'ln1_b': jnp.zeros((N_LAYERS, 1, D_MODEL), jnp.float32),
        'ln2_g': jnp.ones((N_LAYERS, 1, D_MODEL), jnp.float32),
        'ln2_b': jnp.zeros((N_LAYERS, 1, D_MODEL), jnp.float32),
    }
    return params


def transformer_model_forward(params, x):
    # x: (B, 4, L)  ->  permute(0, 2, 1)  ->  (B, L, 4)  -> rows (b*L + l, 4)
    B, C, L = x.shape
    E, H = D_MODEL, N_HEADS
    SN = B * L
    num_classes = params['cls_b2'].shape[-1]

    xt = jnp.transpose(x, (0, 2, 1)).reshape(SN, C)   # tiny XLA layout op

    # Additive attention mask for stacked-heads rows r = h*SN + t, t = b*L + l.
    # nn.TransformerEncoder (batch_first=False) interprets (B, L, E) as
    # (seq=B, batch=L, E): tokens attend only within the same head and same l.
    r = jnp.arange(H * SN)
    same_head = (r[:, None] // SN) == (r[None, :] // SN)
    same_col = (r[:, None] % L) == (r[None, :] % L)
    mask = jnp.where(same_head & same_col, 0.0, NEG_INF).astype(jnp.float32)

    # mean over dim=1 (the L axis) as a (B, SN) pooling matmul on the MXU
    pb = jnp.arange(B)[:, None]
    pc = jnp.arange(SN)[None, :]
    pool = jnp.where(pc // L == pb, 1.0 / L, 0.0).astype(jnp.float32)

    p = params
    enc = p['encoder']
    kernel = partial(_fused_model_kernel, B, L)

    def wspec(shape):
        # stacked per-layer tensor: pick slice `l`, squeeze the layer dim
        return pl.BlockSpec((None,) + shape, lambda l: (l, 0, 0))

    def cspec(shape):
        # resident constant input (DMA'd once, block index never changes)
        return pl.BlockSpec(shape, lambda l: (0, 0))

    return pl.pallas_call(
        kernel,
        out_shape=jax.ShapeDtypeStruct((B, num_classes), jnp.float32),
        grid=(N_LAYERS,),
        in_specs=[cspec((SN, C)),
                  cspec((C, E)), cspec((1, E)), cspec((L, E)),
                  cspec((H * SN, H * SN)),
                  wspec((E, 3 * E)), wspec((1, 3 * E)),
                  wspec((E, E)), wspec((1, E)),
                  wspec((E, D_FF)), wspec((1, D_FF)),
                  wspec((D_FF, E)), wspec((1, E)),
                  wspec((1, E)), wspec((1, E)),
                  wspec((1, E)), wspec((1, E)),
                  cspec((B, SN)),
                  cspec((E, CLS_HIDDEN)), cspec((1, CLS_HIDDEN)),
                  cspec((CLS_HIDDEN, num_classes)), cspec((1, num_classes))],
        out_specs=pl.BlockSpec((B, num_classes), lambda l: (0, 0)),
        scratch_shapes=[pltpu.VMEM((SN, E), jnp.float32)],
        # layer axis carries state in scratch -> must be sequential
        compiler_params=pltpu.CompilerParams(
            dimension_semantics=("arbitrary",)),
    )(xt,
      p['emb_w'], p['emb_b'].reshape(1, E), p['pe'][:L], mask,
      enc['in_w'], enc['in_b'], enc['out_w'], enc['out_b'],
      enc['ff_w1'], enc['ff_b1'], enc['ff_w2'], enc['ff_b2'],
      enc['ln1_g'], enc['ln1_b'], enc['ln2_g'], enc['ln2_b'],
      pool,
      p['cls_w1'], p['cls_b1'].reshape(1, CLS_HIDDEN),
      p['cls_w2'], p['cls_b2'].reshape(1, num_classes))


if __name__ == "__main__":
    B, C, L = 2, 4, 8
    num_classes = 3
    key = jax.random.PRNGKey(0)
    pkey, xkey = jax.random.split(key)
    params = init_params(pkey, sequence_length=L, num_classes=num_classes)
    x = jax.random.normal(xkey, (B, C, L), dtype=jnp.float32)

    fwd = jax.jit(transformer_model_forward)
    out = jax.block_until_ready(fwd(params, x))
    assert out.shape == (B, num_classes) and out.dtype == jnp.float32
    print("KERNEL_OK")
</pallas_src>

<mosaic_0001>
module attributes {stable_mosaic.version = 11 : i64} {
  func.func @_fused_model_kernel(%arg0: i32, %arg1: memref<16x4xf32, #tpu.memory_space<vmem>>, %arg2: memref<4x256xf32, #tpu.memory_space<vmem>>, %arg3: memref<1x256xf32, #tpu.memory_space<vmem>>, %arg4: memref<8x256xf32, #tpu.memory_space<vmem>>, %arg5: memref<128x128xf32, #tpu.memory_space<vmem>>, %arg6: memref<1x256x768xbf16, #tpu.memory_space<vmem>>, %arg7: memref<1x1x768xf32, #tpu.memory_space<vmem>>, %arg8: memref<1x256x256xbf16, #tpu.memory_space<vmem>>, %arg9: memref<1x1x256xf32, #tpu.memory_space<vmem>>, %arg10: memref<1x256x1024xbf16, #tpu.memory_space<vmem>>, %arg11: memref<1x1x1024xf32, #tpu.memory_space<vmem>>, %arg12: memref<1x1024x256xbf16, #tpu.memory_space<vmem>>, %arg13: memref<1x1x256xf32, #tpu.memory_space<vmem>>, %arg14: memref<1x1x256xf32, #tpu.memory_space<vmem>>, %arg15: memref<1x1x256xf32, #tpu.memory_space<vmem>>, %arg16: memref<1x1x256xf32, #tpu.memory_space<vmem>>, %arg17: memref<1x1x256xf32, #tpu.memory_space<vmem>>, %arg18: memref<2x16xf32, #tpu.memory_space<vmem>>, %arg19: memref<256x128xf32, #tpu.memory_space<vmem>>, %arg20: memref<1x128xf32, #tpu.memory_space<vmem>>, %arg21: memref<128x3xf32, #tpu.memory_space<vmem>>, %arg22: memref<1x3xf32, #tpu.memory_space<vmem>>, %arg23: memref<2x3xf32, #tpu.memory_space<vmem>>, %arg24: memref<16x256xf32, #tpu.memory_space<vmem>>) attributes {dimension_semantics = [#tpu.dimension_semantics<arbitrary>], iteration_bounds = array<i64: 6>, scalar_prefetch = 0 : i64, scratch_operands = 1 : i64, tpu.core_type = #tpu.core_type<tc>, window_params = [{pipeline_mode = #tpu.pipeline_mode<synchronous>, transform_indices = @transform_0, window_bounds = array<i64: 16, 4>}, {pipeline_mode = #tpu.pipeline_mode<synchronous>, transform_indices = @transform_1, window_bounds = array<i64: 4, 256>}, {pipeline_mode = #tpu.pipeline_mode<synchronous>, transform_indices = @transform_2, window_bounds = array<i64: 1, 256>}, {pipeline_mode = #tpu.pipeline_mode<synchronous>, transform_indices = @transform_3, window_bounds = array<i64: 8, 256>}, {pipeline_mode = #tpu.pipeline_mode<synchronous>, transform_indices = @transform_4, window_bounds = array<i64: 128, 128>}, {transform_indices = @transform_5, window_bounds = array<i64: 1, 256, 768>}, {transform_indices = @transform_6, window_bounds = array<i64: 1, 1, 768>}, {transform_indices = @transform_7, window_bounds = array<i64: 1, 256, 256>}, {transform_indices = @transform_8, window_bounds = array<i64: 1, 1, 256>}, {transform_indices = @transform_9, window_bounds = array<i64: 1, 256, 1024>}, {transform_indices = @transform_10, window_bounds = array<i64: 1, 1, 1024>}, {transform_indices = @transform_11, window_bounds = array<i64: 1, 1024, 256>}, {transform_indices = @transform_12, window_bounds = array<i64: 1, 1, 256>}, {transform_indices = @transform_13, window_bounds = array<i64: 1, 1, 256>}, {transform_indices = @transform_14, window_bounds = array<i64: 1, 1, 256>}, {transform_indices = @transform_15, window_bounds = array<i64: 1, 1, 256>}, {transform_indices = @transform_16, window_bounds = array<i64: 1, 1, 256>}, {pipeline_mode = #tpu.pipeline_mode<synchronous>, transform_indices = @transform_17, window_bounds = array<i64: 2, 16>}, {pipeline_mode = #tpu.pipeline_mode<synchronous>, transform_indices = @transform_18, window_bounds = array<i64: 256, 128>}, {pipeline_mode = #tpu.pipeline_mode<synchronous>, transform_indices = @transform_19, window_bounds = array<i64: 1, 128>}, {pipeline_mode = #tpu.pipeline_mode<synchronous>, transform_indices = @transform_20, window_bounds = array<i64: 128, 3>}, {pipeline_mode = #tpu.pipeline_mode<synchronous>, transform_indices = @transform_21, window_bounds = array<i64: 1, 3>}, {pipeline_mode = #tpu.pipeline_mode<synchronous>, transform_indices = @transform_22, window_bounds = array<i64: 2, 3>}]} {
    %c0_i32 = arith.constant 0 : i32
    %0 = arith.cmpi eq, %arg0, %c0_i32 : i32
    %1 = arith.extui %0 : i1 to i32
    %c0_i32_0 = arith.constant 0 : i32
    %2 = arith.cmpi ne, %1, %c0_i32_0 : i32
    scf.if %2 {
      %c0_61 = arith.constant 0 : index
      %c0_62 = arith.constant 0 : index
      %153 = vector.load %arg1[%c0_61, %c0_62] : memref<16x4xf32, #tpu.memory_space<vmem>>, vector<16x4xf32>
      %c0_63 = arith.constant 0 : index
      %c0_64 = arith.constant 0 : index
      %154 = vector.load %arg2[%c0_63, %c0_64] : memref<4x256xf32, #tpu.memory_space<vmem>>, vector<4x256xf32>
      %cst_65 = arith.constant dense<0.000000e+00> : vector<16x256xf32>
      %155 = tpu.matmul %153, %154, %cst_65 {dimension_numbers = #tpu.dot_dimension_numbers<[1], [0], [0], [1], [0, 0, 1, 1], [], []>} : vector<16x4xf32>, vector<4x256xf32>, vector<16x256xf32> -> vector<16x256xf32>
      %c0_66 = arith.constant 0 : index
      %c0_67 = arith.constant 0 : index
      %156 = vector.load %arg3[%c0_66, %c0_67] : memref<1x256xf32, #tpu.memory_space<vmem>>, vector<1x256xf32>
      %157 = vector.broadcast %156 : vector<1x256xf32> to vector<16x256xf32>
      %158 = arith.addf %155, %157 : vector<16x256xf32>
      %c0_68 = arith.constant 0 : index
      %c0_69 = arith.constant 0 : index
      %159 = vector.load %arg4[%c0_68, %c0_69] : memref<8x256xf32, #tpu.memory_space<vmem>>, vector<8x256xf32>
      %160 = tpu.concatenate %159, %159 in 0 : vector<8x256xf32>, vector<8x256xf32> -> vector<16x256xf32>
      %161 = arith.addf %158, %160 : vector<16x256xf32>
      %c0_70 = arith.constant 0 : index
      %c0_71 = arith.constant 0 : index
      %162 = vector.load %arg24[%c0_70, %c0_71] : memref<16x256xf32, #tpu.memory_space<vmem>>, vector<16x256xf32>
      tpu.vector_store %arg24[%c0_70, %c0_71], %161 {strides = array<i32>} : memref<16x256xf32, #tpu.memory_space<vmem>>, vector<16x256xf32>,
    } else {
    }
    %c0 = arith.constant 0 : index
    %c0_1 = arith.constant 0 : index
    %3 = vector.load %arg24[%c0, %c0_1] : memref<16x256xf32, #tpu.memory_space<vmem>>, vector<16x256xf32>
    %4 = arith.truncf %3 : vector<16x256xf32> to vector<16x256xbf16>
    %c0_2 = arith.constant 0 : index
    %c0_3 = arith.constant 0 : index
    %c0_4 = arith.constant 0 : index
    %5 = vector.load %arg6[%c0_2, %c0_3, %c0_4] : memref<1x256x768xbf16, #tpu.memory_space<vmem>>, vector<1x256x768xbf16>
    %6 = vector.shape_cast %5 : vector<1x256x768xbf16> to vector<256x768xbf16>
    %cst = arith.constant dense<0.000000e+00> : vector<16x768xf32>
    %7 = tpu.matmul %4, %6, %cst {dimension_numbers = #tpu.dot_dimension_numbers<[1], [0], [0], [1], [0, 0, 1, 1], [], []>} : vector<16x256xbf16>, vector<256x768xbf16>, vector<16x768xf32> -> vector<16x768xf32>
    %c0_5 = arith.constant 0 : index
    %c0_6 = arith.constant 0 : index
    %c0_7 = arith.constant 0 : index
    %8 = vector.load %arg7[%c0_5, %c0_6, %c0_7] : memref<1x1x768xf32, #tpu.memory_space<vmem>>, vector<1x1x768xf32>
    %9 = vector.shape_cast %8 : vector<1x1x768xf32> to vector<1x768xf32>
    %10 = vector.broadcast %9 : vector<1x768xf32> to vector<16x768xf32>
    %11 = arith.addf %7, %10 : vector<16x768xf32>
    %12 = vector.extract_strided_slice %11 {offsets = [0, 0], sizes = [16, 256], strides = [1, 1]} : vector<16x768xf32> to vector<16x256xf32>
    %13 = vector.extract_strided_slice %12 {offsets = [0, 0], sizes = [16, 32], strides = [1, 1]} : vector<16x256xf32> to vector<16x32xf32>
    %14 = vector.extract_strided_slice %12 {offsets = [0, 32], sizes = [16, 32], strides = [1, 1]} : vector<16x256xf32> to vector<16x32xf32>
    %15 = vector.extract_strided_slice %12 {offsets = [0, 64], sizes = [16, 32], strides = [1, 1]} : vector<16x256xf32> to vector<16x32xf32>
    %16 = vector.extract_strided_slice %12 {offsets = [0, 96], sizes = [16, 32], strides = [1, 1]} : vector<16x256xf32> to vector<16x32xf32>
    %17 = vector.extract_strided_slice %12 {offsets = [0, 128], sizes = [16, 32], strides = [1, 1]} : vector<16x256xf32> to vector<16x32xf32>
    %18 = vector.extract_strided_slice %12 {offsets = [0, 160], sizes = [16, 32], strides = [1, 1]} : vector<16x256xf32> to vector<16x32xf32>
    %19 = vector.extract_strided_slice %12 {offsets = [0, 192], sizes = [16, 32], strides = [1, 1]} : vector<16x256xf32> to vector<16x32xf32>
    %20 = vector.extract_strided_slice %12 {offsets = [0, 224], sizes = [16, 32], strides = [1, 1]} : vector<16x256xf32> to vector<16x32xf32>
    %21 = tpu.concatenate %13, %14, %15, %16, %17, %18, %19, %20 in 0 : vector<16x32xf32>, vector<16x32xf32>, vector<16x32xf32>, vector<16x32xf32>, vector<16x32xf32>, vector<16x32xf32>, vector<16x32xf32>, vector<16x32xf32> -> vector<128x32xf32>
    %22 = arith.truncf %21 : vector<128x32xf32> to vector<128x32xbf16>
    %23 = vector.extract_strided_slice %11 {offsets = [0, 256], sizes = [16, 256], strides = [1, 1]} : vector<16x768xf32> to vector<16x256xf32>
    %24 = vector.extract_strided_slice %23 {offsets = [0, 0], sizes = [16, 32], strides = [1, 1]} : vector<16x256xf32> to vector<16x32xf32>
    %25 = vector.extract_strided_slice %23 {offsets = [0, 32], sizes = [16, 32], strides = [1, 1]} : vector<16x256xf32> to vector<16x32xf32>
    %26 = vector.extract_strided_slice %23 {offsets = [0, 64], sizes = [16, 32], strides = [1, 1]} : vector<16x256xf32> to vector<16x32xf32>
    %27 = vector.extract_strided_slice %23 {offsets = [0, 96], sizes = [16, 32], strides = [1, 1]} : vector<16x256xf32> to vector<16x32xf32>
    %28 = vector.extract_strided_slice %23 {offsets = [0, 128], sizes = [16, 32], strides = [1, 1]} : vector<16x256xf32> to vector<16x32xf32>
    %29 = vector.extract_strided_slice %23 {offsets = [0, 160], sizes = [16, 32], strides = [1, 1]} : vector<16x256xf32> to vector<16x32xf32>
    %30 = vector.extract_strided_slice %23 {offsets = [0, 192], sizes = [16, 32], strides = [1, 1]} : vector<16x256xf32> to vector<16x32xf32>
    %31 = vector.extract_strided_slice %23 {offsets = [0, 224], sizes = [16, 32], strides = [1, 1]} : vector<16x256xf32> to vector<16x32xf32>
    %32 = tpu.concatenate %24, %25, %26, %27, %28, %29, %30, %31 in 0 : vector<16x32xf32>, vector<16x32xf32>, vector<16x32xf32>, vector<16x32xf32>, vector<16x32xf32>, vector<16x32xf32>, vector<16x32xf32>, vector<16x32xf32> -> vector<128x32xf32>
    %33 = arith.truncf %32 : vector<128x32xf32> to vector<128x32xbf16>
    %34 = vector.extract_strided_slice %11 {offsets = [0, 512], sizes = [16, 256], strides = [1, 1]} : vector<16x768xf32> to vector<16x256xf32>
    %35 = vector.extract_strided_slice %34 {offsets = [0, 0], sizes = [16, 32], strides = [1, 1]} : vector<16x256xf32> to vector<16x32xf32>
    %36 = vector.extract_strided_slice %34 {offsets = [0, 32], sizes = [16, 32], strides = [1, 1]} : vector<16x256xf32> to vector<16x32xf32>
    %37 = vector.extract_strided_slice %34 {offsets = [0, 64], sizes = [16, 32], strides = [1, 1]} : vector<16x256xf32> to vector<16x32xf32>
    %38 = vector.extract_strided_slice %34 {offsets = [0, 96], sizes = [16, 32], strides = [1, 1]} : vector<16x256xf32> to vector<16x32xf32>
    %39 = vector.extract_strided_slice %34 {offsets = [0, 128], sizes = [16, 32], strides = [1, 1]} : vector<16x256xf32> to vector<16x32xf32>
    %40 = vector.extract_strided_slice %34 {offsets = [0, 160], sizes = [16, 32], strides = [1, 1]} : vector<16x256xf32> to vector<16x32xf32>
    %41 = vector.extract_strided_slice %34 {offsets = [0, 192], sizes = [16, 32], strides = [1, 1]} : vector<16x256xf32> to vector<16x32xf32>
    %42 = vector.extract_strided_slice %34 {offsets = [0, 224], sizes = [16, 32], strides = [1, 1]} : vector<16x256xf32> to vector<16x32xf32>
    %43 = tpu.concatenate %35, %36, %37, %38, %39, %40, %41, %42 in 0 : vector<16x32xf32>, vector<16x32xf32>, vector<16x32xf32>, vector<16x32xf32>, vector<16x32xf32>, vector<16x32xf32>, vector<16x32xf32>, vector<16x32xf32> -> vector<128x32xf32>
    %44 = arith.truncf %43 : vector<128x32xf32> to vector<128x32xbf16>
    %cst_8 = arith.constant dense<0.000000e+00> : vector<128x128xf32>
    %45 = tpu.matmul %22, %33, %cst_8 {dimension_numbers = #tpu.dot_dimension_numbers<[1], [1], [0], [0], [0, 0, 1, 0], [], []>} : vector<128x32xbf16>, vector<128x32xbf16>, vector<128x128xf32> -> vector<128x128xf32>
    %c0_9 = arith.constant 0 : index
    %c0_10 = arith.constant 0 : index
    %46 = vector.load %arg5[%c0_9, %c0_10] : memref<128x128xf32, #tpu.memory_space<vmem>>, vector<128x128xf32>
    %47 = arith.addf %45, %46 : vector<128x128xf32>
    %cst_11 = arith.constant dense<0xFF800000> : vector<128xf32>
    %48 = vector.multi_reduction <maximumf>, %47, %cst_11 [1] : vector<128x128xf32> to vector<128xf32>
    %49 = vector.shape_cast %48 : vector<128xf32> to vector<128x1xf32>
    %50 = vector.broadcast %49 : vector<128x1xf32> to vector<128x128xf32>
    %51 = arith.subf %47, %50 : vector<128x128xf32>
    %52 = math.exp %51 : vector<128x128xf32>
    %cst_12 = arith.constant dense<0.000000e+00> : vector<128xf32>
    %53 = vector.multi_reduction <add>, %52, %cst_12 [1] : vector<128x128xf32> to vector<128xf32>
    %54 = vector.shape_cast %53 : vector<128xf32> to vector<128x1xf32>
    %55 = tpu.reciprocal %54 {approx = true} : vector<128x1xf32> -> vector<128x1xf32>
    %56 = vector.broadcast %55 : vector<128x1xf32> to vector<128x128xf32>
    %57 = arith.mulf %52, %56 : vector<128x128xf32>
    %58 = arith.truncf %57 : vector<128x128xf32> to vector<128x128xbf16>
    %cst_13 = arith.constant dense<0.000000e+00> : vector<128x32xf32>
    %59 = tpu.matmul %58, %44, %cst_13 {dimension_numbers = #tpu.dot_dimension_numbers<[1], [0], [0], [1], [0, 0, 1, 1], [], []>} : vector<128x128xbf16>, vector<128x32xbf16>, vector<128x32xf32> -> vector<128x32xf32>
    %60 = vector.extract_strided_slice %59 {offsets = [0, 0], sizes = [16, 32], strides = [1, 1]} : vector<128x32xf32> to vector<16x32xf32>
    %61 = vector.extract_strided_slice %59 {offsets = [16, 0], sizes = [16, 32], strides = [1, 1]} : vector<128x32xf32> to vector<16x32xf32>
    %62 = vector.extract_strided_slice %59 {offsets = [32, 0], sizes = [16, 32], strides = [1, 1]} : vector<128x32xf32> to vector<16x32xf32>
    %63 = vector.extract_strided_slice %59 {offsets = [48, 0], sizes = [16, 32], strides = [1, 1]} : vector<128x32xf32> to vector<16x32xf32>
    %64 = vector.extract_strided_slice %59 {offsets = [64, 0], sizes = [16, 32], strides = [1, 1]} : vector<128x32xf32> to vector<16x32xf32>
    %65 = vector.extract_strided_slice %59 {offsets = [80, 0], sizes = [16, 32], strides = [1, 1]} : vector<128x32xf32> to vector<16x32xf32>
    %66 = vector.extract_strided_slice %59 {offsets = [96, 0], sizes = [16, 32], strides = [1, 1]} : vector<128x32xf32> to vector<16x32xf32>
    %67 = vector.extract_strided_slice %59 {offsets = [112, 0], sizes = [16, 32], strides = [1, 1]} : vector<128x32xf32> to vector<16x32xf32>
    %68 = tpu.concatenate %60, %61, %62, %63, %64, %65, %66, %67 in 1 : vector<16x32xf32>, vector<16x32xf32>, vector<16x32xf32>, vector<16x32xf32>, vector<16x32xf32>, vector<16x32xf32>, vector<16x32xf32>, vector<16x32xf32> -> vector<16x256xf32>
    %69 = arith.truncf %68 : vector<16x256xf32> to vector<16x256xbf16>
    %c0_14 = arith.constant 0 : index
    %c0_15 = arith.constant 0 : index
    %c0_16 = arith.constant 0 : index
    %70 = vector.load %arg8[%c0_14, %c0_15, %c0_16] : memref<1x256x256xbf16, #tpu.memory_space<vmem>>, vector<1x256x256xbf16>
    %71 = vector.shape_cast %70 : vector<1x256x256xbf16> to vector<256x256xbf16>
    %cst_17 = arith.constant dense<0.000000e+00> : vector<16x256xf32>
    %72 = tpu.matmul %69, %71, %cst_17 {dimension_numbers = #tpu.dot_dimension_numbers<[1], [0], [0], [1], [0, 0, 1, 1], [], []>} : vector<16x256xbf16>, vector<256x256xbf16>, vector<16x256xf32> -> vector<16x256xf32>
    %c0_18 = arith.constant 0 : index
    %c0_19 = arith.constant 0 : index
    %c0_20 = arith.constant 0 : index
    %73 = vector.load %arg9[%c0_18, %c0_19, %c0_20] : memref<1x1x256xf32, #tpu.memory_space<vmem>>, vector<1x1x256xf32>
    %74 = vector.shape_cast %73 : vector<1x1x256xf32> to vector<1x256xf32>
    %75 = vector.broadcast %74 : vector<1x256xf32> to vector<16x256xf32>
    %76 = arith.addf %72, %75 : vector<16x256xf32>
    %77 = arith.addf %3, %76 : vector<16x256xf32>
    %c0_21 = arith.constant 0 : index
    %c0_22 = arith.constant 0 : index
    %c0_23 = arith.constant 0 : index
    %78 = vector.load %arg14[%c0_21, %c0_22, %c0_23] : memref<1x1x256xf32, #tpu.memory_space<vmem>>, vector<1x1x256xf32>
    %79 = vector.shape_cast %78 : vector<1x1x256xf32> to vector<1x256xf32>
    %c0_24 = arith.constant 0 : index
    %c0_25 = arith.constant 0 : index
    %c0_26 = arith.constant 0 : index
    %80 = vector.load %arg15[%c0_24, %c0_25, %c0_26] : memref<1x1x256xf32, #tpu.memory_space<vmem>>, vector<1x1x256xf32>
    %81 = vector.shape_cast %80 : vector<1x1x256xf32> to vector<1x256xf32>
    %cst_27 = arith.constant dense<0.000000e+00> : vector<16xf32>
    %82 = vector.multi_reduction <add>, %77, %cst_27 [1] : vector<16x256xf32> to vector<16xf32>
    %83 = vector.shape_cast %82 : vector<16xf32> to vector<16x1xf32>
    %cst_28 = arith.constant 2.560000e+02 : f32
    %84 = vector.broadcast %cst_28 : f32 to vector<16x1xf32>
    %85 = arith.divf %83, %84 : vector<16x1xf32>
    %86 = vector.broadcast %85 : vector<16x1xf32> to vector<16x256xf32>
    %87 = arith.subf %77, %86 : vector<16x256xf32>
    %88 = arith.mulf %87, %87 : vector<16x256xf32>
    %cst_29 = arith.constant dense<0.000000e+00> : vector<16xf32>
    %89 = vector.multi_reduction <add>, %88, %cst_29 [1] : vector<16x256xf32> to vector<16xf32>
    %90 = vector.shape_cast %89 : vector<16xf32> to vector<16x1xf32>
    %cst_30 = arith.constant 2.560000e+02 : f32
    %91 = vector.broadcast %cst_30 : f32 to vector<16x1xf32>
    %92 = arith.divf %90, %91 : vector<16x1xf32>
    %93 = vector.broadcast %85 : vector<16x1xf32> to vector<16x256xf32>
    %94 = arith.subf %77, %93 : vector<16x256xf32>
    %cst_31 = arith.constant 9.99999974E-6 : f32
    %95 = vector.broadcast %cst_31 : f32 to vector<16x1xf32>
    %96 = arith.addf %92, %95 : vector<16x1xf32>
    %97 = math.rsqrt %96 : vector<16x1xf32>
    %98 = vector.broadcast %97 : vector<16x1xf32> to vector<16x256xf32>
    %99 = arith.mulf %94, %98 : vector<16x256xf32>
    %100 = vector.broadcast %79 : vector<1x256xf32> to vector<16x256xf32>
    %101 = arith.mulf %99, %100 : vector<16x256xf32>
    %102 = vector.broadcast %81 : vector<1x256xf32> to vector<16x256xf32>
    %103 = arith.addf %101, %102 : vector<16x256xf32>
    %104 = arith.truncf %103 : vector<16x256xf32> to vector<16x256xbf16>
    %c0_32 = arith.constant 0 : index
    %c0_33 = arith.constant 0 : index
    %c0_34 = arith.constant 0 : index
    %105 = vector.load %arg10[%c0_32, %c0_33, %c0_34] : memref<1x256x1024xbf16, #tpu.memory_space<vmem>>, vector<1x256x1024xbf16>
    %106 = vector.shape_cast %105 : vector<1x256x1024xbf16> to vector<256x1024xbf16>
    %cst_35 = arith.constant dense<0.000000e+00> : vector<16x1024xf32>
    %107 = tpu.matmul %104, %106, %cst_35 {dimension_numbers = #tpu.dot_dimension_numbers<[1], [0], [0], [1], [0, 0, 1, 1], [], []>} : vector<16x256xbf16>, vector<256x1024xbf16>, vector<16x1024xf32> -> vector<16x1024xf32>
    %c0_36 = arith.constant 0 : index
    %c0_37 = arith.constant 0 : index
    %c0_38 = arith.constant 0 : index
    %108 = vector.load %arg11[%c0_36, %c0_37, %c0_38] : memref<1x1x1024xf32, #tpu.memory_space<vmem>>, vector<1x1x1024xf32>
    %109 = vector.shape_cast %108 : vector<1x1x1024xf32> to vector<1x1024xf32>
    %110 = vector.broadcast %109 : vector<1x1024xf32> to vector<16x1024xf32>
    %111 = arith.addf %107, %110 : vector<16x1024xf32>
    %cst_39 = arith.constant 0.000000e+00 : f32
    %112 = vector.broadcast %cst_39 : f32 to vector<16x1024xf32>
    %113 = arith.maximumf %111, %112 : vector<16x1024xf32>
    %114 = arith.truncf %113 : vector<16x1024xf32> to vector<16x1024xbf16>
    %c0_40 = arith.constant 0 : index
    %c0_41 = arith.constant 0 : index
    %c0_42 = arith.constant 0 : index
    %115 = vector.load %arg12[%c0_40, %c0_41, %c0_42] : memref<1x1024x256xbf16, #tpu.memory_space<vmem>>, vector<1x1024x256xbf16>
    %116 = vector.shape_cast %115 : vector<1x1024x256xbf16> to vector<1024x256xbf16>
    %cst_43 = arith.constant dense<0.000000e+00> : vector<16x256xf32>
    %117 = tpu.matmul %114, %116, %cst_43 {dimension_numbers = #tpu.dot_dimension_numbers<[1], [0], [0], [1], [0, 0, 1, 1], [], []>} : vector<16x1024xbf16>, vector<1024x256xbf16>, vector<16x256xf32> -> vector<16x256xf32>
    %c0_44 = arith.constant 0 : index
    %c0_45 = arith.constant 0 : index
    %c0_46 = arith.constant 0 : index
    %118 = vector.load %arg13[%c0_44, %c0_45, %c0_46] : memref<1x1x256xf32, #tpu.memory_space<vmem>>, vector<1x1x256xf32>
    %119 = vector.shape_cast %118 : vector<1x1x256xf32> to vector<1x256xf32>
    %120 = vector.broadcast %119 : vector<1x256xf32> to vector<16x256xf32>
    %121 = arith.addf %117, %120 : vector<16x256xf32>
    %122 = arith.addf %103, %121 : vector<16x256xf32>
    %c0_47 = arith.constant 0 : index
    %c0_48 = arith.constant 0 : index
    %c0_49 = arith.constant 0 : index
    %123 = vector.load %arg16[%c0_47, %c0_48, %c0_49] : memref<1x1x256xf32, #tpu.memory_space<vmem>>, vector<1x1x256xf32>
    %124 = vector.shape_cast %123 : vector<1x1x256xf32> to vector<1x256xf32>
    %c0_50 = arith.constant 0 : index
    %c0_51 = arith.constant 0 : index
    %c0_52 = arith.constant 0 : index
    %125 = vector.load %arg17[%c0_50, %c0_51, %c0_52] : memref<1x1x256xf32, #tpu.memory_space<vmem>>, vector<1x1x256xf32>
    %126 = vector.shape_cast %125 : vector<1x1x256xf32> to vector<1x256xf32>
    %cst_53 = arith.constant dense<0.000000e+00> : vector<16xf32>
    %127 = vector.multi_reduction <add>, %122, %cst_53 [1] : vector<16x256xf32> to vector<16xf32>
    %128 = vector.shape_cast %127 : vector<16xf32> to vector<16x1xf32>
    %cst_54 = arith.constant 2.560000e+02 : f32
    %129 = vector.broadcast %cst_54 : f32 to vector<16x1xf32>
    %130 = arith.divf %128, %129 : vector<16x1xf32>
    %131 = vector.broadcast %130 : vector<16x1xf32> to vector<16x256xf32>
    %132 = arith.subf %122, %131 : vector<16x256xf32>
    %133 = arith.mulf %132, %132 : vector<16x256xf32>
    %cst_55 = arith.constant dense<0.000000e+00> : vector<16xf32>
    %134 = vector.multi_reduction <add>, %133, %cst_55 [1] : vector<16x256xf32> to vector<16xf32>
    %135 = vector.shape_cast %134 : vector<16xf32> to vector<16x1xf32>
    %cst_56 = arith.constant 2.560000e+02 : f32
    %136 = vector.broadcast %cst_56 : f32 to vector<16x1xf32>
    %137 = arith.divf %135, %136 : vector<16x1xf32>
    %138 = vector.broadcast %130 : vector<16x1xf32> to vector<16x256xf32>
    %139 = arith.subf %122, %138 : vector<16x256xf32>
    %cst_57 = arith.constant 9.99999974E-6 : f32
    %140 = vector.broadcast %cst_57 : f32 to vector<16x1xf32>
    %141 = arith.addf %137, %140 : vector<16x1xf32>
    %142 = math.rsqrt %141 : vector<16x1xf32>
    %143 = vector.broadcast %142 : vector<16x1xf32> to vector<16x256xf32>
    %144 = arith.mulf %139, %143 : vector<16x256xf32>
    %145 = vector.broadcast %124 : vector<1x256xf32> to vector<16x256xf32>
    %146 = arith.mulf %144, %145 : vector<16x256xf32>
    %147 = vector.broadcast %126 : vector<1x256xf32> to vector<16x256xf32>
    %148 = arith.addf %146, %147 : vector<16x256xf32>
    %c0_58 = arith.constant 0 : index
    %c0_59 = arith.constant 0 : index
    %149 = vector.load %arg24[%c0_58, %c0_59] : memref<16x256xf32, #tpu.memory_space<vmem>>, vector<16x256xf32>
    tpu.vector_store %arg24[%c0_58, %c0_59], %148 {strides = array<i32>} : memref<16x256xf32, #tpu.memory_space<vmem>>, vector<16x256xf32>,
    %c5_i32 = arith.constant 5 : i32
    %150 = arith.cmpi eq, %arg0, %c5_i32 : i32
    %151 = arith.extui %150 : i1 to i32
    %c0_i32_60 = arith.constant 0 : i32
    %152 = arith.cmpi ne, %151, %c0_i32_60 : i32
    scf.if %152 {
      %c0_61 = arith.constant 0 : index
      %c0_62 = arith.constant 0 : index
      %153 = vector.load %arg18[%c0_61, %c0_62] : memref<2x16xf32, #tpu.memory_space<vmem>>, vector<2x16xf32>
      %cst_63 = arith.constant dense<0.000000e+00> : vector<2x256xf32>
      %154 = tpu.matmul %153, %148, %cst_63 {dimension_numbers = #tpu.dot_dimension_numbers<[1], [0], [0], [1], [0, 0, 1, 1], [], []>} : vector<2x16xf32>, vector<16x256xf32>, vector<2x256xf32> -> vector<2x256xf32>
      %c0_64 = arith.constant 0 : index
      %c0_65 = arith.constant 0 : index
      %155 = vector.load %arg19[%c0_64, %c0_65] : memref<256x128xf32, #tpu.memory_space<vmem>>, vector<256x128xf32>
      %cst_66 = arith.constant dense<0.000000e+00> : vector<2x128xf32>
      %156 = tpu.matmul %154, %155, %cst_66 {dimension_numbers = #tpu.dot_dimension_numbers<[1], [0], [0], [1], [0, 0, 1, 1], [], []>} : vector<2x256xf32>, vector<256x128xf32>, vector<2x128xf32> -> vector<2x128xf32>
      %c0_67 = arith.constant 0 : index
      %c0_68 = arith.constant 0 : index
      %157 = vector.load %arg20[%c0_67, %c0_68] : memref<1x128xf32, #tpu.memory_space<vmem>>, vector<1x128xf32>
      %158 = vector.broadcast %157 : vector<1x128xf32> to vector<2x128xf32>
      %159 = arith.addf %156, %158 : vector<2x128xf32>
      %cst_69 = arith.constant 0.000000e+00 : f32
      %160 = vector.broadcast %cst_69 : f32 to vector<2x128xf32>
      %161 = arith.maximumf %159, %160 : vector<2x128xf32>
      %c0_70 = arith.constant 0 : index
      %c0_71 = arith.constant 0 : index
      %162 = vector.load %arg21[%c0_70, %c0_71] : memref<128x3xf32, #tpu.memory_space<vmem>>, vector<128x3xf32>
      %cst_72 = arith.constant dense<0.000000e+00> : vector<2x3xf32>
      %163 = tpu.matmul %161, %162, %cst_72 {dimension_numbers = #tpu.dot_dimension_numbers<[1], [0], [0], [1], [0, 0, 1, 1], [], []>} : vector<2x128xf32>, vector<128x3xf32>, vector<2x3xf32> -> vector<2x3xf32>
      %c0_73 = arith.constant 0 : index
      %c0_74 = arith.constant 0 : index
      %164 = vector.load %arg22[%c0_73, %c0_74] : memref<1x3xf32, #tpu.memory_space<vmem>>, vector<1x3xf32>
      %165 = vector.broadcast %164 : vector<1x3xf32> to vector<2x3xf32>
      %166 = arith.addf %163, %165 : vector<2x3xf32>
      %c0_75 = arith.constant 0 : index
      %c0_76 = arith.constant 0 : index
      %167 = vector.load %arg23[%c0_75, %c0_76] : memref<2x3xf32, #tpu.memory_space<vmem>>, vector<2x3xf32>
      tpu.vector_store %arg23[%c0_75, %c0_76], %166 {strides = array<i32>} : memref<2x3xf32, #tpu.memory_space<vmem>>, vector<2x3xf32>,
    } else {
    }
    return
  }
  func.func @transform_0(%arg0: i32) -> (i32, i32) {
    %c0_i32 = arith.constant 0 : i32
    %c0_i32_0 = arith.constant 0 : i32
    %c0_i32_1 = arith.constant 0 : i32
    return %c0_i32, %c0_i32_0 : i32, i32
  }
  func.func @transform_1(%arg0: i32) -> (i32, i32) {
    %c0_i32 = arith.constant 0 : i32
    %c0_i32_0 = arith.constant 0 : i32
    %c0_i32_1 = arith.constant 0 : i32
    return %c0_i32, %c0_i32_0 : i32, i32
  }
  func.func @transform_2(%arg0: i32) -> (i32, i32) {
    %c0_i32 = arith.constant 0 : i32
    %c0_i32_0 = arith.constant 0 : i32
    %c0_i32_1 = arith.constant 0 : i32
    return %c0_i32, %c0_i32_0 : i32, i32
  }
  func.func @transform_3(%arg0: i32) -> (i32, i32) {
    %c0_i32 = arith.constant 0 : i32
    %c0_i32_0 = arith.constant 0 : i32
    %c0_i32_1 = arith.constant 0 : i32
    return %c0_i32, %c0_i32_0 : i32, i32
  }
  func.func @transform_4(%arg0: i32) -> (i32, i32) {
    %c0_i32 = arith.constant 0 : i32
    %c0_i32_0 = arith.constant 0 : i32
    %c0_i32_1 = arith.constant 0 : i32
    return %c0_i32, %c0_i32_0 : i32, i32
  }
  func.func @transform_5(%arg0: i32) -> (i32, i32, i32) {
    %c0_i32 = arith.constant 0 : i32
    %c0_i32_0 = arith.constant 0 : i32
    %c0_i32_1 = arith.constant 0 : i32
    return %arg0, %c0_i32, %c0_i32_0 : i32, i32, i32
  }
  func.func @transform_6(%arg0: i32) -> (i32, i32, i32) {
    %c0_i32 = arith.constant 0 : i32
    %c0_i32_0 = arith.constant 0 : i32
    %c0_i32_1 = arith.constant 0 : i32
    return %arg0, %c0_i32, %c0_i32_0 : i32, i32, i32
  }
  func.func @transform_7(%arg0: i32) -> (i32, i32, i32) {
    %c0_i32 = arith.constant 0 : i32
    %c0_i32_0 = arith.constant 0 : i32
    %c0_i32_1 = arith.constant 0 : i32
    return %arg0, %c0_i32, %c0_i32_0 : i32, i32, i32
  }
  func.func @transform_8(%arg0: i32) -> (i32, i32, i32) {
    %c0_i32 = arith.constant 0 : i32
    %c0_i32_0 = arith.constant 0 : i32
    %c0_i32_1 = arith.constant 0 : i32
    return %arg0, %c0_i32, %c0_i32_0 : i32, i32, i32
  }
  func.func @transform_9(%arg0: i32) -> (i32, i32, i32) {
    %c0_i32 = arith.constant 0 : i32
    %c0_i32_0 = arith.constant 0 : i32
    %c0_i32_1 = arith.constant 0 : i32
    return %arg0, %c0_i32, %c0_i32_0 : i32, i32, i32
  }
  func.func @transform_10(%arg0: i32) -> (i32, i32, i32) {
    %c0_i32 = arith.constant 0 : i32
    %c0_i32_0 = arith.constant 0 : i32
    %c0_i32_1 = arith.constant 0 : i32
    return %arg0, %c0_i32, %c0_i32_0 : i32, i32, i32
  }
  func.func @transform_11(%arg0: i32) -> (i32, i32, i32) {
    %c0_i32 = arith.constant 0 : i32
    %c0_i32_0 = arith.constant 0 : i32
    %c0_i32_1 = arith.constant 0 : i32
    return %arg0, %c0_i32, %c0_i32_0 : i32, i32, i32
  }
  func.func @transform_12(%arg0: i32) -> (i32, i32, i32) {
    %c0_i32 = arith.constant 0 : i32
    %c0_i32_0 = arith.constant 0 : i32
    %c0_i32_1 = arith.constant 0 : i32
    return %arg0, %c0_i32, %c0_i32_0 : i32, i32, i32
  }
  func.func @transform_13(%arg0: i32) -> (i32, i32, i32) {
    %c0_i32 = arith.constant 0 : i32
    %c0_i32_0 = arith.constant 0 : i32
    %c0_i32_1 = arith.constant 0 : i32
    return %arg0, %c0_i32, %c0_i32_0 : i32, i32, i32
  }
  func.func @transform_14(%arg0: i32) -> (i32, i32, i32) {
    %c0_i32 = arith.constant 0 : i32
    %c0_i32_0 = arith.constant 0 : i32
    %c0_i32_1 = arith.constant 0 : i32
    return %arg0, %c0_i32, %c0_i32_0 : i32, i32, i32
  }
  func.func @transform_15(%arg0: i32) -> (i32, i32, i32) {
    %c0_i32 = arith.constant 0 : i32
    %c0_i32_0 = arith.constant 0 : i32
    %c0_i32_1 = arith.constant 0 : i32
    return %arg0, %c0_i32, %c0_i32_0 : i32, i32, i32
  }
  func.func @transform_16(%arg0: i32) -> (i32, i32, i32) {
    %c0_i32 = arith.constant 0 : i32
    %c0_i32_0 = arith.constant 0 : i32
    %c0_i32_1 = arith.constant 0 : i32
    return %arg0, %c0_i32, %c0_i32_0 : i32, i32, i32
  }
  func.func @transform_17(%arg0: i32) -> (i32, i32) {
    %c0_i32 = arith.constant 0 : i32
    %c0_i32_0 = arith.constant 0 : i32
    %c0_i32_1 = arith.constant 0 : i32
    return %c0_i32, %c0_i32_0 : i32, i32
  }
  func.func @transform_18(%arg0: i32) -> (i32, i32) {
    %c0_i32 = arith.constant 0 : i32
    %c0_i32_0 = arith.constant 0 : i32
    %c0_i32_1 = arith.constant 0 : i32
    return %c0_i32, %c0_i32_0 : i32, i32
  }
  func.func @transform_19(%arg0: i32) -> (i32, i32) {
    %c0_i32 = arith.constant 0 : i32
    %c0_i32_0 = arith.constant 0 : i32
    %c0_i32_1 = arith.constant 0 : i32
    return %c0_i32, %c0_i32_0 : i32, i32
  }
  func.func @transform_20(%arg0: i32) -> (i32, i32) {
    %c0_i32 = arith.constant 0 : i32
    %c0_i32_0 = arith.constant 0 : i32
    %c0_i32_1 = arith.constant 0 : i32
    return %c0_i32, %c0_i32_0 : i32, i32
  }
  func.func @transform_21(%arg0: i32) -> (i32, i32) {
    %c0_i32 = arith.constant 0 : i32
    %c0_i32_0 = arith.constant 0 : i32
    %c0_i32_1 = arith.constant 0 : i32
    return %c0_i32, %c0_i32_0 : i32, i32
  }
  func.func @transform_22(%arg0: i32) -> (i32, i32) {
    %c0_i32 = arith.constant 0 : i32
    %c0_i32_0 = arith.constant 0 : i32
    %c0_i32_1 = arith.constant 0 : i32
    return %c0_i32, %c0_i32_0 : i32, i32
  }
}

</mosaic_0001>

<bundles_post_ra>
// kernel: transformer_model_forward.1
= control target key start
LH: loop header
LB: loop body
LE: loop exit
PB: predicated region body
PF: predicated region fallthrough
CT: control target
= control target key end

     0   :  { %s9493_s0 = inlined_call_operand.vmem [shape: f32[16,4], index: 0, kind: input, shape index: {}]   ;;  %s9494_s1 = inlined_call_operand.hbm [shape: f32[4,256], index: 1, kind: input, shape index: {}]   ;;  %s9495_s2 = inlined_call_operand.hbm [shape: f32[1,256], index: 2, kind: input, shape index: {}]   ;;  %s9496_s3 = inlined_call_operand.hbm [shape: f32[8,256], index: 3, kind: input, shape index: {}]   ;;  %s9497_s4 = inlined_call_operand.vmem [shape: f32[128,128], index: 4, kind: input, shape index: {}]   ;;  %s9498_s5 = inlined_call_operand.hbm [shape: bf16[6,256,768], index: 5, kind: input, shape index: {}]   ;;  %s9499_s6 = inlined_call_operand.hbm [shape: f32[6,1,768], index: 6, kind: input, shape index: {}]   ;;  %s9500_s7 = inlined_call_operand.hbm [shape: bf16[6,256,256], index: 7, kind: input, shape index: {}]   ;;  %s9501_s8 = inlined_call_operand.hbm [shape: f32[6,1,256], index: 8, kind: input, shape index: {}]   ;;  %s9502_s9 = inlined_call_operand.hbm [shape: bf16[6,256,1024], index: 9, kind: input, shape index: {}]   ;;  %s9503_s10 = inlined_call_operand.hbm [shape: f32[6,1,1024], index: 10, kind: input, shape index: {}]   ;;  %s9504_s11 = inlined_call_operand.hbm [shape: bf16[6,1024,256], index: 11, kind: input, shape index: {}]   ;;  %s9505_s12 = inlined_call_operand.hbm [shape: f32[6,1,256], index: 12, kind: input, shape index: {}]   ;;  %s9506_s13 = inlined_call_operand.hbm [shape: f32[6,1,256], index: 13, kind: input, shape index: {}]   ;;  %s9507_s14 = inlined_call_operand.hbm [shape: f32[6,1,256], index: 14, kind: input, shape index: {}]   ;;  %s9508_s15 = inlined_call_operand.hbm [shape: f32[6,1,256], index: 15, kind: input, shape index: {}]   ;;  %s9509_s16 = inlined_call_operand.hbm [shape: f32[6,1,256], index: 16, kind: input, shape index: {}]   ;;  %s9510_s17 = inlined_call_operand.vmem [shape: f32[2,16], index: 17, kind: input, shape index: {}]   ;;  %s9511_s18 = inlined_call_operand.hbm [shape: f32[256,128], index: 18, kind: input, shape index: {}]   ;;  %s9512_s19 = inlined_call_operand.hbm [shape: f32[1,128], index: 19, kind: input, shape index: {}]   ;;  %s9513_s20 = inlined_call_operand.vmem [shape: f32[128,3], index: 20, kind: input, shape index: {}]   ;;  %s9514_s21 = inlined_call_operand.hbm [shape: f32[1,3], index: 21, kind: input, shape index: {}]   ;;  %s9515_s22 = inlined_call_operand.hbm [shape: f32[2,3], index: 22, kind: output, shape index: {}]  }
   0x1   :  { %9562 = sst [smem:[#allocation51_spill]] %s9493_s0 }
   0x2   :  { %9563 = sst [smem:[#allocation52_spill]] %s9494_s1 }
   0x3   :  { %9564 = sst [smem:[#allocation53_spill]] %s9495_s2 }
   0x4   :  { %9565 = sst [smem:[#allocation54_spill]] %s9496_s3 }
   0x5   :  { %9566 = sst [smem:[#allocation55_spill]] %s9497_s4 }
   0x6   :  { %9567 = sst [smem:[#allocation56_spill]] %s9498_s5 }
   0x7   :  { %9568 = sst [smem:[#allocation57_spill]] %s9499_s6 }
   0x8   :  { %9569 = sst [smem:[#allocation58_spill]] %s9500_s7 }
   0x9   :  { %9570 = sst [smem:[#allocation59_spill]] %s9501_s8 }
   0xa   :  { %9571 = sst [smem:[#allocation60_spill]] %s9502_s9 }
   0xb   :  { %9572 = sst [smem:[#allocation61_spill]] %s9505_s12 }
   0xc   :  { %9573 = sst [smem:[#allocation62_spill]] %s9507_s14 }
   0xd   :  { %9574 = sst [smem:[#allocation63_spill]] %s9509_s16 }
   0xe   :  { %9575 = sst [smem:[#allocation64_spill]] %s9510_s17 }
   0xf   :  { %9576 = sst [smem:[#allocation65_spill]] %s9511_s18 }
  0x10   :  { %9577 = sst [smem:[#allocation66_spill]] %s9513_s20 }
  0x11   :  { %9578 = sst [smem:[#allocation67_spill]] %s9515_s22 }
  0x12   :  { %27 = vsyncpa [#allocation4], 0 }
  0x13   :  { %28 = vsyncpa [#allocation7], 0 }
  0x14   :  { %29 = vsyncpa [#allocation10], 0 }
  0x15   :  { %31 = vsyncpa [#allocation10 + $0x1], 0 }
  0x16   :  { %32 = vsyncpa [#allocation13], 0 }
  0x17   :  { %34 = vsyncpa [#allocation13 + $0x1], 0 }
  0x18   :  { %35 = vsyncpa [#allocation16], 0 }
  0x19   :  { %37 = vsyncpa [#allocation16 + $0x1], 0 }
  0x1a   :  { %38 = vsyncpa [#allocation19], 0 }
  0x1b   :  { %40 = vsyncpa [#allocation19 + $0x1], 0 }
  0x1c   :  { %41 = vsyncpa [#allocation22], 0 }
  0x1d   :  { %43 = vsyncpa [#allocation22 + $0x1], 0 }
  0x1e   :  { %44 = vsyncpa [#allocation25], 0 }
  0x1f   :  { %46 = vsyncpa [#allocation25 + $0x1], 0 }
  0x20   :  { %47 = vsyncpa [#allocation28], 0 }
  0x21   :  { %48 = vsyncpa [#allocation31], 0 }
  0x22   :  { %49 = vsyncpa [#allocation5], 0  ;;  %s7923_s3 = smov 0   ;;  %s7925_s28 = smov 0  }
  0x23   :  { %s7927_s29 = smov 0   ;;  %s7929_s30 = smov 0  }
  0x24 LB: > { %9579 = sst [smem:[#allocation44_spill]] %s7766_s28  ;;  %s7776_s4 = smov [#allocation6]   ;;  %s7774_s30 = sphi %s7929_s30, %s9650_s30   ;;  %s7770_s29 = sphi %s7927_s29, %s9653_s29   ;;  %s7766_s28 = sphi %s7925_s28, %s9652_s28   ;;  %s7762_s3 = sphi %s7923_s3, %s9651_s3  }
  0x25   : > { %9580 = sst [smem:[#allocation45_spill]] %s7770_s29  ;;  %s630_s0 = sshll.u32 %s7776_s4, 4  ;;  %s631_s0 = int_to_ptr.vmem [resolvable:$true] %s630_s0 }
  0x26   : > { %s7944_s23 = sadd.s32 4294967295, %s7774_s30   ;;  %p5643_p0 = scmp.ge.s32.totalorder %s7774_s30, 1 }
  0x27   : > { %9581 = sst [smem:[#allocation46_spill]] %s7944_s23  ;;  %p9525_p1 = scmp.eq.s32.totalorder %s7944_s23, 0 }
  0x28   : > { %p603_p2 = scmp.lt.s32.totalorder %s7774_s30, 7  ;;  %s7777_s5 = smov [#allocation27]  }
  0x29   : > { %s657_s24 = sshll.u32 %s7777_s5, 4  ;;  %s9585_s2 = sld [smem:[#allocation53_spill]]  ;;  %s7956_s24 = int_to_ptr.vmem [resolvable:$true] %s657_s24 }
  0x2a   : > { %p7950_p4 = pnand %p5643_p0, %p603_p2 }
  0x2c   : > { %s9582_s1 = scalar_select %p7950_p4, 1, 0 }
  0x2d   : > { %p6442_p5 = pneg %p7950_p4 }
  0x2e   : > { %9583 = sst [smem:[#allocation47_spill]] %s9582_s1 }
  0x2f   : > { %p7960_p6 = pnand %p6442_p5, %p9525_p1  ;;  %s7146_s27 = scalar_lea.hbm %s9585_s2, 32 }
  0x30   : > { %p7147_p7 = scmp.ne.s32.totalorder %s9585_s2, %s7146_s27  ;;  %p7153_p11 = scmp.lt.u32.totalorder %s7146_s27, %s9585_s2 }
  0x31   : > { %s9584_s6 = scalar_select %p7960_p6, 1, 0 }
  0x32   : > { %p7972_p8 = pneg %p7960_p6 }
  0x34   : > { %s9586_s20 = scalar_select %p7972_p8, 1, 0 }
  0x35   : > { %p7149_p9 = pnand %p7972_p8, %p7147_p7 }
  0x37   : > { %p7150_p10 = pneg %p7149_p9 }
  0x39   : > { %p7155_p12 = pnand %p7153_p11, %p7150_p10 }
  0x3b   : > { %7158 = shalt.err (!%p7155_p12)
}
  0x3c   : > { %s7159_s25 = scalar_lea.vmem %s631_s0, 32  ;;  %p7167_p5 = scmp.lt.s32.totalorder %s631_s0, %s631_s0 }
  0x3d   : > { %p7160_p13 = scmp.ne.s32.totalorder %s631_s0, %s7159_s25  ;;  %p7168_p3 = scmp.lt.s32.totalorder %s7159_s25, %s7159_s25 }
  0x3f   : > { %p7162_p0 = pnand %p7160_p13, %p7972_p8  ;;  %p7169_p1 = por %p7168_p3, %p7167_p5 }
  0x41   : > { %p7163_p2 = pneg %p7162_p0 }
  0x43   : > { %p7170_p4 = pnand %p7169_p1, %p7163_p2 }
  0x45   : > { %7173 = shalt.err (!%p7170_p4)
}
  0x46   : > { %6448 = dma.hbm_to_vmem [thread:$0]  (!%p7960_p6), %s9585_s2, 32, %s631_s0, [#allocation7]  }
  0x47   : > { %s9587_s18 = sld [smem:[#allocation65_spill]] }
  0x4d   : > { %s7174_s4 = scalar_lea.hbm %s9587_s18, 4096 }
  0x4e   : > { %p7175_p7 = scmp.ne.s32.totalorder %s9587_s18, %s7174_s4  ;;  %p7181_p1 = scmp.lt.u32.totalorder %s7174_s4, %s9587_s18 }
  0x50   : > { %p7177_p9 = pnand %p7175_p7, %p7972_p8 }
  0x52   : > { %p7178_p3 = pneg %p7177_p9 }
  0x54   : > { %p7183_p4 = pnand %p7181_p1, %p7178_p3 }
  0x56   : > { %7186 = shalt.err (!%p7183_p4)
}
  0x57   : > { %s7187_s0 = scalar_lea.vmem %s7956_s24, 4096  ;;  %p7195_p13 = scmp.lt.s32.totalorder %s7956_s24, %s7956_s24 }
  0x58   : > { %p7188_p10 = scmp.ne.s32.totalorder %s7956_s24, %s7187_s0  ;;  %p7196_p0 = scmp.lt.s32.totalorder %s7187_s0, %s7187_s0 }
  0x5a   : > { %p7190_p11 = pnand %p7188_p10, %p7972_p8  ;;  %p7197_p2 = por %p7196_p0, %p7195_p13 }
  0x5c   : > { %p7191_p12 = pneg %p7190_p11 }
  0x5e   : > { %p7198_p5 = pnand %p7197_p2, %p7191_p12 }
  0x60   : > { %7201 = shalt.err (!%p7198_p5)
}
  0x61   : > { %s9529_s1 = smov 128   ;;  %s9531_s16 = smov 8  }
  0x62   : > { %6454 = dma.hbm_to_vmem [thread:$0]  (!%p7960_p6), %s9587_s18, 4096, %s7956_s24, [#allocation28], %s9529_s1, %s9529_s1, %s9531_s16  }
  0x63   : > { %s8015_s17 = sadd.s32 1, %s7774_s30   ;;  %s167_s27 = sadd.s32 1, %s7770_s29 }
  0x64   : > { %9588 = sst [smem:[#allocation48_spill]] %s8015_s17  ;;  %s164_s4 = ssub.s32 %s7774_s30, %s8015_s17 }
  0x65   : > { %p174_p7 = scmp.ne.s32.totalorder %s7770_s29, %s7766_s28  ;;  %p165_p9 = scmp.eq.s32.totalorder %s164_s4, 0 }
  0x66   : > { %p175_p3 = scmp.eq.s32.totalorder %s7774_s30, 0  ;;  %p180_p1 = scmp.ne.s32.totalorder %s7766_s28, %s7762_s3 }
  0x67   : > { %p6504_p4 = scmp.lt.s32.totalorder %s7774_s30, 6  ;;  %p9590_p11 = scmp.eq.s32.totalorder %s7944_s23, 0 }
  0x68   : > { %s8027_s5 = scalar_select %p165_p9, %s7770_s29, %s167_s27  }
  0x69   : > { %p176_p10 = por %p175_p3, %p174_p7  ;;  %p8031_p12 = por %p9590_p11, %p180_p1 }
  0x6a   : > { %9589 = sst [smem:[#allocation49_spill]] %s8027_s5  ;;  %s8036_s0 = sand.u32 1, %s7774_s30  }
  0x6b   : > { %s9591_s25 = scalar_select %p8031_p12, 1, 0 }
  0x6c   : > { %s8039_s24 = sand.u32 1, %s7770_s29   ;;  %s6385_s26 = smul.u32 12288, %s7774_s30 }
  0x6d   : > { %9592 = sst [smem:[#allocation50_spill]] %s9591_s25  ;;  %s6384_s22 = smul.u32 768, %s8039_s24 }
  0x6e   : > { %p8043_p13 = pnand %p6504_p4, %p176_p10  ;;  %s9594_s1 = sld [smem:[#allocation56_spill]] }
  0x6f   : > { %s700_s2 = scalar_lea.vmem [#allocation9], %s6384_s22 }
  0x70   : > { %s9593_s4 = scalar_select %p8043_p13, 1, 0 }
  0x71   : > { %s707_s18 = sshll.u32 %s700_s2, 4  ;;  %p8059_p2 = pneg %p8043_p13  ;;  %s8052_s18 = int_to_ptr.vmem [resolvable:$true] %s707_s18 }
  0x73   : > { %s9595_s17 = scalar_select %p8059_p2, 1, 0 }
  0x74   : > { %s8050_s16 = scalar_lea.hbm %s9594_s1, %s6385_s26  ;;  %s7207_s27 = scalar_lea.hbm %s9594_s1, 73728 }
  0x75   : > { %s7202_s29 = scalar_lea.hbm %s8050_s16, 12288  ;;  %p7208_p9 = scmp.lt.u32.totalorder %s8050_s16, %s9594_s1 }
  0x76   : > { %p7203_p0 = scmp.ne.s32.totalorder %s8050_s16, %s7202_s29  ;;  %p7209_p3 = scmp.lt.u32.totalorder %s7207_s27, %s7202_s29 }
  0x77   : > { %p7211_p4 = scmp.lt.u32.totalorder %s7202_s29, %s8050_s16 }
  0x78   : > { %p7205_p5 = pnand %p8059_p2, %p7203_p0  ;;  %p7210_p1 = por %p7209_p3, %p7208_p9 }
  0x7a   : > { %p7206_p7 = pneg %p7205_p5  ;;  %p7212_p10 = por %p7211_p4, %p7210_p1 }
  0x7c   : > { %p7213_p11 = pnand %p7212_p10, %p7206_p7 }
  0x7e   : > { %7216 = shalt.err (!%p7213_p11)
}
  0x7f   : > { %s7217_s5 = scalar_lea.vmem %s8052_s18, 12288  ;;  %s7780_s26 = smov [#allocation9]  }
  0x80   : > { %p7218_p0 = scmp.ne.s32.totalorder %s8052_s18, %s7217_s5  ;;  %s7222_s3 = sshll.u32 %s7780_s26, 4  ;;  %s7223_s3 = int_to_ptr.vmem [resolvable:$false] %s7222_s3 }
  0x81   : > { %s7224_s22 = scalar_lea.vmem %s7223_s3, 24576  ;;  %p7225_p6 = scmp.lt.s32.totalorder %s8052_s18, %s7223_s3 }
  0x82   : > { %p7220_p5 = pnand %p7218_p0, %p8059_p2  ;;  %p7226_p8 = scmp.lt.s32.totalorder %s7224_s22, %s7217_s5 }
  0x84   : > { %p7221_p12 = pneg %p7220_p5  ;;  %p7227_p9 = por %p7226_p8, %p7225_p6 }
  0x86   : > { %p7228_p3 = pnand %p7227_p9, %p7221_p12 }
  0x88   : > { %7231 = shalt.err (!%p7228_p3)
}
  0x89   : > { %s7781_s29 = smov 384   ;;  %s7782_s27 = smov 24  }
  0x8a   : > { %s9596_s2 = scalar_lea.sflag [#allocation10], %s8036_s0  ;;  %s5653_s26 = sshll.u32 %s8039_s24, 8 }
  0x8b   : > { %6464 = dma.hbm_to_vmem [thread:$0]  (!%p8043_p13), %s8050_s16, 12288, %s8052_s18, %s9596_s2, %s7781_s29, %s7781_s29, %s7782_s27  }
  0x8c   : > { %s6105_s3 = sshll.u32 %s7774_s30, 12  ;;  %s9597_s7 = sld [smem:[#allocation58_spill]] }
  0x8d   : > { %s740_s25 = scalar_lea.vmem [#allocation12], %s5653_s26  ;;  %s5659_s23 = sshll.u32 %s8039_s24, 10 }
  0x8e   : > { %s747_s28 = sshll.u32 %s740_s25, 4  ;;  %s9551_s14 = scalar_lea.sflag [#allocation13], %s8036_s0  ;;  %s8091_s28 = int_to_ptr.vmem [resolvable:$true] %s747_s28 }
  0x92   : > { %s8089_s1 = scalar_lea.hbm %s9597_s7, %s6105_s3  ;;  %s7237_s29 = scalar_lea.hbm %s9597_s7, 24576 }
  0x93   : > { %s7232_s12 = scalar_lea.hbm %s8089_s1, 4096  ;;  %p7238_p7 = scmp.lt.u32.totalorder %s8089_s1, %s9597_s7 }
  0x94   : > { %p7233_p6 = scmp.ne.s32.totalorder %s8089_s1, %s7232_s12  ;;  %p7239_p1 = scmp.lt.u32.totalorder %s7237_s29, %s7232_s12 }
  0x95   : > { %p7241_p10 = scmp.lt.u32.totalorder %s7232_s12, %s8089_s1 }
  0x96   : > { %p7235_p8 = pnand %p7233_p6, %p8059_p2  ;;  %p7240_p4 = por %p7239_p1, %p7238_p7 }
  0x98   : > { %p7236_p12 = pneg %p7235_p8  ;;  %p7242_p11 = por %p7241_p10, %p7240_p4 }
  0x9a   : > { %p7243_p0 = pnand %p7242_p11, %p7236_p12 }
  0x9c   : > { %7246 = shalt.err (!%p7243_p0)
}
  0x9d   : > { %s7247_s25 = scalar_lea.vmem %s8091_s28, 4096  ;;  %s7783_s26 = smov [#allocation12]  }
  0x9e   : > { %p7248_p5 = scmp.ne.s32.totalorder %s8091_s28, %s7247_s25  ;;  %s7252_s3 = sshll.u32 %s7783_s26, 4  ;;  %s7253_s3 = int_to_ptr.vmem [resolvable:$false] %s7252_s3 }
  0x9f   : > { %s7254_s5 = scalar_lea.vmem %s7253_s3, 8192  ;;  %p7255_p6 = scmp.lt.s32.totalorder %s8091_s28, %s7253_s3 }
  0xa0   : > { %p7250_p9 = pnand %p7248_p5, %p8059_p2  ;;  %p7256_p8 = scmp.lt.s32.totalorder %s7254_s5, %s7247_s25 }
  0xa2   : > { %p7251_p3 = pneg %p7250_p9  ;;  %p7257_p7 = por %p7256_p8, %p7255_p6 }
  0xa4   : > { %p7258_p1 = pnand %p7257_p7, %p7251_p3 }
  0xa6   : > { %7261 = shalt.err (!%p7258_p1)
}
  0xa7   : > { %s9598_s12 = smov 8   ;;  %s9599_s22 = smov 128  }
  0xa8   : > { %6470 = dma.hbm_to_vmem [thread:$0]  (!%p8043_p13), %s8089_s1, 4096, %s8091_s28, %s9551_s14, %s9599_s22, %s9599_s22, %s9598_s12  }
  0xa9   : > { %s6107_s18 = sshll.u32 %s7774_s30, 14  ;;  %s9600_s9 = sld [smem:[#allocation60_spill]] }
  0xaa   : > { %s780_s2 = scalar_lea.vmem [#allocation15], %s5659_s23  ;;  %s9558_s26 = scalar_lea.sflag [#allocation16], %s8036_s0 }
  0xab   : > { %s787_s25 = sshll.u32 %s780_s2, 4  ;;  %s8131_s25 = int_to_ptr.vmem [resolvable:$true] %s787_s25 }
  0xaf   : > { %s8127_s27 = scalar_lea.hbm %s9600_s9, %s6107_s18  ;;  %s7267_s5 = scalar_lea.hbm %s9600_s9, 98304 }
  0xb0   : > { %s7262_s3 = scalar_lea.hbm %s8127_s27, 16384  ;;  %p7268_p11 = scmp.lt.u32.totalorder %s8127_s27, %s9600_s9 }
  0xb1   : > { %p7263_p12 = scmp.ne.s32.totalorder %s8127_s27, %s7262_s3  ;;  %p7269_p0 = scmp.lt.u32.totalorder %s7267_s5, %s7262_s3 }
  0xb2   : > { %p7271_p9 = scmp.lt.u32.totalorder %s7262_s3, %s8127_s27 }
  0xb3   : > { %p7265_p4 = pnand %p7263_p12, %p8059_p2  ;;  %p7270_p5 = por %p7269_p0, %p7268_p11 }
  0xb5   : > { %p7266_p10 = pneg %p7265_p4  ;;  %p7272_p3 = por %p7271_p9, %p7270_p5 }
  0xb7   : > { %p7273_p6 = pnand %p7272_p3, %p7266_p10 }
  0xb9   : > { %7276 = shalt.err (!%p7273_p6)
}
  0xba   : > { %s7277_s2 = scalar_lea.vmem %s8131_s25, 16384  ;;  %s7784_s28 = smov [#allocation15]  }
  0xbb   : > { %p7278_p8 = scmp.ne.s32.totalorder %s8131_s25, %s7277_s2  ;;  %s7282_s1 = sshll.u32 %s7784_s28, 4  ;;  %s7283_s1 = int_to_ptr.vmem [resolvable:$false] %s7282_s1 }
  0xbc   : > { %s7284_s16 = scalar_lea.vmem %s7283_s1, 32768  ;;  %p7285_p12 = scmp.lt.s32.totalorder %s8131_s25, %s7283_s1 }
  0xbd   : > { %p7280_p7 = pnand %p7278_p8, %p8059_p2  ;;  %p7286_p4 = scmp.lt.s32.totalorder %s7284_s16, %s7277_s2 }
  0xbf   : > { %p7281_p1 = pneg %p7280_p7  ;;  %p7287_p11 = por %p7286_p4, %p7285_p12 }
  0xc1   : > { %p7288_p0 = pnand %p7287_p11, %p7281_p1 }
  0xc3   : > { %7291 = shalt.err (!%p7288_p0)
}
  0xc4   : > { %s7785_s3 = smov 512   ;;  %s7786_s5 = smov 32  }
  0xc5   : > { %6476 = dma.hbm_to_vmem [thread:$0]  (!%p8043_p13), %s8127_s27, 16384, %s8131_s25, %s9558_s26, %s7785_s3, %s7785_s3, %s7786_s5  }
  0xc6   : > { %s8162_s28 = scalar_lea.hbm %s9504_s11, %s6107_s18  ;;  %s820_s1 = scalar_lea.vmem [#allocation18], %s5659_s23 }
  0xc7   : > { %s827_s16 = sshll.u32 %s820_s1, 4  ;;  %s8167_s14 = sshll.u32 %s8039_s24, 1  ;;  %s8169_s16 = int_to_ptr.vmem [resolvable:$true] %s827_s16 }
  0xc8   : > { %s8172_s7 = sshll.u32 %s7774_s30, 5  ;;  %s9555_s27 = scalar_lea.sflag [#allocation19], %s8036_s0 }
  0xc9   : > { %s7292_s25 = scalar_lea.hbm %s8162_s28, 16384  ;;  %s7297_s5 = scalar_lea.hbm %s9504_s11, 98304 }
  0xca   : > { %p7293_p10 = scmp.ne.s32.totalorder %s8162_s28, %s7292_s25  ;;  %p7298_p3 = scmp.lt.u32.totalorder %s8162_s28, %s9504_s11 }
  0xcb   : > { %p7299_p6 = scmp.lt.u32.totalorder %s7297_s5, %s7292_s25  ;;  %p7301_p7 = scmp.lt.u32.totalorder %s7292_s25, %s8162_s28 }
  0xcc   : > { %p7295_p5 = pnand %p7293_p10, %p8059_p2 }
  0xcd   : > { %p7300_p8 = por %p7299_p6, %p7298_p3 }
  0xce   : > { %p7296_p9 = pneg %p7295_p5 }
  0xcf   : > { %p7302_p1 = por %p7301_p7, %p7300_p8 }
  0xd1   : > { %p7303_p12 = pnand %p7302_p1, %p7296_p9 }
  0xd3   : > { %7306 = shalt.err (!%p7303_p12)
}
  0xd4   : > { %s7307_s23 = scalar_lea.vmem %s8169_s16, 16384  ;;  %s7787_s1 = smov [#allocation18]  }
  0xd5   : > { %p7308_p4 = scmp.ne.s32.totalorder %s8169_s16, %s7307_s23  ;;  %s7312_s18 = sshll.u32 %s7787_s1, 4  ;;  %s7313_s18 = int_to_ptr.vmem [resolvable:$false] %s7312_s18 }
  0xd6   : > { %s7314_s3 = scalar_lea.vmem %s7313_s18, 32768  ;;  %p7315_p10 = scmp.lt.s32.totalorder %s8169_s16, %s7313_s18 }
  0xd7   : > { %p7310_p11 = pnand %p7308_p4, %p8059_p2  ;;  %p7316_p5 = scmp.lt.s32.totalorder %s7314_s3, %s7307_s23 }
  0xd9   : > { %p7311_p0 = pneg %p7310_p11  ;;  %p7317_p3 = por %p7316_p5, %p7315_p10 }
  0xdb   : > { %p7318_p6 = pnand %p7317_p3, %p7311_p0 }
  0xdd   : > { %7321 = shalt.err (!%p7318_p6)
}
  0xde   : > { %6482 = dma.hbm_to_vmem [thread:$0]  (!%p8043_p13), %s8162_s28, 16384, %s8169_s16, %s9555_s27, %s9599_s22, %s9599_s22, %s9598_s12  }
  0xdf   : > { %s8205_s29 = scalar_lea.hbm %s9506_s13, %s8172_s7  ;;  %s860_s2 = scalar_lea.vmem [#allocation21], %s8167_s14 }
  0xe0   : > { %s868_s23 = sshll.u32 %s860_s2, 4  ;;  %s9554_s1 = scalar_lea.sflag [#allocation22], %s8036_s0  ;;  %s869_s23 = int_to_ptr.vmem [resolvable:$true] %s868_s23 }
  0xe1   : > { %s7322_s18 = scalar_lea.hbm %s8205_s29, 32  ;;  %s7327_s22 = scalar_lea.hbm %s9506_s13, 192 }
  0xe2   : > { %p7323_p9 = scmp.ne.s32.totalorder %s8205_s29, %s7322_s18  ;;  %p7328_p1 = scmp.lt.u32.totalorder %s8205_s29, %s9506_s13 }
  0xe3   : > { %p7329_p12 = scmp.lt.u32.totalorder %s7327_s22, %s7322_s18  ;;  %p7331_p11 = scmp.lt.u32.totalorder %s7322_s18, %s8205_s29 }
  0xe4   : > { %p7325_p8 = pnand %p7323_p9, %p8059_p2 }
  0xe5   : > { %p7330_p4 = por %p7329_p12, %p7328_p1 }
  0xe6   : > { %p7326_p7 = pneg %p7325_p8 }
  0xe7   : > { %p7332_p0 = por %p7331_p11, %p7330_p4 }
  0xe9   : > { %p7333_p10 = pnand %p7332_p0, %p7326_p7 }
  0xeb   : > { %7336 = shalt.err (!%p7333_p10)
}
  0xec   : > { %s7337_s25 = scalar_lea.vmem %s869_s23, 32  ;;  %s7788_s5 = smov [#allocation21]  }
  0xed   : > { %p7338_p5 = scmp.ne.s32.totalorder %s869_s23, %s7337_s25  ;;  %s7342_s2 = sshll.u32 %s7788_s5, 4  ;;  %s7343_s2 = int_to_ptr.vmem [resolvable:$false] %s7342_s2 }
  0xee   : > { %s7344_s3 = scalar_lea.vmem %s7343_s2, 64  ;;  %p7345_p9 = scmp.lt.s32.totalorder %s869_s23, %s7343_s2 }
  0xef   : > { %p7340_p3 = pnand %p7338_p5, %p8059_p2  ;;  %p7346_p8 = scmp.lt.s32.totalorder %s7344_s3, %s7337_s25 }
  0xf1   : > { %p7341_p6 = pneg %p7340_p3  ;;  %p7347_p13 = por %p7346_p8, %p7345_p9 }
  0xf3   : > { %p7348_p1 = pnand %p7347_p13, %p7341_p6 }
  0xf5   : > { %7351 = shalt.err (!%p7348_p1)
}
  0xf6   : > { %p9601_p12 = scmp.ne.s32.totalorder %s9593_s4, 0  ;;  %s8232_s22 = scalar_lea.hbm %s9508_s15, %s8172_s7 }
  0xf7   : > { %s898_s28 = scalar_lea.vmem [#allocation24], %s8167_s14  ;;  %s7789_s25 = smov [#allocation3]  }
  0xf8   : > { %6488 = dma.hbm_to_vmem [thread:$0]  (!%p9601_p12), %s8205_s29, 32, %s869_s23, %s9554_s1  }
  0xf9   : > { %s906_s16 = sshll.u32 %s898_s28, 4  ;;  %s8237_s5 = sshll.u32 %s7789_s25, 4  ;;  %s8235_s16 = int_to_ptr.vmem [resolvable:$true] %s906_s16  ;;  %s620_s5 = int_to_ptr.vmem [resolvable:$true] %s8237_s5 }
  0xfa   : > { %s9557_s2 = scalar_lea.sflag [#allocation25], %s8036_s0  ;;  %s7352_s3 = scalar_lea.hbm %s8232_s22, 32 }
  0xfb   : > { %p7353_p13 = scmp.ne.s32.totalorder %s8232_s22, %s7352_s3  ;;  %s7357_s18 = scalar_lea.hbm %s9508_s15, 192 }
  0xfc   : > { %p7358_p11 = scmp.lt.u32.totalorder %s8232_s22, %s9508_s15  ;;  %p7359_p0 = scmp.lt.u32.totalorder %s7357_s18, %s7352_s3 }
  0xfd   : > { %p7355_p7 = pnand %p7353_p13, %p8059_p2  ;;  %p7361_p5 = scmp.lt.u32.totalorder %s7352_s3, %s8232_s22 }
  0xfe   : > { %p7360_p10 = por %p7359_p0, %p7358_p11 }
  0xff   : > { %p7356_p4 = pneg %p7355_p7 }
 0x100   : > { %p7362_p3 = por %p7361_p5, %p7360_p10 }
 0x102   : > { %p7363_p6 = pnand %p7362_p3, %p7356_p4 }
 0x104   : > { %7366 = shalt.err (!%p7363_p6)
}
 0x105   : > { %s7367_s28 = scalar_lea.vmem %s8235_s16, 32  ;;  %s7790_s25 = smov [#allocation24]  }
 0x106   : > { %p7368_p9 = scmp.ne.s32.totalorder %s8235_s16, %s7367_s28  ;;  %s7372_s29 = sshll.u32 %s7790_s25, 4  ;;  %s7373_s29 = int_to_ptr.vmem [resolvable:$false] %s7372_s29 }
 0x107   : > { %s7374_s1 = scalar_lea.vmem %s7373_s29, 64  ;;  %p7375_p13 = scmp.lt.s32.totalorder %s8235_s16, %s7373_s29 }
 0x108   : > { %p7370_p8 = pnand %p7368_p9, %p8059_p2  ;;  %p7376_p7 = scmp.lt.s32.totalorder %s7374_s1, %s7367_s28 }
 0x10a   : > { %p7371_p1 = pneg %p7370_p8  ;;  %p7377_p11 = por %p7376_p7, %p7375_p13 }
 0x10c   : > { %p7378_p0 = pnand %p7377_p11, %p7371_p1 }
 0x10e   : > { %7381 = shalt.err (!%p7378_p0)
}
 0x10f   : > { %6494 = dma.hbm_to_vmem [thread:$0]  (!%p9601_p12), %s8232_s22, 32, %s8235_s16, %s9557_s2  }
 0x110   : > { %s9602_s18 = sld [smem:[#allocation52_spill]]  ;;  %p9603_p10 = scmp.ne.s32.totalorder %s9586_s20, 0 }
 0x116   : > { %s7382_s12 = scalar_lea.hbm %s9602_s18, 128 }
 0x117   : > { %p7383_p4 = scmp.ne.s32.totalorder %s9602_s18, %s7382_s12  ;;  %p7389_p6 = scmp.lt.u32.totalorder %s7382_s12, %s9602_s18 }
 0x119   : > { %p7385_p5 = pnand %p7383_p4, %p9603_p10 }
 0x11b   : > { %p7386_p3 = pneg %p7385_p5 }
 0x11d   : > { %p7391_p9 = pnand %p7389_p6, %p7386_p3 }
 0x11f   : > { %7394 = shalt.err (!%p7391_p9)
}
 0x120   : > { %s7395_s27 = scalar_lea.vmem %s620_s5, 128  ;;  %p7403_p7 = scmp.lt.s32.totalorder %s620_s5, %s620_s5 }
 0x121   : > { %p7396_p8 = scmp.ne.s32.totalorder %s620_s5, %s7395_s27  ;;  %p7404_p11 = scmp.lt.s32.totalorder %s7395_s27, %s7395_s27 }
 0x123   : > { %p7398_p1 = pnand %p7396_p8, %p9603_p10  ;;  %p7405_p0 = por %p7404_p11, %p7403_p7 }
 0x125   : > { %p7399_p13 = pneg %p7398_p1 }
 0x127   : > { %p7406_p12 = pnand %p7405_p0, %p7399_p13 }
 0x129   : > { %7409 = shalt.err (!%p7406_p12)
}
 0x12a   : > { %p9604_p4 = scmp.ne.s32.totalorder %s9584_s6, 0  ;;  %s7791_s3 = smov [#allocation8]  }
 0x12b   : > { %s641_s23 = sshll.u32 %s7791_s3, 4  ;;  %s7792_s12 = smov [#allocation29]   ;;  %s642_s23 = int_to_ptr.vmem [resolvable:$true] %s641_s23 }
 0x12c   : > { %6445 = dma.hbm_to_vmem [thread:$0]  (!%p9604_p4), %s9602_s18, 128, %s620_s5, [#allocation4]  }
 0x12d   : > { %s671_s25 = sshll.u32 %s7792_s12, 4  ;;  %s9605_s1 = sld [smem:[#allocation54_spill]]  ;;  %s672_s25 = int_to_ptr.vmem [resolvable:$true] %s671_s25 }
 0x133   : > { %s7410_s2 = scalar_lea.hbm %s9605_s1, 256 }
 0x134   : > { %p7411_p12 = scmp.ne.s32.totalorder %s9605_s1, %s7410_s2  ;;  %p7417_p6 = scmp.lt.u32.totalorder %s7410_s2, %s9605_s1 }
 0x136   : > { %p7413_p5 = pnand %p7411_p12, %p9603_p10 }
 0x138   : > { %p7414_p3 = pneg %p7413_p5 }
 0x13a   : > { %p7419_p9 = pnand %p7417_p6, %p7414_p3 }
 0x13c   : > { %7422 = shalt.err (!%p7419_p9)
}
 0x13d   : > { %s7423_s5 = scalar_lea.vmem %s642_s23, 256  ;;  %p7431_p7 = scmp.lt.s32.totalorder %s642_s23, %s642_s23 }
 0x13e   : > { %p7424_p8 = scmp.ne.s32.totalorder %s642_s23, %s7423_s5  ;;  %p7432_p11 = scmp.lt.s32.totalorder %s7423_s5, %s7423_s5 }
 0x140   : > { %p7426_p1 = pnand %p7424_p8, %p9603_p10  ;;  %p7433_p0 = por %p7432_p11, %p7431_p7 }
 0x142   : > { %p7427_p13 = pneg %p7426_p1 }
 0x144   : > { %p7434_p2 = pnand %p7433_p0, %p7427_p13 }
 0x146   : > { %7437 = shalt.err (!%p7434_p2)
}
 0x147   : > { %6451 = dma.hbm_to_vmem [thread:$0]  (!%p9604_p4), %s9605_s1, 256, %s642_s23, [#allocation7]  }
 0x148   : > { %s7438_s3 = scalar_lea.hbm %s9512_s19, 16 }
 0x149   : > { %p7439_p12 = scmp.ne.s32.totalorder %s9512_s19, %s7438_s3  ;;  %p7445_p2 = scmp.lt.u32.totalorder %s7438_s3, %s9512_s19 }
 0x14b   : > { %p7441_p5 = pnand %p7439_p12, %p9603_p10 }
 0x14d   : > { %p7442_p3 = pneg %p7441_p5 }
 0x14f   : > { %p7447_p6 = pnand %p7445_p2, %p7442_p3 }
 0x151   : > { %7450 = shalt.err (!%p7447_p6)
}
 0x152   : > { %s7451_s22 = scalar_lea.vmem %s672_s25, 16  ;;  %s7458_s23 = scalar_lea.vmem %s672_s25, 32 }
 0x153   : > { %p7452_p9 = scmp.ne.s32.totalorder %s672_s25, %s7451_s22  ;;  %p7459_p13 = scmp.lt.s32.totalorder %s672_s25, %s672_s25 }
 0x154   : > { %p7460_p7 = scmp.lt.s32.totalorder %s7458_s23, %s7451_s22 }
 0x155   : > { %p7454_p8 = pnand %p7452_p9, %p9603_p10 }
 0x156   : > { %p7461_p11 = por %p7460_p7, %p7459_p13 }
 0x157   : > { %p7455_p1 = pneg %p7454_p8 }
 0x159   : > { %p7462_p0 = pnand %p7461_p11, %p7455_p1 }
 0x15b   : > { %7465 = shalt.err (!%p7462_p0)
}
 0x15c   : > { %6457 = dma.hbm_to_vmem [thread:$0]  (!%p9604_p4), %s9512_s19, 16, %s672_s25, [#allocation28]  }
 0x15d   : > { %s7793_s16 = smov [#allocation30]   ;;  %s6386_s2 = smul.u32 6, %s8039_s24 }
 0x15e   : > { %s685_s9 = sshll.u32 %s7793_s16, 4  ;;  %s6387_s3 = smul.u32 96, %s7774_s30  ;;  %s686_s9 = int_to_ptr.vmem [resolvable:$true] %s685_s9 }
 0x15f   : > { %s7466_s28 = scalar_lea.hbm %s9514_s21, 16 }
 0x160   : > { %p7467_p12 = scmp.ne.s32.totalorder %s9514_s21, %s7466_s28  ;;  %p7473_p2 = scmp.lt.u32.totalorder %s7466_s28, %s9514_s21 }
 0x162   : > { %p7469_p5 = pnand %p7467_p12, %p9603_p10 }
 0x164   : > { %p7470_p3 = pneg %p7469_p5 }
 0x166   : > { %p7475_p6 = pnand %p7473_p2, %p7470_p3 }
 0x168   : > { %7478 = shalt.err (!%p7475_p6)
}
 0x169   : > { %s7479_s25 = scalar_lea.vmem %s686_s9, 16  ;;  %s7486_s26 = scalar_lea.vmem %s686_s9, 32 }
 0x16a   : > { %p7480_p9 = scmp.ne.s32.totalorder %s686_s9, %s7479_s25  ;;  %p7487_p13 = scmp.lt.s32.totalorder %s686_s9, %s686_s9 }
 0x16b   : > { %p7488_p7 = scmp.lt.s32.totalorder %s7486_s26, %s7479_s25 }
 0x16c   : > { %p7482_p8 = pnand %p7480_p9, %p9603_p10 }
 0x16d   : > { %p7489_p11 = por %p7488_p7, %p7487_p13 }
 0x16e   : > { %p7483_p1 = pneg %p7482_p8 }
 0x170   : > { %p7490_p0 = pnand %p7489_p11, %p7483_p1 }
 0x172   : > { %7493 = shalt.err (!%p7490_p0)
}
 0x173   : > { %6460 = dma.hbm_to_vmem [thread:$0]  (!%p9604_p4), %s9514_s21, 16, %s686_s9, [#allocation31]  }
 0x174   : > { %s9606_s27 = sld [smem:[#allocation57_spill]]  ;;  %s721_s22 = scalar_lea.vmem [#allocation11], %s6386_s2 }
 0x175   : > { %s729_s23 = sshll.u32 %s721_s22, 4  ;;  %s9607_s8 = sld [smem:[#allocation59_spill]]  ;;  %s730_s23 = int_to_ptr.vmem [resolvable:$true] %s729_s23 }
 0x176   : > { %p9608_p4 = scmp.ne.s32.totalorder %s9595_s17, 0 }
 0x17a   : > { %s8341_s20 = scalar_lea.hbm %s9606_s27, %s6387_s3  ;;  %s7499_s16 = scalar_lea.hbm %s9606_s27, 576 }
 0x17b   : > { %s8347_s25 = scalar_lea.hbm %s9607_s8, %s8172_s7  ;;  %s7494_s26 = scalar_lea.hbm %s8341_s20, 96 }
 0x17c   : > { %p7495_p10 = scmp.ne.s32.totalorder %s8341_s20, %s7494_s26  ;;  %p7500_p3 = scmp.lt.u32.totalorder %s8341_s20, %s9606_s27 }
 0x17d   : > { %p7501_p2 = scmp.lt.u32.totalorder %s7499_s16, %s7494_s26  ;;  %p7503_p9 = scmp.lt.u32.totalorder %s7494_s26, %s8341_s20 }
 0x17e   : > { %p7497_p12 = pnand %p7495_p10, %p9608_p4 }
 0x17f   : > { %p7502_p6 = por %p7501_p2, %p7500_p3 }
 0x180   : > { %p7498_p5 = pneg %p7497_p12 }
 0x181   : > { %p7504_p8 = por %p7503_p9, %p7502_p6 }
 0x183   : > { %p7505_p1 = pnand %p7504_p8, %p7498_p5 }
 0x185   : > { %7508 = shalt.err (!%p7505_p1)
}
 0x186   : > { %s7509_s2 = scalar_lea.vmem %s730_s23, 96  ;;  %s7794_s28 = smov [#allocation11]  }
 0x187   : > { %p7510_p13 = scmp.ne.s32.totalorder %s730_s23, %s7509_s2  ;;  %s7514_s22 = sshll.u32 %s7794_s28, 4  ;;  %s7515_s22 = int_to_ptr.vmem [resolvable:$false] %s7514_s22 }
 0x188   : > { %s7516_s5 = scalar_lea.vmem %s7515_s22, 192  ;;  %p7517_p0 = scmp.lt.s32.totalorder %s730_s23, %s7515_s22 }
 0x189   : > { %p7512_p7 = pnand %p7510_p13, %p9608_p4  ;;  %p7518_p10 = scmp.lt.s32.totalorder %s7516_s5, %s7509_s2 }
 0x18b   : > { %p7513_p11 = pneg %p7512_p7  ;;  %p7519_p12 = por %p7518_p10, %p7517_p0 }
 0x18d   : > { %p7520_p2 = pnand %p7519_p12, %p7513_p11 }
 0x18f   : > { %7523 = shalt.err (!%p7520_p2)
}
 0x190   : > { %p9609_p3 = scmp.ne.s32.totalorder %s9593_s4, 0  ;;  %s9610_s6 = scalar_lea.sflag [#allocation10], %s8036_s0 }
 0x191   : > { %s761_s26 = scalar_lea.vmem [#allocation14], %s8167_s14  ;;  %s5662_s3 = sshll.u32 %s8039_s24, 3 }
 0x192   : > { %6467 = dma.hbm_to_vmem [thread:$0]  (!%p9609_p3), %s8341_s20, 96, %s730_s23, %s9610_s6  }
 0x193   : > { %s769_s9 = sshll.u32 %s761_s26, 4  ;;  %s7524_s16 = scalar_lea.hbm %s8347_s25, 32  ;;  %s770_s9 = int_to_ptr.vmem [resolvable:$true] %s769_s9 }
 0x194   : > { %p7525_p5 = scmp.ne.s32.totalorder %s8347_s25, %s7524_s16  ;;  %s7529_s2 = scalar_lea.hbm %s9607_s8, 192 }
 0x195   : > { %p7530_p8 = scmp.lt.u32.totalorder %s8347_s25, %s9607_s8  ;;  %p7531_p1 = scmp.lt.u32.totalorder %s7529_s2, %s7524_s16 }
 0x196   : > { %p7527_p6 = pnand %p7525_p5, %p9608_p4  ;;  %p7533_p7 = scmp.lt.u32.totalorder %s7524_s16, %s8347_s25 }
 0x197   : > { %p7532_p13 = por %p7531_p1, %p7530_p8 }
 0x198   : > { %p7528_p9 = pneg %p7527_p6 }
 0x199   : > { %p7534_p11 = por %p7533_p7, %p7532_p13 }
 0x19b   : > { %p7535_p0 = pnand %p7534_p11, %p7528_p9 }
 0x19d   : > { %7538 = shalt.err (!%p7535_p0)
}
 0x19e   : > { %s7539_s20 = scalar_lea.vmem %s770_s9, 32  ;;  %s7795_s23 = smov [#allocation14]  }
 0x19f   : > { %p7540_p10 = scmp.ne.s32.totalorder %s770_s9, %s7539_s20  ;;  %s7544_s5 = sshll.u32 %s7795_s23, 4  ;;  %s7545_s5 = int_to_ptr.vmem [resolvable:$false] %s7544_s5 }
 0x1a0   : > { %s7546_s6 = scalar_lea.vmem %s7545_s5, 64  ;;  %p7547_p5 = scmp.lt.s32.totalorder %s770_s9, %s7545_s5 }
 0x1a1   : > { %p7542_p12 = pnand %p7540_p10, %p9608_p4  ;;  %p7548_p6 = scmp.lt.s32.totalorder %s7546_s6, %s7539_s20 }
 0x1a3   : > { %p7543_p2 = pneg %p7542_p12  ;;  %p7549_p3 = por %p7548_p6, %p7547_p5 }
 0x1a5   : > { %p7550_p1 = pnand %p7549_p3, %p7543_p2 }
 0x1a7   : > { %7553 = shalt.err (!%p7550_p1)
}
 0x1a8   : > { %p9611_p8 = scmp.ne.s32.totalorder %s9593_s4, 0  ;;  %s9612_s26 = scalar_lea.sflag [#allocation13], %s8036_s0 }
 0x1a9   : > { %s6108_s16 = sshll.u32 %s7774_s30, 7  ;;  %s801_s12 = scalar_lea.vmem [#allocation17], %s5662_s3 }
 0x1aa   : > { %6473 = dma.hbm_to_vmem [thread:$0]  (!%p9611_p8), %s8347_s25, 32, %s770_s9, %s9612_s26  }
 0x1ab   : > { %s809_s29 = sshll.u32 %s801_s12, 4  ;;  %s807_s22 = scalar_lea.hbm %s9503_s10, %s6108_s16  ;;  %s810_s29 = int_to_ptr.vmem [resolvable:$true] %s809_s29 }
 0x1ac   : > { %s7554_s20 = scalar_lea.hbm %s807_s22, 128  ;;  %s7559_s6 = scalar_lea.hbm %s9503_s10, 768 }
 0x1ad   : > { %p7555_p3 = scmp.ne.s32.totalorder %s807_s22, %s7554_s20  ;;  %p7560_p7 = scmp.lt.u32.totalorder %s807_s22, %s9503_s10 }
 0x1ae   : > { %p7561_p11 = scmp.lt.u32.totalorder %s7559_s6, %s7554_s20  ;;  %p7563_p10 = scmp.lt.u32.totalorder %s7554_s20, %s807_s22 }
 0x1af   : > { %p7557_p9 = pnand %p7555_p3, %p9608_p4 }
 0x1b0   : > { %p7562_p0 = por %p7561_p11, %p7560_p7 }
 0x1b1   : > { %p7558_p13 = pneg %p7557_p9 }
 0x1b2   : > { %p7564_p12 = por %p7563_p10, %p7562_p0 }
 0x1b4   : > { %p7565_p2 = pnand %p7564_p12, %p7558_p13 }
 0x1b6   : > { %7568 = shalt.err (!%p7565_p2)
}
 0x1b7   : > { %s7569_s30 = scalar_lea.vmem %s810_s29, 128  ;;  %s7796_s24 = smov [#allocation17]  }
 0x1b8   : > { %p7570_p5 = scmp.ne.s32.totalorder %s810_s29, %s7569_s30  ;;  %s7574_s9 = sshll.u32 %s7796_s24, 4  ;;  %s7575_s9 = int_to_ptr.vmem [resolvable:$false] %s7574_s9 }
 0x1b9   : > { %s7576_s3 = scalar_lea.vmem %s7575_s9, 256  ;;  %p7577_p3 = scmp.lt.s32.totalorder %s810_s29, %s7575_s9 }
 0x1ba   : > { %p7572_p6 = pnand %p7570_p5, %p9608_p4  ;;  %p7578_p9 = scmp.lt.s32.totalorder %s7576_s3, %s7569_s30 }
 0x1bc   : > { %p7573_p1 = pneg %p7572_p6  ;;  %p7579_p8 = por %p7578_p9, %p7577_p3 }
 0x1be   : > { %p7580_p7 = pnand %p7579_p8, %p7573_p1 }
 0x1c0   : > { %7583 = shalt.err (!%p7580_p7)
}
 0x1c1   : > { %p9613_p11 = scmp.ne.s32.totalorder %s9593_s4, 0  ;;  %s9614_s1 = scalar_lea.sflag [#allocation16], %s8036_s0 }
 0x1c2   : > { %s9615_s12 = sld [smem:[#allocation61_spill]]  ;;  %s841_s28 = scalar_lea.vmem [#allocation20], %s8167_s14 }
 0x1c3   : > { %6479 = dma.hbm_to_vmem [thread:$0]  (!%p9613_p11), %s807_s22, 128, %s810_s29, %s9614_s1  }
 0x1c4   : > { %s849_s20 = sshll.u32 %s841_s28, 4  ;;  %s9616_s6 = sld [smem:[#allocation62_spill]]  ;;  %s850_s20 = int_to_ptr.vmem [resolvable:$true] %s849_s20 }
 0x1c8   : > { %s8413_s2 = scalar_lea.hbm %s9615_s12, %s8172_s7  ;;  %s7589_s24 = scalar_lea.hbm %s9615_s12, 192 }
 0x1c9   : > { %s7584_s30 = scalar_lea.hbm %s8413_s2, 32  ;;  %p7590_p10 = scmp.lt.u32.totalorder %s8413_s2, %s9615_s12 }
 0x1ca   : > { %s8420_s25 = scalar_lea.hbm %s9616_s6, %s8172_s7  ;;  %p7585_p8 = scmp.ne.s32.totalorder %s8413_s2, %s7584_s30 }
 0x1cb   : > { %p7591_p12 = scmp.lt.u32.totalorder %s7589_s24, %s7584_s30  ;;  %p7593_p5 = scmp.lt.u32.totalorder %s7584_s30, %s8413_s2 }
 0x1cc   : > { %p7587_p13 = pnand %p7585_p8, %p9608_p4 }
 0x1cd   : > { %p7592_p2 = por %p7591_p12, %p7590_p10 }
 0x1ce   : > { %p7588_p0 = pneg %p7587_p13 }
 0x1cf   : > { %p7594_p6 = por %p7593_p5, %p7592_p2 }
 0x1d1   : > { %p7595_p1 = pnand %p7594_p6, %p7588_p0 }
 0x1d3   : > { %7598 = shalt.err (!%p7595_p1)
}
 0x1d4   : > { %s7599_s1 = scalar_lea.vmem %s850_s20, 32  ;;  %s7797_s26 = smov [#allocation20]  }
 0x1d5   : > { %p7600_p3 = scmp.ne.s32.totalorder %s850_s20, %s7599_s1  ;;  %s7604_s16 = sshll.u32 %s7797_s26, 4  ;;  %s7605_s16 = int_to_ptr.vmem [resolvable:$false] %s7604_s16 }
 0x1d6   : > { %s7606_s28 = scalar_lea.vmem %s7605_s16, 64  ;;  %p7607_p8 = scmp.lt.s32.totalorder %s850_s20, %s7605_s16 }
 0x1d7   : > { %p7602_p9 = pnand %p7600_p3, %p9608_p4  ;;  %p7608_p13 = scmp.lt.s32.totalorder %s7606_s28, %s7599_s1 }
 0x1d9   : > { %p7603_p7 = pneg %p7602_p9  ;;  %p7609_p11 = por %p7608_p13, %p7607_p8 }
 0x1db   : > { %p7610_p10 = pnand %p7609_p11, %p7603_p7 }
 0x1dd   : > { %7613 = shalt.err (!%p7610_p10)
}
 0x1de   : > { %p9617_p12 = scmp.ne.s32.totalorder %s9593_s4, 0  ;;  %s9618_s23 = scalar_lea.sflag [#allocation19], %s8036_s0 }
 0x1df   : > { %s879_s5 = scalar_lea.vmem [#allocation23], %s8167_s14  ;;  %s9619_s24 = sld [smem:[#allocation63_spill]] }
 0x1e0   : > { %6485 = dma.hbm_to_vmem [thread:$0]  (!%p9617_p12), %s8413_s2, 32, %s850_s20, %s9618_s23  }
 0x1e1   : > { %s887_s30 = sshll.u32 %s879_s5, 4  ;;  %s7614_s3 = scalar_lea.hbm %s8420_s25, 32  ;;  %s888_s30 = int_to_ptr.vmem [resolvable:$true] %s887_s30 }
 0x1e2   : > { %p7615_p11 = scmp.ne.s32.totalorder %s8420_s25, %s7614_s3  ;;  %s7619_s16 = scalar_lea.hbm %s9616_s6, 192 }
 0x1e3   : > { %p7620_p5 = scmp.lt.u32.totalorder %s8420_s25, %s9616_s6  ;;  %p7621_p6 = scmp.lt.u32.totalorder %s7619_s16, %s7614_s3 }
 0x1e4   : > { %p7617_p0 = pnand %p7615_p11, %p9608_p4  ;;  %p7623_p3 = scmp.lt.u32.totalorder %s7614_s3, %s8420_s25 }
 0x1e5   : > { %s8446_s9 = scalar_lea.hbm %s9619_s24, %s8172_s7  ;;  %p7622_p1 = por %p7621_p6, %p7620_p5 }
 0x1e6   : > { %p7618_p2 = pneg %p7617_p0 }
 0x1e7   : > { %p7624_p9 = por %p7623_p3, %p7622_p1 }
 0x1e9   : > { %p7625_p7 = pnand %p7624_p9, %p7618_p2 }
 0x1eb   : > { %7628 = shalt.err (!%p7625_p7)
}
 0x1ec   : > { %s7629_s7 = scalar_lea.vmem %s888_s30, 32  ;;  %s7798_s2 = smov [#allocation23]  }
 0x1ed   : > { %p7630_p8 = scmp.ne.s32.totalorder %s888_s30, %s7629_s7  ;;  %s7634_s20 = sshll.u32 %s7798_s2, 4  ;;  %s7635_s20 = int_to_ptr.vmem [resolvable:$false] %s7634_s20 }
 0x1ee   : > { %s7636_s23 = scalar_lea.vmem %s7635_s20, 64  ;;  %p7637_p11 = scmp.lt.s32.totalorder %s888_s30, %s7635_s20 }
 0x1ef   : > { %p7632_p13 = pnand %p7630_p8, %p9608_p4  ;;  %p7638_p0 = scmp.lt.s32.totalorder %s7636_s23, %s7629_s7 }
 0x1f1   : > { %p7633_p10 = pneg %p7632_p13  ;;  %p7639_p12 = por %p7638_p0, %p7637_p11 }
 0x1f3   : > { %p7640_p5 = pnand %p7639_p12, %p7633_p10 }
 0x1f5   : > { %7643 = shalt.err (!%p7640_p5)
}
 0x1f6   : > { %p9620_p6 = scmp.ne.s32.totalorder %s9593_s4, 0  ;;  %s9621_s8 = scalar_lea.sflag [#allocation22], %s8036_s0 }
 0x1f7   : > { %s917_s5 = scalar_lea.vmem [#allocation26], %s8167_s14  ;;  %s7644_s22 = scalar_lea.hbm %s8446_s9, 32 }
 0x1f8   : > { %6491 = dma.hbm_to_vmem [thread:$0]  (!%p9620_p6), %s8420_s25, 32, %s888_s30, %s9621_s8  }
 0x1f9   : > { %s925_s29 = sshll.u32 %s917_s5, 4  ;;  %p7645_p2 = scmp.ne.s32.totalorder %s8446_s9, %s7644_s22  ;;  %s926_s29 = int_to_ptr.vmem [resolvable:$true] %s925_s29 }
 0x1fa   : > { %s7649_s26 = scalar_lea.hbm %s9619_s24, 192  ;;  %p7650_p3 = scmp.lt.u32.totalorder %s8446_s9, %s9619_s24 }
 0x1fb   : > { %p7647_p12 = pnand %p7645_p2, %p9608_p4  ;;  %p7651_p9 = scmp.lt.u32.totalorder %s7649_s26, %s7644_s22 }
 0x1fc   : > { %p7653_p8 = scmp.lt.u32.totalorder %s7644_s22, %s8446_s9 }
 0x1fd   : > { %p7648_p1 = pneg %p7647_p12  ;;  %p7652_p7 = por %p7651_p9, %p7650_p3 }
 0x1ff   : > { %p7654_p13 = por %p7653_p8, %p7652_p7 }
 0x201   : > { %p7655_p10 = pnand %p7654_p13, %p7648_p1 }
 0x203   : > { %7658 = shalt.err (!%p7655_p10)
}
 0x204   : > { %s7659_s14 = scalar_lea.vmem %s926_s29, 32  ;;  %s7799_s25 = smov [#allocation26]  }
 0x205   : > { %p7660_p11 = scmp.ne.s32.totalorder %s926_s29, %s7659_s14  ;;  %s7664_s30 = sshll.u32 %s7799_s25, 4  ;;  %s7665_s30 = int_to_ptr.vmem [resolvable:$false] %s7664_s30 }
 0x206   : > { %s7666_s7 = scalar_lea.vmem %s7665_s30, 64  ;;  %p7667_p2 = scmp.lt.s32.totalorder %s926_s29, %s7665_s30 }
 0x207   : > { %p7662_p0 = pnand %p7660_p11, %p9608_p4  ;;  %p7668_p12 = scmp.lt.s32.totalorder %s7666_s7, %s7659_s14 }
 0x209   : > { %p7663_p5 = pneg %p7662_p0  ;;  %p7669_p6 = por %p7668_p12, %p7667_p2 }
 0x20b   : > { %p7670_p3 = pnand %p7669_p6, %p7663_p5 }
 0x20d   : > { %7673 = shalt.err (!%p7670_p3)
}
 0x20e   : > { %p9622_p9 = scmp.ne.s32.totalorder %s9593_s4, 0  ;;  %s9623_s2 = scalar_lea.sflag [#allocation25], %s8036_s0 }
 0x20f   : > { %s9624_s20 = sld [smem:[#allocation47_spill]] }
 0x210   : > { %6497 = dma.hbm_to_vmem [thread:$0]  (!%p9622_p9), %s8446_s9, 32, %s926_s29, %s9623_s2  }
 0x215   : > { %p9625_p1 = scmp.ne.s32.totalorder %s9624_s20, 0 }
 0x216   : > { %s9626_s17 = sld [smem:[#allocation46_spill]] (!%p9625_p1) }
 0x217   : > { %934 = sbr.rel (%p9625_p1) target bundleno = 4461 (0x116d), region = 108 }
 0x21c   : > { %p9627_p4 = scmp.eq.s32.totalorder (!%p9625_p1), %s9626_s17, 0 }
 0x21e   : > { %7717 = dma.done.wait (%p9627_p4), [#allocation4], 128   ;;  %p9628_p7 = pmov %p9627_p4 }
 0x21f   : > { %p9629_p8 = pmov %p9627_p4 }
 0x220   : > { %7719 = vsyncadd (%p9628_p7), [#allocation4], 4294967168 }
 0x221   : > { %7721 = dma.done.wait (%p9629_p8), [#allocation7], 288   ;;  %p9630_p6 = pmov %p9627_p4 }
 0x222   : > { %s9631_s4 = sld [smem:[#allocation44_spill]]  ;;  %s9632_s0 = sld [smem:[#allocation50_spill]] }
 0x223   : > { %7723 = vsyncadd (%p9630_p6), [#allocation7], 4294967008  ;;  %s8498_s23 = sand.u32 1, %s9626_s17  }
 0x224   : > { %s949_s5 = scalar_lea.sflag [#allocation10], %s8498_s23 }
 0x228   : > { %s950_s9 = sand.u32 1, %s9631_s4   ;;  %p9633_p13 = scmp.ne.s32.totalorder %s9632_s0, 0 }
 0x229   : > { %s6388_s8 = smul.u32 768, %s950_s9 }
 0x22b   : > { %s8502_s29 = scalar_lea.vmem [#allocation9], %s6388_s8 }
 0x22c   : > { %7725 = dma.done.wait (%p9633_p13), %s949_s5, 12384  }
 0x22d   : > { %7727 = vsyncadd (%p9633_p13), %s949_s5, 4294954912  ;;  %s6389_s22 = smul.u32 6, %s950_s9  ;;  %s5687_s3 = sshll.u32 %s950_s9, 8 }
 0x22e   : > { %s967_s26 = scalar_lea.sflag [#allocation13], %s8498_s23  ;;  %s8511_s16 = scalar_lea.vmem [#allocation12], %s5687_s3 }
 0x22f   : > { %s8508_s1 = scalar_lea.vmem [#allocation11], %s6389_s22 }
 0x230   : > { %7729 = dma.done.wait (%p9633_p13), %s967_s26, 4128  }
 0x231   : > { %7731 = vsyncadd (%p9633_p13), %s967_s26, 4294963168  ;;  %s8517_s28 = sshll.u32 %s950_s9, 1  ;;  %s5689_s14 = sshll.u32 %s950_s9, 10 }
 0x232   : > { %s979_s25 = scalar_lea.vmem [#allocation14], %s8517_s28  ;;  %s985_s30 = scalar_lea.sflag [#allocation16], %s8498_s23 }
 0x233   : > { %s8521_s7 = scalar_lea.vmem [#allocation15], %s5689_s14 }
 0x234   : > { %7733 = dma.done.wait (%p9633_p13), %s985_s30, 16512  }
 0x235   : > { %7735 = vsyncadd (%p9633_p13), %s985_s30, 4294950784  ;;  %s5690_s2 = sshll.u32 %s950_s9, 3  ;;  %s1003_s4 = scalar_lea.sflag [#allocation19], %s8498_s23 }
 0x236   : > { %s8527_s20 = scalar_lea.vmem [#allocation17], %s5690_s2  ;;  %s8530_s8 = scalar_lea.vmem [#allocation18], %s5689_s14 }
 0x237   : > { %7737 = dma.done.wait (%p9633_p13), %s1003_s4, 16416  }
 0x238   : > { %7739 = vsyncadd (%p9633_p13), %s1003_s4, 4294950880  ;;  %s1021_s22 = scalar_lea.sflag [#allocation22], %s8498_s23  ;;  %s1024_s3 = scalar_lea.vmem [#allocation21], %s8517_s28 }
 0x239   : > { %7741 = dma.done.wait (%p9633_p13), %s1021_s22, 64  }
 0x23a   : > { %7743 = vsyncadd (%p9633_p13), %s1021_s22, 4294967232  ;;  %s1033_s9 = scalar_lea.vmem [#allocation23], %s8517_s28  ;;  %s1039_s26 = scalar_lea.sflag [#allocation25], %s8498_s23 }
 0x23b   : > { %7745 = dma.done.wait (%p9633_p13), %s1039_s26, 64  }
 0x23c   : > { %7747 = vsyncadd (%p9633_p13), %s1039_s26, 4294967232  ;;  %p9634_p10 = pmov %p9627_p4 }
 0x23d   : > { %p9635_p11 = pmov %p9627_p4 }
 0x23e   : > { %7749 = dma.done.wait (%p9634_p10), [#allocation28], 4112  }
 0x23f   : > { %7751 = vsyncadd (%p9635_p11), [#allocation28], 4294963184  ;;  %p9636_p0 = pmov %p9627_p4 }
 0x241   : > { %7753 = dma.done.wait (%p9636_p0), [#allocation31], 16   ;;  %p9637_p5 = pmov %p9636_p0 }
 0x242   : > { %p9638_p2 = scmp.ne.s32.totalorder %s9626_s17, 0 }
 0x243   : > { %7755 = vsyncadd (%p9637_p5), [#allocation31], 4294967280  ;;  %v1181_v0 = vld [vmem:[#allocation3] sm:$0xff] (!%p9638_p2)  ;;  %vm1203_vm0 = vcmask (!%p9638_p2), 1043456   ;;  %v7800_v2 = vmov (!%p9638_p2), 0.0   ;;  %s9639_s2 = sld [smem:[#allocation51_spill]] (!%p9638_p2)  ;;  %v1184_v5 = vlaneseq (!%p9638_p2) }
 0x244   : > { %1178 = sbr.rel (%p9638_p2) target bundleno = 804 (0x324), region = 184  ;;  %v1195_v1 = vcombine.high (!%p9638_p2), %v1181_v0, %v1181_v0  ;;  %1272 = vmatprep.mubr.f32.mxu0 (!%p9638_p2), %v7800_v2  ;;  %1278 = vmatprep.mubr.f32.mxu1 (!%p9638_p2), %v7800_v2  ;;  %vm1196_vm1 = vcmask (!%p9638_p2), 31744   ;;  %v1182_v8 = vld [vmem:[#allocation6] sm:$0x3] (!%p9638_p2)  ;;  %v1285_v13 = vld [vmem:[#allocation8] sm:$0xff] (!%p9638_p2)  ;;  %v1286_v18 = vld [vmem:[#allocation8 + $0x8] sm:$0xff] (!%p9638_p2) }
 0x245   : > { %v1185_v6 = vshrl.u32 (!%p9638_p2), %v1184_v5, 7 }
 0x246   : > { %5701 = vmatprep.subr.msk.mxu0 (!%p9638_p2), %vm1203_vm0, %v1195_v1  ;;  %6358 = vmatprep.subr.msk.mxu1 (!%p9638_p2), %vm1203_vm0, %v1195_v1 }
 0x247   : > { %5702 = vmatpush1.msk.msra.mxu0 (!%p9638_p2), %vm1203_vm0, %v1181_v0  ;;  %6359 = vmatpush1.msk.msra.mxu1 (!%p9638_p2), %vm1203_vm0, %v1181_v0  ;;  %v1186_v7 = vsub.s32 (!%p9638_p2), 0, %v1185_v6  ;;  %v1190_v9 = vsub.s32 (!%p9638_p2), 1, %v1185_v6 }
 0x249   : > { %v1179_v3 = vld [vmem:[%s9639_s2] sm:$0xff] (!%p9638_p2)  ;;  %v1180_v4 = vld [vmem:[%s9639_s2 + $0x8] sm:$0xff] (!%p9638_p2)  ;;  %v1187_v10 = vrot.slane (!%p9638_p2), %v1182_v8, %v1186_v7  ;;  %v1191_v11 = vrot.slane (!%p9638_p2), %v1182_v8, %v1190_v9 }
 0x24a   : > { %5703 = vmatmul.mubr.msk.f32.vlgmr.msra.gmra.mrb[0].mxu0 (!%p9638_p2), %vm1196_vm1, %v1179_v3  ;;  %5704 = vmatmul.mubr.msk.f32.vlgmr.msra.gmra.mrb[0].mxu1 (!%p9638_p2), %vm1196_vm1, %v1180_v4 }
 0x31d   : > { %v1274_v12 = vpop.f32.mrb[0].mxu0  ;;  %v1280_v14 = vpop.f32.mrb[0].mxu1 }
 0x31e   : > { %v1275_v15 = vadd.f32 %v1274_v12, %v1187_v10  ;;  %v1281_v16 = vadd.f32 %v1280_v14, %v1187_v10  ;;  %v1276_v17 = vpop.f32.mrb[1].mxu0  ;;  %v1282_v19 = vpop.f32.mrb[1].mxu1 }
 0x31f   : > { %v1277_v20 = vadd.f32 %v1276_v17, %v1191_v11  ;;  %v1283_v21 = vadd.f32 %v1282_v19, %v1191_v11 }
 0x320   : > { %v1287_v22 = vadd.f32 %v1285_v13, %v1275_v15  ;;  %v1289_v23 = vadd.f32 %v1285_v13, %v1281_v16 }
 0x321   : > { %v1288_v24 = vadd.f32 %v1286_v18, %v1277_v20  ;;  %v1290_v25 = vadd.f32 %v1286_v18, %v1283_v21 }
 0x322   : > { %1291 = vst [vmem:[#allocation2] sm:$0xff] %v1287_v22  ;;  %1293 = vst [vmem:[#allocation2 + $0x10] sm:$0xff] %v1289_v23 }
 0x323   : > { %1292 = vst [vmem:[#allocation2 + $0x8] sm:$0xff] %v1288_v24  ;;  %1294 = vst [vmem:[#allocation2 + $0x18] sm:$0xff] %v1290_v25 }
 0x324 PF: > { %v6686_v26 = vld [vmem:[%s8502_s29 + $0x4] ss:$24 sps:$4 sm:$0xff]   ;;  %v6688_v27 = vld [vmem:[%s8502_s29] ss:$24 sps:$4 sm:$0xff]   ;;  %v6689_v28 = vld [vmem:[%s8502_s29 + $0x34] ss:$24 sps:$4 sm:$0xff]  }
 0x325   : > { %1909 = vmatprep.subr.bf16.mxu1 %v6686_v26  ;;  %v6691_v29 = vld [vmem:[%s8502_s29 + $0x30] ss:$24 sps:$4 sm:$0xff]   ;;  %v6692_v30 = vld [vmem:[%s8502_s29 + $0x64] ss:$24 sps:$4 sm:$0xff]   ;;  %v6694_v31 = vld [vmem:[%s8502_s29 + $0x60] ss:$24 sps:$4 sm:$0xff]  }
 0x326   : > { %1910 = vmatpush1.bf16.msra.mxu1 %v6688_v27  ;;  %v6695_v32 = vld [vmem:[%s8502_s29 + $0x94] ss:$24 sps:$4 sm:$0xff]   ;;  %v6697_v33 = vld [vmem:[%s8502_s29 + $0x90] ss:$24 sps:$4 sm:$0xff]   ;;  %v6698_v34 = vld [vmem:[%s8502_s29 + $0xc4] ss:$24 sps:$4 sm:$0xff]  }
 0x327   : > { %1911 = vmatprep.subr.bf16.mxu1 %v6689_v28  ;;  %v6700_v35 = vld [vmem:[%s8502_s29 + $0xc0] ss:$24 sps:$4 sm:$0xff]   ;;  %v6701_v36 = vld [vmem:[%s8502_s29 + $0xf4] ss:$24 sps:$4 sm:$0xff]   ;;  %v6703_v37 = vld [vmem:[%s8502_s29 + $0xf0] ss:$24 sps:$4 sm:$0xff]  }
 0x328   : > { %v6704_v38 = vld [vmem:[%s8502_s29 + $0x124] ss:$24 sps:$4 sm:$0xff]   ;;  %v6706_v42 = vld [vmem:[%s8502_s29 + $0x120] ss:$24 sps:$4 sm:$0xff]   ;;  %v6707_v43 = vld [vmem:[%s8502_s29 + $0x154] ss:$24 sps:$4 sm:$0xff]  }
 0x329   : > { %v6709_v44 = vld [vmem:[%s8502_s29 + $0x150] ss:$24 sps:$4 sm:$0xff]   ;;  %v6710_v45 = vld [vmem:[%s8502_s29 + $0x184] ss:$24 sps:$4 sm:$0xff]   ;;  %v6712_v46 = vld [vmem:[%s8502_s29 + $0x180] ss:$24 sps:$4 sm:$0xff]  }
 0x32a   : > { %1912 = vmatpush1.bf16.msra.mxu1 %v6691_v29  ;;  %v1296_v39 = vld [vmem:[#allocation2 + $0x8] sm:$0xff]  ;;  %v1298_v40 = vld [vmem:[#allocation2 + $0x18] sm:$0xff]  ;;  %v1295_v61 = vld [vmem:[#allocation2] sm:$0xff]  ;;  %vm2198_vm2 = vcmask 261120   ;;  %s7801_s17 = smov 32   ;;  %s9640_s23 = sld [smem:[#allocation55_spill]] }
 0x32b   : > { %1913 = vmatprep.subr.bf16.mxu1 %v6692_v30  ;;  %v8580_v41 = vpack.c.bf16 %v1298_v40, %v1296_v39  ;;  %v6713_v47 = vld [vmem:[%s8502_s29 + $0x1b4] ss:$24 sps:$4 sm:$0xff]   ;;  %v6715_v48 = vld [vmem:[%s8502_s29 + $0x1b0] ss:$24 sps:$4 sm:$0xff]   ;;  %v6716_v49 = vld [vmem:[%s8502_s29 + $0x1e4] ss:$24 sps:$4 sm:$0xff]  }
 0x32c   : > { %v6718_v50 = vld [vmem:[%s8502_s29 + $0x1e0] ss:$24 sps:$4 sm:$0xff]   ;;  %v6719_v51 = vld [vmem:[%s8502_s29 + $0x214] ss:$24 sps:$4 sm:$0xff]   ;;  %v6721_v52 = vld [vmem:[%s8502_s29 + $0x210] ss:$24 sps:$4 sm:$0xff]  }
 0x32d   : > { %1941 = vmatprep.mubr.bf16.mxu1 %v8580_v41  ;;  %v6722_v53 = vld [vmem:[%s8502_s29 + $0x244] ss:$24 sps:$4 sm:$0xff]   ;;  %v6724_v54 = vld [vmem:[%s8502_s29 + $0x240] ss:$24 sps:$4 sm:$0xff]   ;;  %v6725_v55 = vld [vmem:[%s8502_s29 + $0x274] ss:$24 sps:$4 sm:$0xff]  }
 0x32e   : > { %1914 = vmatpush1.bf16.msra.mxu1 %v6694_v31  ;;  %v6727_v56 = vld [vmem:[%s8502_s29 + $0x270] ss:$24 sps:$4 sm:$0xff]   ;;  %v6728_v57 = vld [vmem:[%s8502_s29 + $0x2a4] ss:$24 sps:$4 sm:$0xff]   ;;  %v6730_v58 = vld [vmem:[%s8502_s29 + $0x2a0] ss:$24 sps:$4 sm:$0xff]  }
 0x32f   : > { %1915 = vmatprep.subr.bf16.mxu1 %v6695_v32  ;;  %v6731_v59 = vld [vmem:[%s8502_s29 + $0x2d4] ss:$24 sps:$4 sm:$0xff]   ;;  %v6733_v60 = vld [vmem:[%s8502_s29 + $0x2d0] ss:$24 sps:$4 sm:$0xff]   ;;  %v6791_v39 = vld [vmem:[%s8502_s29 + $0xa0] ss:$24 sps:$4 sm:$0xff]  }
 0x330   : > { %v1297_v62 = vld [vmem:[#allocation2 + $0x10] sm:$0xff]  ;;  %v6736_v63 = vld [vmem:[%s8502_s29 + $0xc] ss:$24 sps:$4 sm:$0xff]   ;;  %v6734_v1 = vld [vmem:[%s8502_s29 + $0x8] ss:$24 sps:$4 sm:$0xff]   ;;  %vm2643_vm3 = vcmask 523264  }
 0x331   : > { %v8603_v0 = vpack.c.bf16 %v1297_v62, %v1295_v61  ;;  %v6739_v2 = vld [vmem:[%s8502_s29 + $0x3c] ss:$24 sps:$4 sm:$0xff]   ;;  %v6737_v3 = vld [vmem:[%s8502_s29 + $0x38] ss:$24 sps:$4 sm:$0xff]   ;;  %v6742_v4 = vld [vmem:[%s8502_s29 + $0x6c] ss:$24 sps:$4 sm:$0xff]  }
 0x332   : > { %1916 = vmatpush1.bf16.msra.mxu1 %v6697_v33  ;;  %v6740_v5 = vld [vmem:[%s8502_s29 + $0x68] ss:$24 sps:$4 sm:$0xff]   ;;  %v6745_v6 = vld [vmem:[%s8502_s29 + $0x9c] ss:$24 sps:$4 sm:$0xff]   ;;  %v6743_v7 = vld [vmem:[%s8502_s29 + $0x98] ss:$24 sps:$4 sm:$0xff]  }
 0x333   : > { %1917 = vmatprep.subr.bf16.mxu1 %v6698_v34  ;;  %v6748_v8 = vld [vmem:[%s8502_s29 + $0xcc] ss:$24 sps:$4 sm:$0xff]   ;;  %v6746_v9 = vld [vmem:[%s8502_s29 + $0xc8] ss:$24 sps:$4 sm:$0xff]   ;;  %v6751_v10 = vld [vmem:[%s8502_s29 + $0xfc] ss:$24 sps:$4 sm:$0xff]  }
 0x334   : > { %v6749_v11 = vld [vmem:[%s8502_s29 + $0xf8] ss:$24 sps:$4 sm:$0xff]   ;;  %v6754_v12 = vld [vmem:[%s8502_s29 + $0x12c] ss:$24 sps:$4 sm:$0xff]   ;;  %v6752_v13 = vld [vmem:[%s8502_s29 + $0x128] ss:$24 sps:$4 sm:$0xff]  }
 0x335   : > { %v6757_v14 = vld [vmem:[%s8502_s29 + $0x15c] ss:$24 sps:$4 sm:$0xff]   ;;  %v6755_v15 = vld [vmem:[%s8502_s29 + $0x158] ss:$24 sps:$4 sm:$0xff]   ;;  %v6760_v16 = vld [vmem:[%s8502_s29 + $0x18c] ss:$24 sps:$4 sm:$0xff]  }
 0x336   : > { %1918 = vmatpush1.bf16.msra.mxu1 %v6700_v35  ;;  %v6758_v17 = vld [vmem:[%s8502_s29 + $0x188] ss:$24 sps:$4 sm:$0xff]   ;;  %v6763_v18 = vld [vmem:[%s8502_s29 + $0x1bc] ss:$24 sps:$4 sm:$0xff]   ;;  %v6761_v19 = vld [vmem:[%s8502_s29 + $0x1b8] ss:$24 sps:$4 sm:$0xff]  }
 0x337   : > { %1919 = vmatprep.subr.bf16.mxu1 %v6701_v36  ;;  %v6766_v20 = vld [vmem:[%s8502_s29 + $0x1ec] ss:$24 sps:$4 sm:$0xff]   ;;  %v6764_v21 = vld [vmem:[%s8502_s29 + $0x1e8] ss:$24 sps:$4 sm:$0xff]   ;;  %v6769_v22 = vld [vmem:[%s8502_s29 + $0x21c] ss:$24 sps:$4 sm:$0xff]  }
 0x338   : > { %v6767_v23 = vld [vmem:[%s8502_s29 + $0x218] ss:$24 sps:$4 sm:$0xff]   ;;  %v6772_v24 = vld [vmem:[%s8502_s29 + $0x24c] ss:$24 sps:$4 sm:$0xff]   ;;  %v6770_v25 = vld [vmem:[%s8502_s29 + $0x248] ss:$24 sps:$4 sm:$0xff]  }
 0x339   : > { %v6775_v26 = vld [vmem:[%s8502_s29 + $0x27c] ss:$24 sps:$4 sm:$0xff]   ;;  %v6773_v27 = vld [vmem:[%s8502_s29 + $0x278] ss:$24 sps:$4 sm:$0xff]   ;;  %v6778_v28 = vld [vmem:[%s8502_s29 + $0x2ac] ss:$24 sps:$4 sm:$0xff]  }
 0x33a   : > { %1920 = vmatpush1.bf16.msra.mxu1 %v6703_v37  ;;  %v6776_v29 = vld [vmem:[%s8502_s29 + $0x2a8] ss:$24 sps:$4 sm:$0xff]   ;;  %v6781_v30 = vld [vmem:[%s8502_s29 + $0x2dc] ss:$24 sps:$4 sm:$0xff]   ;;  %v6779_v31 = vld [vmem:[%s8502_s29 + $0x2d8] ss:$24 sps:$4 sm:$0xff]  }
 0x33b   : > { %1921 = vmatprep.subr.bf16.mxu1 %v6704_v38  ;;  %v6784_v32 = vld [vmem:[%s8502_s29 + $0x14] ss:$24 sps:$4 sm:$0xff]   ;;  %v6782_v33 = vld [vmem:[%s8502_s29 + $0x10] ss:$24 sps:$4 sm:$0xff]   ;;  %v6787_v34 = vld [vmem:[%s8502_s29 + $0x44] ss:$24 sps:$4 sm:$0xff]  }
 0x33c   : > { %v6785_v35 = vld [vmem:[%s8502_s29 + $0x40] ss:$24 sps:$4 sm:$0xff]   ;;  %v6790_v36 = vld [vmem:[%s8502_s29 + $0x74] ss:$24 sps:$4 sm:$0xff]   ;;  %v6788_v37 = vld [vmem:[%s8502_s29 + $0x70] ss:$24 sps:$4 sm:$0xff]  }
 0x33d   : > { %v6793_v38 = vld [vmem:[%s8502_s29 + $0xa4] ss:$24 sps:$4 sm:$0xff]   ;;  %v6796_v40 = vld [vmem:[%s8502_s29 + $0xd4] ss:$24 sps:$4 sm:$0xff]   ;;  %v6824_v61 = vld [vmem:[%s8502_s29 + $0x2b0] ss:$24 sps:$4 sm:$0xff]  }
 0x33e   : > { %1922 = vmatpush1.bf16.msra.mxu1 %v6706_v42  ;;  %v6794_v42 = vld [vmem:[%s8502_s29 + $0xd0] ss:$24 sps:$4 sm:$0xff]   ;;  %v6829_v62 = vld [vmem:[%s8502_s29 + $0x2e4] ss:$24 sps:$4 sm:$0xff]   ;;  %vm2646_vm4 = vcmask 785408  }
 0x33f   : > { %1923 = vmatprep.subr.bf16.mxu1 %v6707_v43  ;;  %v6797_v43 = vld [vmem:[%s8502_s29 + $0x100] ss:$24 sps:$4 sm:$0xff]  }
 0x342   : > { %1924 = vmatpush1.bf16.msra.mxu1 %v6709_v44  ;;  %v6802_v44 = vld [vmem:[%s8502_s29 + $0x134] ss:$24 sps:$4 sm:$0xff]  }
 0x343   : > { %1925 = vmatprep.subr.bf16.mxu1 %v6710_v45  ;;  %v6800_v45 = vld [vmem:[%s8502_s29 + $0x130] ss:$24 sps:$4 sm:$0xff]  }
 0x346   : > { %1926 = vmatpush1.bf16.msra.mxu1 %v6712_v46  ;;  %v6805_v46 = vld [vmem:[%s8502_s29 + $0x164] ss:$24 sps:$4 sm:$0xff]  }
 0x347   : > { %1927 = vmatprep.subr.bf16.mxu1 %v6713_v47  ;;  %v6803_v47 = vld [vmem:[%s8502_s29 + $0x160] ss:$24 sps:$4 sm:$0xff]  }
 0x34a   : > { %1928 = vmatpush1.bf16.msra.mxu1 %v6715_v48  ;;  %v6808_v48 = vld [vmem:[%s8502_s29 + $0x194] ss:$24 sps:$4 sm:$0xff]  }
 0x34b   : > { %1929 = vmatprep.subr.bf16.mxu1 %v6716_v49  ;;  %v6806_v49 = vld [vmem:[%s8502_s29 + $0x190] ss:$24 sps:$4 sm:$0xff]  }
 0x34e   : > { %1930 = vmatpush1.bf16.msra.mxu1 %v6718_v50  ;;  %v6811_v50 = vld [vmem:[%s8502_s29 + $0x1c4] ss:$24 sps:$4 sm:$0xff]  }
 0x34f   : > { %1931 = vmatprep.subr.bf16.mxu1 %v6719_v51  ;;  %v6809_v51 = vld [vmem:[%s8502_s29 + $0x1c0] ss:$24 sps:$4 sm:$0xff]  }
 0x352   : > { %1932 = vmatpush1.bf16.msra.mxu1 %v6721_v52  ;;  %v6814_v52 = vld [vmem:[%s8502_s29 + $0x1f4] ss:$24 sps:$4 sm:$0xff]  }
 0x353   : > { %1933 = vmatprep.subr.bf16.mxu1 %v6722_v53  ;;  %v6812_v53 = vld [vmem:[%s8502_s29 + $0x1f0] ss:$24 sps:$4 sm:$0xff]  }
 0x356   : > { %1934 = vmatpush1.bf16.msra.mxu1 %v6724_v54  ;;  %v6817_v54 = vld [vmem:[%s8502_s29 + $0x224] ss:$24 sps:$4 sm:$0xff]  }
 0x357   : > { %1935 = vmatprep.subr.bf16.mxu1 %v6725_v55  ;;  %v6815_v55 = vld [vmem:[%s8502_s29 + $0x220] ss:$24 sps:$4 sm:$0xff]  }
 0x35a   : > { %1936 = vmatpush1.bf16.msra.mxu1 %v6727_v56  ;;  %v6820_v56 = vld [vmem:[%s8502_s29 + $0x254] ss:$24 sps:$4 sm:$0xff]  }
 0x35b   : > { %1937 = vmatprep.subr.bf16.mxu1 %v6728_v57  ;;  %v6818_v57 = vld [vmem:[%s8502_s29 + $0x250] ss:$24 sps:$4 sm:$0xff]  }
 0x35e   : > { %1938 = vmatpush1.bf16.msra.mxu1 %v6730_v58  ;;  %v6823_v58 = vld [vmem:[%s8502_s29 + $0x284] ss:$24 sps:$4 sm:$0xff]  }
 0x35f   : > { %1939 = vmatprep.subr.bf16.mxu1 %v6731_v59  ;;  %v6821_v59 = vld [vmem:[%s8502_s29 + $0x280] ss:$24 sps:$4 sm:$0xff]  }
 0x362   : > { %1940 = vmatpush1.bf16.msra.mxu1 %v6733_v60  ;;  %v6826_v60 = vld [vmem:[%s8502_s29 + $0x2b4] ss:$24 sps:$4 sm:$0xff]  }
 0x363   : > { %1952 = vmatprep.subr.bf16.mxu1 %v6736_v63  ;;  %v6827_v63 = vld [vmem:[%s8502_s29 + $0x2e0] ss:$24 sps:$4 sm:$0xff]  }
 0x365   : > { %1942 = vmatmul.mubr.bf16.vlgmr.msra.gmra.mrb[0].mxu1 %v8603_v0 }
 0x366   : > { %1953 = vmatpush1.bf16.msra.mxu1 %v6734_v1  ;;  %1984 = vmatprep.mubr.bf16.mxu1 %v8580_v41  ;;  %v1399_v1 = vlaneseq }
 0x367   : > { %1954 = vmatprep.subr.bf16.mxu1 %v6739_v2 }
 0x368   : > { %v8673_v2 = vshrl.u32 %v1399_v1, 7 }
 0x36a   : > { %1955 = vmatpush1.bf16.msra.mxu1 %v6737_v3  ;;  %v8676_v3 = vsub.s32 0, %v8673_v2 }
 0x36b   : > { %1956 = vmatprep.subr.bf16.mxu1 %v6742_v4  ;;  %v8679_v4 = vld [vmem:[%s8508_s1] sm:$0x3f]  ;;  %s7803_s1 = smov 64  }
 0x36e   : > { %1957 = vmatpush1.bf16.msra.mxu1 %v6740_v5  ;;  %v8682_v5 = vsub.s32 1, %v8673_v2 }
 0x36f   : > { %1958 = vmatprep.subr.bf16.mxu1 %v6745_v6  ;;  %v1402_v6 = vrot.slane %v8679_v4, %v8676_v3 }
 0x372   : > { %1959 = vmatpush1.bf16.msra.mxu1 %v6743_v7 }
 0x373   : > { %1960 = vmatprep.subr.bf16.mxu1 %v6748_v8  ;;  %v1406_v8 = vrot.slane %v8679_v4, %v8682_v5 }
 0x376   : > { %1961 = vmatpush1.bf16.msra.mxu1 %v6746_v9 }
 0x377   : > { %1962 = vmatprep.subr.bf16.mxu1 %v6751_v10 }
 0x37a   : > { %1963 = vmatpush1.bf16.msra.mxu1 %v6749_v11 }
 0x37b   : > { %1964 = vmatprep.subr.bf16.mxu1 %v6754_v12 }
 0x37e   : > { %1965 = vmatpush1.bf16.msra.mxu1 %v6752_v13 }
 0x37f   : > { %1966 = vmatprep.subr.bf16.mxu1 %v6757_v14 }
 0x382   : > { %1967 = vmatpush1.bf16.msra.mxu1 %v6755_v15 }
 0x383   : > { %1968 = vmatprep.subr.bf16.mxu1 %v6760_v16 }
 0x386   : > { %1969 = vmatpush1.bf16.msra.mxu1 %v6758_v17 }
 0x387   : > { %1970 = vmatprep.subr.bf16.mxu1 %v6763_v18 }
 0x38a   : > { %1971 = vmatpush1.bf16.msra.mxu1 %v6761_v19  ;;  %v1409_v19 = vsub.s32 2, %v8673_v2 }
 0x38b   : > { %1972 = vmatprep.subr.bf16.mxu1 %v6766_v20  ;;  %v1413_v20 = vsub.s32 3, %v8673_v2 }
 0x38e   : > { %1973 = vmatpush1.bf16.msra.mxu1 %v6764_v21  ;;  %v1410_v21 = vrot.slane %v8679_v4, %v1409_v19 }
 0x38f   : > { %1974 = vmatprep.subr.bf16.mxu1 %v6769_v22 }
 0x392   : > { %1975 = vmatpush1.bf16.msra.mxu1 %v6767_v23  ;;  %v1414_v23 = vrot.slane %v8679_v4, %v1413_v20 }
 0x393   : > { %1976 = vmatprep.subr.bf16.mxu1 %v6772_v24 }
 0x396   : > { %1977 = vmatpush1.bf16.msra.mxu1 %v6770_v25 }
 0x397   : > { %1978 = vmatprep.subr.bf16.mxu1 %v6775_v26 }
 0x39a   : > { %1979 = vmatpush1.bf16.msra.mxu1 %v6773_v27 }
 0x39b   : > { %1980 = vmatprep.subr.bf16.mxu1 %v6778_v28 }
 0x39e   : > { %1981 = vmatpush1.bf16.msra.mxu1 %v6776_v29 }
 0x39f   : > { %1982 = vmatprep.subr.bf16.mxu1 %v6781_v30 }
 0x3a2   : > { %1983 = vmatpush1.bf16.msra.mxu1 %v6779_v31 }
 0x3a3   : > { %1995 = vmatprep.subr.bf16.mxu1 %v6784_v32 }
 0x3a5   : > { %1985 = vmatmul.mubr.bf16.vlgmr.msra.gmra.mrb[4].mxu1 %v8603_v0 }
 0x3a6   : > { %1996 = vmatpush1.bf16.msra.mxu1 %v6782_v33  ;;  %2027 = vmatprep.mubr.bf16.mxu1 %v8580_v41  ;;  %v6799_v41 = vld [vmem:[%s8502_s29 + $0x104] ss:$24 sps:$4 sm:$0xff]   ;;  %s7802_s29 = smov 96  }
 0x3a7   : > { %1997 = vmatprep.subr.bf16.mxu1 %v6787_v34 }
 0x3aa   : > { %1998 = vmatpush1.bf16.msra.mxu1 %v6785_v35 }
 0x3ab   : > { %1999 = vmatprep.subr.bf16.mxu1 %v6790_v36  ;;  %v1417_v36 = vsub.s32 4, %v8673_v2 }
 0x3ae   : > { %2000 = vmatpush1.bf16.msra.mxu1 %v6788_v37 }
 0x3af   : > { %2001 = vmatprep.subr.bf16.mxu1 %v6793_v38 }
 0x3b2   : > { %2002 = vmatpush1.bf16.msra.mxu1 %v6791_v39  ;;  %v1418_v39 = vrot.slane %v8679_v4, %v1417_v36 }
 0x3b3   : > { %2003 = vmatprep.subr.bf16.mxu1 %v6796_v40 }
 0x3b6   : > { %2004 = vmatpush1.bf16.msra.mxu1 %v6794_v42 }
 0x3b7   : > { %2005 = vmatprep.subr.bf16.mxu1 %v6799_v41 }
 0x3ba   : > { %2006 = vmatpush1.bf16.msra.mxu1 %v6797_v43 }
 0x3bb   : > { %2007 = vmatprep.subr.bf16.mxu1 %v6802_v44 }
 0x3be   : > { %2008 = vmatpush1.bf16.msra.mxu1 %v6800_v45 }
 0x3bf   : > { %2009 = vmatprep.subr.bf16.mxu1 %v6805_v46 }
 0x3c2   : > { %2010 = vmatpush1.bf16.msra.mxu1 %v6803_v47 }
 0x3c3   : > { %2011 = vmatprep.subr.bf16.mxu1 %v6808_v48 }
 0x3c6   : > { %2012 = vmatpush1.bf16.msra.mxu1 %v6806_v49 }
 0x3c7   : > { %2013 = vmatprep.subr.bf16.mxu1 %v6811_v50 }
 0x3ca   : > { %2014 = vmatpush1.bf16.msra.mxu1 %v6809_v51 }
 0x3cb   : > { %2015 = vmatprep.subr.bf16.mxu1 %v6814_v52 }
 0x3ce   : > { %2016 = vmatpush1.bf16.msra.mxu1 %v6812_v53 }
 0x3cf   : > { %2017 = vmatprep.subr.bf16.mxu1 %v6817_v54 }
 0x3d2   : > { %2018 = vmatpush1.bf16.msra.mxu1 %v6815_v55 }
 0x3d3   : > { %2019 = vmatprep.subr.bf16.mxu1 %v6820_v56 }
 0x3d6   : > { %2020 = vmatpush1.bf16.msra.mxu1 %v6818_v57 }
 0x3d7   : > { %2021 = vmatprep.subr.bf16.mxu1 %v6823_v58 }
 0x3da   : > { %2022 = vmatpush1.bf16.msra.mxu1 %v6821_v59 }
 0x3db   : > { %2023 = vmatprep.subr.bf16.mxu1 %v6826_v60 }
 0x3de   : > { %2024 = vmatpush1.bf16.msra.mxu1 %v6824_v61 }
 0x3df   : > { %2025 = vmatprep.subr.bf16.mxu1 %v6829_v62 }
 0x3e2   : > { %2026 = vmatpush1.bf16.msra.mxu1 %v6827_v63 }
 0x3e5   : > { %2028 = vmatmul.mubr.bf16.vlgmr.msra.gmra.mrb[8].mxu1 %v8603_v0 }
 0x438   : > { %v1943_v7 = vpop.f32.mrb[0].mxu1 }
 0x439   : > { %v1944_v9 = vadd.f32 %v1943_v7, %v1402_v6  ;;  %v1945_v0 = vpop.f32.mrb[1].mxu1 }
 0x43a   : > { %v1947_v10 = vpop.f32.mrb[2].mxu1  ;;  %v8688_v13 = vadd.f32 %v1945_v0, %v1406_v8 }
 0x43b   : > { %v1948_v11 = vadd.f32 %v1947_v10, %v1402_v6  ;;  %v1949_v12 = vpop.f32.mrb[3].mxu1 }
 0x43c   : > { %v8690_v14 = vadd.f32 %v1949_v12, %v1406_v8 }
 0x43d   : > { %v2078_v15 = vpack.c.bf16 %v1948_v11, %v1944_v9  ;;  %v6601_v16 = vpack.i.bf16 %v1948_v11, %v1944_v9 }
 0x43e   : > { %v6611_v17 = vpack.i.bf16 %v8690_v14, %v8688_v13  ;;  %v2082_v18 = vpack.c.bf16 %v8690_v14, %v8688_v13 }
 0x43f   : > { %6215 = vmatprep.mubr.msk.bf16.mxu1 %vm2198_vm2, %v2078_v15 }
 0x478   : > { %v1986_v22 = vpop.f32.mrb[4].mxu1 }
 0x479   : > { %v1988_v24 = vpop.f32.mrb[5].mxu1  ;;  %v1987_v26 = vadd.f32 %v1986_v22, %v1410_v21 }
 0x47a   : > { %v1990_v25 = vpop.f32.mrb[6].mxu1  ;;  %v1989_v29 = vadd.f32 %v1988_v24, %v1414_v23 }
 0x47b   : > { %v1991_v27 = vadd.f32 %v1990_v25, %v1410_v21  ;;  %v1992_v28 = vpop.f32.mrb[7].mxu1 }
 0x47c   : > { %v1993_v30 = vadd.f32 %v1992_v28, %v1414_v23 }
 0x47d   : > { %v6576_v31 = vpack.i.bf16 %v1991_v27, %v1987_v26  ;;  %v2126_v32 = vpack.c.bf16 %v1991_v27, %v1987_v26 }
 0x47e   : > { %v6581_v33 = vpack.i.bf16 %v1993_v30, %v1989_v29  ;;  %v2130_v34 = vpack.c.bf16 %v1993_v30, %v1989_v29 }
 0x47f   : > { %6577 = vrot.lane.b32.xlu1 %v6576_v31, %s7801_s17  ;;  %6567 = vrot.lane.b32.xlu0 %v6576_v31, %s7802_s29  ;;  %v2224_v35 = vsel %vm2198_vm2, %v2126_v32, 0 }
 0x480   : > { %6376 = vmatprep.subr.msk.bf16.mxu1 %vm2198_vm2, %v2126_v32  ;;  %v2236_v1 = vsel %vm2198_vm2, %v2130_v34, 0 }
 0x481   : > { %6200 = vmatpush3.bf16.xpose.msra.mxu1 %v2224_v35 }
 0x483   : > { %6582 = vrot.lane.b32.xlu1 %v6581_v33, %s7802_s29  ;;  %6572 = vrot.lane.b32.xlu0 %v6576_v31, %s7803_s1 }
 0x487   : > { %6592 = vrot.lane.b32.xlu1 %v6581_v33, %s7801_s17  ;;  %6587 = vrot.lane.b32.xlu0 %v6581_v33, %s7803_s1 }
 0x48b   : > { %6602 = vrot.lane.b32.xlu1 %v6601_v16, %s7803_s1  ;;  %6597 = vrot.lane.b32.xlu0 %v6601_v16, %s7802_s29 }
 0x48f   : > { %6612 = vrot.lane.b32.xlu1 %v6611_v17, %s7802_s29  ;;  %6607 = vrot.lane.b32.xlu0 %v6601_v16, %s7801_s17 }
 0x493   : > { %6622 = vrot.lane.b32.xlu1 %v6611_v17, %s7801_s17  ;;  %6617 = vrot.lane.b32.xlu0 %v6611_v17, %s7803_s1 }
 0x4b8   : > { %v2029_v37 = vpop.f32.mrb[8].mxu1 }
 0x4b9   : > { %v8720_v38 = vpop.f32.mrb[9].mxu1  ;;  %v8727_v41 = vadd.f32 %v2029_v37, %v1418_v39 }
 0x4ba   : > { %v2033_v40 = vpop.f32.mrb[10].mxu1 }
 0x4bb   : > { %v8725_v42 = vpop.f32.mrb[11].mxu1  ;;  %v8729_v43 = vadd.f32 %v2033_v40, %v1418_v39 }
 0x4bd   : > { %v2174_v44 = vpack.c.bf16 %v8729_v43, %v8727_v41 }
 0x4bf   : > { %6231 = vmatprep.subr.bf16.mxu0 %v2174_v44 }
 0x4c0   : > { %6232 = vmatpush3.bf16.msra.mxu0 %v2174_v44  ;;  %v1421_v44 = vsub.s32 5, %v8673_v2 }
 0x4f1   : > { %v6568_v45 = vpop.permute.xlu0 %6567  ;;  %v6578_v53 = vpop.permute.xlu1 %6577 }
 0x4f2   : > { %v6570_v46 = vunpack.i.h.bf16 %v6568_v45  ;;  %v6569_v47 = vunpack.i.l.bf16 %v6568_v45  ;;  %v6580_v55 = vunpack.i.h.bf16 %v6578_v53  ;;  %v6579_v56 = vunpack.i.l.bf16 %v6578_v53 }
 0x4f4   : > { %v2127_v48 = vpack.c.bf16 %v6570_v46, %v6569_v47  ;;  %v2129_v57 = vpack.c.bf16 %v6580_v55, %v6579_v56  ;;  %v2183_v55 = vld [vmem:[%s9640_s23 + $0x8] sm:$0xff]  ;;  %v2184_v56 = vld [vmem:[%s9640_s23 + $0x10] sm:$0xff] }
 0x4f5   : > { %v6573_v49 = vpop.permute.xlu0 %6572  ;;  %v6583_v60 = vpop.permute.xlu1 %6582 }
 0x4f6   : > { %v6575_v50 = vunpack.i.h.bf16 %v6573_v49  ;;  %v6574_v51 = vunpack.i.l.bf16 %v6573_v49  ;;  %6377 = vmatprep.subr.msk.bf16.mxu1 %vm2198_vm2, %v2127_v48  ;;  %v2227_v52 = vsel %vm2198_vm2, %v2127_v48, 0  ;;  %v2233_v59 = vsel %vm2198_vm2, %v2129_v57, 0 }
 0x4f7   : > { %6202 = vmatpush3.bf16.xpose.msra.mxu1 %v2227_v52  ;;  %v6585_v61 = vunpack.i.h.bf16 %v6583_v60  ;;  %v6584_v62 = vunpack.i.l.bf16 %v6583_v60  ;;  %v1422_v48 = vrot.slane %v8679_v4, %v1421_v44  ;;  %v2182_v4 = vld [vmem:[%s9640_s23] sm:$0xff]  ;;  %v2185_v60 = vld [vmem:[%s9640_s23 + $0x18] sm:$0xff] }
 0x4f8   : > { %v2128_v54 = vpack.c.bf16 %v6575_v50, %v6574_v51 }
 0x4f9   : > { %v2131_v63 = vpack.c.bf16 %v6585_v61, %v6584_v62  ;;  %v6588_v6 = vpop.permute.xlu0 %6587  ;;  %v6593_v10 = vpop.permute.xlu1 %6592  ;;  %v2036_v49 = vadd.f32 %v8725_v42, %v1422_v48  ;;  %v2186_v61 = vld [vmem:[%s9640_s23 + $0x20] sm:$0xff] }
 0x4fa   : > { %6378 = vmatprep.subr.msk.bf16.mxu1 %vm2198_vm2, %v2128_v54  ;;  %v2230_v58 = vsel %vm2198_vm2, %v2128_v54, 0  ;;  %v6590_v7 = vunpack.i.h.bf16 %v6588_v6  ;;  %v6589_v8 = vunpack.i.l.bf16 %v6588_v6  ;;  %v6595_v11 = vunpack.i.h.bf16 %v6593_v10 }
 0x4fb   : > { %v2239_v0 = vsel %vm2198_vm2, %v2131_v63, 0  ;;  %v6594_v12 = vunpack.i.l.bf16 %v6593_v10 }
 0x4fc   : > { %v2132_v9 = vpack.c.bf16 %v6590_v7, %v6589_v8  ;;  %v2188_v8 = vld [vmem:[%s9640_s23 + $0x30] sm:$0xff] }
 0x4fd   : > { %v2133_v15 = vpack.c.bf16 %v6595_v11, %v6594_v12  ;;  %v6598_v17 = vpop.permute.xlu0 %6597  ;;  %v6603_v21 = vpop.permute.xlu1 %6602  ;;  %v2187_v12 = vld [vmem:[%s9640_s23 + $0x28] sm:$0xff] }
 0x4fe   : > { %v2242_v16 = vsel %vm2198_vm2, %v2132_v9, 0  ;;  %v6600_v23 = vunpack.i.h.bf16 %v6598_v17  ;;  %v6599_v24 = vunpack.i.l.bf16 %v6598_v17  ;;  %v6605_v25 = vunpack.i.h.bf16 %v6603_v21 }
 0x4ff   : > { %6204 = vmatpush3.bf16.xpose.msra.mxu1 %v2230_v58  ;;  %v2245_v22 = vsel %vm2198_vm2, %v2133_v15, 0  ;;  %v6604_v26 = vunpack.i.l.bf16 %v6603_v21 }
 0x500   : > { %6379 = vmatprep.subr.msk.bf16.mxu1 %vm2198_vm2, %v2129_v57  ;;  %v2079_v27 = vpack.c.bf16 %v6600_v23, %v6599_v24  ;;  %v2192_v24 = vld [vmem:[%s9640_s23 + $0x50] sm:$0xff] }
 0x501   : > { %v2080_v28 = vpack.c.bf16 %v6605_v25, %v6604_v26  ;;  %v6608_v29 = vpop.permute.xlu0 %6607  ;;  %v6613_v33 = vpop.permute.xlu1 %6612  ;;  %v2193_v25 = vld [vmem:[%s9640_s23 + $0x58] sm:$0xff] }
 0x502   : > { %v6610_v30 = vunpack.i.h.bf16 %v6608_v29  ;;  %v6609_v31 = vunpack.i.l.bf16 %v6608_v29  ;;  %v6615_v35 = vunpack.i.h.bf16 %v6613_v33  ;;  %v6614_v37 = vunpack.i.l.bf16 %v6613_v33  ;;  %v2191_v29 = vld [vmem:[%s9640_s23 + $0x48] sm:$0xff] }
 0x504   : > { %v2081_v32 = vpack.c.bf16 %v6610_v30, %v6609_v31  ;;  %v2083_v45 = vpack.c.bf16 %v6615_v35, %v6614_v37  ;;  %v2194_v30 = vld [vmem:[%s9640_s23 + $0x60] sm:$0xff]  ;;  %v2196_v37 = vld [vmem:[%s9640_s23 + $0x70] sm:$0xff] }
 0x505   : > { %v6623_v46 = vpop.permute.xlu1 %6622 }
 0x506   : > { %v6625_v13 = vunpack.i.h.bf16 %v6623_v46  ;;  %v6624_v14 = vunpack.i.l.bf16 %v6623_v46  ;;  %v2197_v46 = vld [vmem:[%s9640_s23 + $0x78] sm:$0xff] }
 0x507   : > { %6206 = vmatpush3.bf16.xpose.msra.mxu1 %v2233_v59 }
 0x508   : > { %6380 = vmatprep.subr.msk.bf16.mxu1 %vm2198_vm2, %v2130_v34  ;;  %v6618_v34 = vpop.permute.xlu0 %6617  ;;  %v2085_v50 = vpack.c.bf16 %v6625_v13, %v6624_v14 }
 0x509   : > { %v6620_v39 = vunpack.i.h.bf16 %v6618_v34  ;;  %v6619_v40 = vunpack.i.l.bf16 %v6618_v34 }
 0x50b   : > { %v2084_v47 = vpack.c.bf16 %v6620_v39, %v6619_v40 }
 0x50f   : > { %6208 = vmatpush3.bf16.xpose.msra.mxu1 %v2236_v1 }
 0x510   : > { %6381 = vmatprep.subr.msk.bf16.mxu1 %vm2198_vm2, %v2131_v63 }
 0x517   : > { %6210 = vmatpush3.bf16.xpose.msra.mxu1 %v2239_v0 }
 0x518   : > { %6382 = vmatprep.subr.msk.bf16.mxu1 %vm2198_vm2, %v2132_v9  ;;  %v2189_v9 = vld [vmem:[%s9640_s23 + $0x38] sm:$0xff] }
 0x51f   : > { %6212 = vmatpush3.bf16.xpose.msra.mxu1 %v2242_v16 }
 0x520   : > { %6383 = vmatprep.subr.msk.bf16.mxu1 %vm2198_vm2, %v2133_v15  ;;  %v2190_v15 = vld [vmem:[%s9640_s23 + $0x40] sm:$0xff] }
 0x527   : > { %6214 = vmatpush3.bf16.xpose.msra.mxu1 %v2245_v22 }
 0x52e   : > { %6216 = vmatmul.mubr.msk.bf16.vlgmr.msra.gmra.mrb[12].mxu1 %vm2198_vm2, %v2079_v27 }
 0x52f   : > { %6219 = vmatprep.mubr.msk.bf16.mxu1 %vm2198_vm2, %v2080_v28 }
 0x536   : > { %6220 = vmatmul.mubr.msk.bf16.gmra.mrb[16].mxu1 %vm2198_vm2, %v2081_v32 }
 0x537   : > { %6223 = vmatprep.mubr.msk.bf16.mxu1 %vm2198_vm2, %v2082_v18  ;;  %v2032_v18 = vadd.f32 %v8720_v38, %v1422_v48  ;;  %v2195_v48 = vld [vmem:[%s9640_s23 + $0x68] sm:$0xff] }
 0x539   : > { %v8762_v51 = vpack.i.bf16 %v2036_v49, %v2032_v18  ;;  %v8765_v52 = vpack.c.bf16 %v2036_v49, %v2032_v18 }
 0x53e   : > { %6224 = vmatmul.mubr.msk.bf16.gmra.mrb[20].mxu1 %vm2198_vm2, %v2083_v45  ;;  %v6626_v45 = vpack.i.bf16 %v8729_v43, %v8727_v41 }
 0x53f   : > { %6227 = vmatprep.mubr.msk.bf16.mxu1 %vm2198_vm2, %v2084_v47 }
 0x546   : > { %6228 = vmatmul.mubr.msk.bf16.gmra.mrb[24].mxu1 %vm2198_vm2, %v2085_v50 }
 0x601   : > { %v6217_v53 = vpop.f32.mrb[12].mxu1 }
 0x602   : > { %v2281_v54 = vpop.f32.mrb[13].mxu1  ;;  %v8781_v59 = vadd.f32 %v6217_v53, %v2184_v56 }
 0x603   : > { %v8773_v38 = vadd.f32 %v2281_v54, %v2182_v4  ;;  %v6218_v42 = vpop.f32.mrb[14].mxu1 }
 0x604   : > { %v2284_v57 = vpop.f32.mrb[15].mxu1  ;;  %v8791_v1 = vadd.f32 %v6218_v42, %v2185_v60 }
 0x605   : > { %v8778_v58 = vadd.f32 %v2284_v57, %v2183_v55  ;;  %2344 = vmax.xlane.f32.xlu0 %v8773_v38 }
 0x607   : > { %2346 = vmax.xlane.f32.xlu1 %v8778_v58 }
 0x609   : > { %v6221_v62 = vpop.f32.mrb[16].mxu1  ;;  %2348 = vmax.xlane.f32.xlu0 %v8781_v59 }
 0x60a   : > { %v2297_v63 = vpop.f32.mrb[17].mxu1  ;;  %v8803_v10 = vadd.f32 %v6221_v62, %v2188_v8 }
 0x60b   : > { %v8793_v6 = vadd.f32 %v2297_v63, %v2186_v61  ;;  %v6222_v7 = vpop.f32.mrb[18].mxu1 }
 0x60c   : > { %v2300_v0 = vpop.f32.mrb[19].mxu1  ;;  %v8805_v11 = vadd.f32 %v6222_v7, %v2189_v9 }
 0x60d   : > { %2352 = vmax.xlane.f32.xlu1 %v8793_v6  ;;  %2350 = vmax.xlane.f32.xlu0 %v8791_v1  ;;  %v8815_v21 = vadd.f32 %v2300_v0, %v2187_v12 }
 0x611   : > { %v6225_v16 = vpop.f32.mrb[20].mxu1  ;;  %2356 = vmax.xlane.f32.xlu1 %v8803_v10  ;;  %2358 = vmax.xlane.f32.xlu0 %v8805_v11 }
 0x612   : > { %v2313_v17 = vpop.f32.mrb[21].mxu1  ;;  %v8827_v27 = vadd.f32 %v6225_v16, %v2192_v24 }
 0x613   : > { %v8817_v22 = vadd.f32 %v2313_v17, %v2190_v15  ;;  %v6226_v23 = vpop.f32.mrb[22].mxu1 }
 0x614   : > { %v2316_v26 = vpop.f32.mrb[23].mxu1  ;;  %v8829_v28 = vadd.f32 %v6226_v23, %v2193_v25 }
 0x615   : > { %2360 = vmax.xlane.f32.xlu1 %v8817_v22  ;;  %2354 = vmax.xlane.f32.xlu0 %v8815_v21  ;;  %v8839_v33 = vadd.f32 %v2316_v26, %v2191_v29 }
 0x619   : > { %v6229_v31 = vpop.f32.mrb[24].mxu1  ;;  %2364 = vmax.xlane.f32.xlu1 %v8827_v27  ;;  %2366 = vmax.xlane.f32.xlu0 %v8829_v28 }
 0x61a   : > { %v2329_v32 = vpop.f32.mrb[25].mxu1  ;;  %v8848_v40 = vadd.f32 %v6229_v31, %v2196_v37 }
 0x61b   : > { %v8841_v34 = vadd.f32 %v2329_v32, %v2194_v30  ;;  %v6230_v35 = vpop.f32.mrb[26].mxu1 }
 0x61c   : > { %v2332_v39 = vpop.f32.mrb[27].mxu1  ;;  %v8861_v47 = vadd.f32 %v6230_v35, %v2197_v46 }
 0x61d   : > { %2368 = vmax.xlane.f32.xlu1 %v8841_v34  ;;  %2362 = vmax.xlane.f32.xlu0 %v8839_v33  ;;  %v8867_v41 = vadd.f32 %v2332_v39, %v2195_v48 }
 0x621   : > { %2372 = vmax.xlane.f32.xlu1 %v8848_v40 }
 0x632   : > { %6627 = vrot.lane.b32.xlu1 %v6626_v45, %s7802_s29 }
 0x633   : > { %6637 = vrot.lane.b32.xlu0 %v6626_v45, %s7801_s17 }
 0x636   : > { %6632 = vrot.lane.b32.xlu1 %v6626_v45, %s7803_s1 }
 0x63a   : > { %6642 = vrot.lane.b32.xlu1 %v8762_v51, %s7802_s29 }
 0x652   : > { %2374 = vmax.xlane.f32.xlu0 %v8861_v47 }
 0x656   : > { %2370 = vmax.xlane.f32.xlu0 %v8867_v41 }
 0x66c   : > { %6647 = vrot.lane.b32.xlu0 %v8762_v51, %s7803_s1 }
 0x692   : > { %v2345_v43 = vpop.xlane.xlu0 %2344 }
 0x693   : > { %v2376_v18 = vsub.f32 %v8773_v38, %v2345_v43 }
 0x694   : > { %v2347_v13 = vpop.xlane.xlu1 %2346 }
 0x695   : > { %v2392_v54 = vmul.f32 1.442695, %v2376_v18  ;;  %v2377_v42 = vsub.f32 %v8778_v58, %v2347_v13 }
 0x696   : > { %v2349_v14 = vpop.xlane.xlu0 %2348 }
 0x697   : > { %v2378_v49 = vsub.f32 %v8781_v59, %v2349_v14  ;;  %v2394_v63 = vmul.f32 1.442695, %v2377_v42 }
 0x699   : > { %v2396_v50 = vmul.f32 1.442695, %v2378_v49 }
 0x69a   : > { %v2353_v4 = vpop.xlane.xlu1 %2352  ;;  %v2351_v53 = vpop.xlane.xlu0 %2350 }
 0x69b   : > { %7070 = vpow2.f32 %v2396_v50  ;;  %v2379_v55 = vsub.f32 %v8791_v1, %v2351_v53  ;;  %v2380_v61 = vsub.f32 %v8793_v6, %v2353_v4 }
 0x69c   : > { %7072 = vpow2.f32 %v2392_v54 }
 0x69d   : > { %v2398_v56 = vmul.f32 1.442695, %v2379_v55  ;;  %v2400_v9 = vmul.f32 1.442695, %v2380_v61 }
 0x69e   : > { %v2357_v57 = vpop.xlane.xlu1 %2356  ;;  %v2359_v60 = vpop.xlane.xlu0 %2358 }
 0x69f   : > { %v2382_v62 = vsub.f32 %v8803_v10, %v2357_v57  ;;  %7074 = vpow2.f32 %v2398_v56  ;;  %v2383_v59 = vsub.f32 %v8805_v11, %v2359_v60 }
 0x6a1   : > { %v2404_v38 = vmul.f32 1.442695, %v2382_v62  ;;  %v2406_v0 = vmul.f32 1.442695, %v2383_v59 }
 0x6a2   : > { %v2361_v7 = vpop.xlane.xlu1 %2360  ;;  %v2355_v8 = vpop.xlane.xlu0 %2354 }
 0x6a3   : > { %7076 = vpow2.f32 %v2404_v38  ;;  %v2381_v1 = vsub.f32 %v8815_v21, %v2355_v8  ;;  %v2384_v17 = vsub.f32 %v8817_v22, %v2361_v7 }
 0x6a4   : > { %7078 = vpow2.f32 %v2394_v63 }
 0x6a5   : > { %v8880_v58 = vpop.eup %7070  ;;  %7080 = vpow2.f32 %v2400_v9  ;;  %v2402_v10 = vmul.f32 1.442695, %v2381_v1 }
 0x6a6   : > { %v2365_v12 = vpop.xlane.xlu1 %2364  ;;  %2428 = vadd.xlane.f32.xlu0 %v8880_v58  ;;  %v2367_v6 = vpop.xlane.xlu0 %2366  ;;  %7082 = vpow2.f32 %v2406_v0 }
 0x6a7   : > { %v2386_v15 = vsub.f32 %v8827_v27, %v2365_v12  ;;  %v2387_v11 = vsub.f32 %v8829_v28, %v2367_v6  ;;  %v8885_v16 = vpop.eup %7072  ;;  %7084 = vpow2.f32 %v2402_v10  ;;  %v2408_v27 = vmul.f32 1.442695, %v2384_v17 }
 0x6a9   : > { %v2412_v21 = vmul.f32 1.442695, %v2386_v15  ;;  %v2414_v24 = vmul.f32 1.442695, %v2387_v11  ;;  %v8891_v25 = vpop.eup %7074 }
 0x6aa   : > { %v8888_v23 = vpop.xlane.xlu1 %2368  ;;  %2424 = vadd.xlane.f32.xlu0 %v8885_v16  ;;  %v2363_v26 = vpop.xlane.xlu0 %2362 }
 0x6ab   : > { %7086 = vpow2.f32 %v2412_v21  ;;  %v2385_v22 = vsub.f32 %v8839_v33, %v2363_v26  ;;  %v2388_v59 = vsub.f32 %v8841_v34, %v8888_v23 }
 0x6ac   : > { %7088 = vpow2.f32 %v2414_v24 }
 0x6ad   : > { %v8893_v29 = vpop.eup %7076  ;;  %7090 = vpow2.f32 %v2408_v27  ;;  %v2410_v39 = vmul.f32 1.442695, %v2385_v22  ;;  %v2416_v0 = vmul.f32 1.442695, %v2388_v59 }
 0x6ae   : > { %2436 = vadd.xlane.f32.xlu1 %v8893_v29  ;;  %v2373_v28 = vpop.xlane.xlu1 %2372  ;;  %2430 = vadd.xlane.f32.xlu0 %v8891_v25  ;;  %v8899_v31 = vpop.eup %7078 }
 0x6af   : > { %v2390_v30 = vsub.f32 %v8848_v40, %v2373_v28  ;;  %v8901_v32 = vpop.eup %7080  ;;  %v6638_v45 = vpop.permute.xlu0 %6637 }
 0x6b0   : > { %v8905_v43 = vpop.eup %7082  ;;  %v6640_v13 = vunpack.i.h.bf16 %v6638_v45  ;;  %v6639_v18 = vunpack.i.l.bf16 %v6638_v45 }
 0x6b1   : > { %v2420_v35 = vmul.f32 1.442695, %v2390_v30  ;;  %v8907_v33 = vpop.eup %7084 }
 0x6b2   : > { %2432 = vadd.xlane.f32.xlu1 %v8901_v32  ;;  %v6628_v37 = vpop.permute.xlu1 %6627  ;;  %2426 = vadd.xlane.f32.xlu0 %v8899_v31  ;;  %v2177_v55 = vpack.c.bf16 %v6640_v13, %v6639_v18 }
 0x6b3   : > { %7092 = vpow2.f32 %v2420_v35  ;;  %v6630_v46 = vunpack.i.h.bf16 %v6628_v37  ;;  %v6629_v48 = vunpack.i.l.bf16 %v6628_v37 }
 0x6b4   : > { %7094 = vpow2.f32 %v2410_v39 }
 0x6b5   : > { %v2175_v40 = vpack.c.bf16 %v6630_v46, %v6629_v48  ;;  %v8911_v4 = vpop.eup %7086 }
 0x6b6   : > { %v6633_v14 = vpop.permute.xlu1 %6632  ;;  %2438 = vadd.xlane.f32.xlu1 %v8905_v43  ;;  %2434 = vadd.xlane.f32.xlu0 %v8907_v33  ;;  %v8913_v53 = vpop.eup %7088 }
 0x6b7   : > { %v6635_v49 = vunpack.i.h.bf16 %v6633_v14  ;;  %v6634_v50 = vunpack.i.l.bf16 %v6633_v14  ;;  %6233 = vmatprep.subr.bf16.mxu0 %v2175_v40  ;;  %v8917_v42 = vpop.eup %7090 }
 0x6b8   : > { %6234 = vmatpush3.bf16.msra.mxu0 %v2175_v40 }
 0x6b9   : > { %v2176_v54 = vpack.c.bf16 %v6635_v49, %v6634_v50 }
 0x6ba   : > { %2444 = vadd.xlane.f32.xlu0 %v8911_v4  ;;  %2446 = vadd.xlane.f32.xlu1 %v8913_v53  ;;  %v6643_v56 = vpop.permute.xlu1 %6642 }
 0x6bb   : > { %6235 = vmatprep.subr.bf16.mxu0 %v2176_v54  ;;  %v6645_v60 = vunpack.i.h.bf16 %v6643_v56  ;;  %v6644_v61 = vunpack.i.l.bf16 %v6643_v56 }
 0x6bc   : > { %6236 = vmatpush3.bf16.msra.mxu0 %v2176_v54 }
 0x6bd   : > { %v8919_v57 = vpop.eup %7092  ;;  %6237 = vmatprep.subr.bf16.mxu0 %v2177_v55  ;;  %v2179_v38 = vpack.c.bf16 %v6645_v60, %v6644_v61 }
 0x6be   : > { %2440 = vadd.xlane.f32.xlu0 %v8917_v42  ;;  %2452 = vadd.xlane.f32.xlu1 %v8919_v57  ;;  %v8923_v62 = vpop.eup %7094 }
 0x6c0   : > { %6238 = vmatpush3.bf16.msra.mxu0 %v2177_v55 }
 0x6c1   : > { %6239 = vmatprep.subr.bf16.mxu0 %v8765_v52 }
 0x6c2   : > { %2442 = vadd.xlane.f32.xlu0 %v8923_v62 }
 0x6c4   : > { %6240 = vmatpush3.bf16.msra.mxu0 %v8765_v52 }
 0x6c5   : > { %6241 = vmatprep.subr.bf16.mxu0 %v2179_v38 }
 0x6c8   : > { %6242 = vmatpush3.bf16.msra.mxu0 %v2179_v38 }
 0x6d8   : > { %6652 = vrot.lane.b32.xlu0 %v8762_v51, %s7801_s17 }
 0x6df   : > { %v2375_v63 = vpop.xlane.xlu0 %2374 }
 0x6e0   : > { %v2391_v8 = vsub.f32 %v8861_v47, %v2375_v63 }
 0x6e2   : > { %v2422_v6 = vmul.f32 1.442695, %v2391_v8 }
 0x6e3   : > { %v2371_v7 = vpop.xlane.xlu0 %2370 }
 0x6e4   : > { %v2389_v9 = vsub.f32 %v8867_v41, %v2371_v7 }
 0x6e6   : > { %v2418_v1 = vmul.f32 1.442695, %v2389_v9 }
 0x6e7   : > { %v6648_v12 = vpop.permute.xlu0 %6647 }
 0x6e8   : > { %7096 = vpow2.f32 %v2418_v1  ;;  %v6650_v52 = vunpack.i.h.bf16 %v6648_v12  ;;  %v6649_v10 = vunpack.i.l.bf16 %v6648_v12 }
 0x6e9   : > { %7098 = vpow2.f32 %v2416_v0 }
 0x6ea   : > { %v2180_v15 = vpack.c.bf16 %v6650_v52, %v6649_v10  ;;  %7100 = vpow2.f32 %v2422_v6 }
 0x6ec   : > { %6243 = vmatprep.subr.bf16.mxu0 %v2180_v15 }
 0x6ed   : > { %6244 = vmatpush3.bf16.msra.mxu0 %v2180_v15 }
 0x6f2   : > { %v8934_v51 = vpop.eup %7096 }
 0x6f3   : > { %2450 = vadd.xlane.f32.xlu1 %v8934_v51  ;;  %v8937_v34 = vpop.eup %7098 }
 0x6f4   : > { %v8939_v47 = vpop.eup %7100 }
 0x6f7   : > { %2448 = vadd.xlane.f32.xlu0 %v8937_v34  ;;  %2454 = vadd.xlane.f32.xlu1 %v8939_v47 }
 0x733   : > { %v2429_v41 = vpop.xlane.xlu0 %2428 }
 0x737   : > { %v2425_v11 = vpop.xlane.xlu0 %2424 }
 0x738   : > { %7102 = vrcp.f32 %v2425_v11 }
 0x73b   : > { %v2431_v17 = vpop.xlane.xlu0 %2430  ;;  %v2437_v23 = vpop.xlane.xlu1 %2436 }
 0x73f   : > { %v2427_v21 = vpop.xlane.xlu0 %2426  ;;  %v2433_v27 = vpop.xlane.xlu1 %2432 }
 0x740   : > { %7104 = vrcp.f32 %v2427_v21 }
 0x741   : > { %7106 = vrcp.f32 %v2431_v17 }
 0x742   : > { %v7103_v28 = vpop.eup %7102 }
 0x743   : > { %v2435_v24 = vpop.xlane.xlu0 %2434  ;;  %v2472_v35 = vmul.f32 %v7103_v28, %v8885_v16  ;;  %v2439_v39 = vpop.xlane.xlu1 %2438  ;;  %v6832_v28 = vld [vmem:[%s8511_s16 + $0x4] ss:$8 sps:$4 sm:$0xff]  }
 0x744   : > { %7108 = vrcp.f32 %v2435_v24  ;;  %2861 = vmatprep.subr.bf16.mxu1 %v6832_v28 }
 0x745   : > { %7110 = vrcp.f32 %v2429_v41 }
 0x746   : > { %7112 = vrcp.f32 %v2433_v27  ;;  %v6830_v27 = vld [vmem:[%s8511_s16] ss:$8 sps:$4 sm:$0xff]  }
 0x747   : > { %v2445_v26 = vpop.xlane.xlu0 %2444  ;;  %7114 = vrcp.f32 %v2439_v39  ;;  %v2447_v50 = vpop.xlane.xlu1 %2446  ;;  %2862 = vmatpush1.bf16.msra.mxu1 %v6830_v27  ;;  %v6836_v39 = vld [vmem:[%s8511_s16 + $0x20] ss:$8 sps:$4 sm:$0xff]  }
 0x74a   : > { %v7105_v22 = vpop.eup %7104 }
 0x74b   : > { %v2441_v30 = vpop.xlane.xlu0 %2440  ;;  %v2473_v37 = vmul.f32 %v7105_v22, %v8899_v31  ;;  %v7107_v48 = vpop.eup %7106 }
 0x74c   : > { %v2475_v16 = vmul.f32 %v7107_v48, %v8891_v25  ;;  %v2453_v15 = vpop.xlane.xlu1 %2452  ;;  %v6841_v48 = vld [vmem:[%s8511_s16 + $0x34] ss:$8 sps:$4 sm:$0xff]  }
 0x74d   : > { %v2488_v45 = vpack.c.bf16 %v2473_v37, %v2472_v35  ;;  %v6838_v37 = vld [vmem:[%s8511_s16 + $0x24] ss:$8 sps:$4 sm:$0xff]  }
 0x74e   : > { %v7109_v13 = vpop.eup %7108 }
 0x74f   : > { %v2443_v46 = vpop.xlane.xlu0 %2442  ;;  %6247 = vmatprep.mubr.bf16.mxu0 %v2488_v45  ;;  %v7111_v49 = vpop.eup %7110  ;;  %v2477_v31 = vmul.f32 %v7109_v13, %v8907_v33  ;;  %v6839_v13 = vld [vmem:[%s8511_s16 + $0x30] ss:$8 sps:$4 sm:$0xff]  }
 0x750   : > { %7116 = vrcp.f32 %v2443_v46  ;;  %v7113_v54 = vpop.eup %7112  ;;  %v2474_v56 = vmul.f32 %v7111_v49, %v8880_v58  ;;  %v6844_v49 = vld [vmem:[%s8511_s16 + $0x44] ss:$8 sps:$4 sm:$0xff]  }
 0x751   : > { %7118 = vrcp.f32 %v2437_v23  ;;  %v2476_v60 = vmul.f32 %v7113_v54, %v8901_v32  ;;  %v7115_v38 = vpop.eup %7114  ;;  %v6842_v54 = vld [vmem:[%s8511_s16 + $0x40] ss:$8 sps:$4 sm:$0xff]  }
 0x752   : > { %7120 = vrcp.f32 %v2441_v30  ;;  %v2489_v61 = vpack.c.bf16 %v2475_v16, %v2474_v56  ;;  %v2479_v25 = vmul.f32 %v7115_v38, %v8905_v43  ;;  %v6835_v30 = vld [vmem:[%s8511_s16 + $0x14] ss:$8 sps:$4 sm:$0xff]  }
 0x753   : > { %v6653_v40 = vpop.permute.xlu0 %6652  ;;  %7122 = vrcp.f32 %v2447_v50  ;;  %v2490_v63 = vpack.c.bf16 %v2477_v31, %v2476_v60  ;;  %2863 = vmatprep.subr.bf16.mxu1 %v6835_v30  ;;  %v6845_v31 = vld [vmem:[%s8511_s16 + $0x50] ss:$8 sps:$4 sm:$0xff]   ;;  %v6850_v60 = vld [vmem:[%s8511_s16 + $0x64] ss:$8 sps:$4 sm:$0xff]  }
 0x754   : > { %v6655_v14 = vunpack.i.h.bf16 %v6653_v40  ;;  %v6654_v18 = vunpack.i.l.bf16 %v6653_v40  ;;  %7124 = vrcp.f32 %v2445_v26 }
 0x755   : > { %7126 = vrcp.f32 %v2453_v15  ;;  %v6869_v15 = vld [vmem:[%s8511_s16 + $0xd0] ss:$8 sps:$4 sm:$0xff]  }
 0x756   : > { %v2181_v55 = vpack.c.bf16 %v6655_v14, %v6654_v18 }
 0x758   : > { %6245 = vmatprep.subr.bf16.mxu0 %v2181_v55 }
 0x759   : > { %6246 = vmatpush3.bf16.msra.mxu0 %v2181_v55  ;;  %v6847_v55 = vld [vmem:[%s8511_s16 + $0x54] ss:$8 sps:$4 sm:$0xff]  }
 0x75a   : > { %v7117_v59 = vpop.eup %7116 }
 0x75b   : > { %v7119_v7 = vpop.eup %7118  ;;  %v2481_v33 = vmul.f32 %v7117_v59, %v8923_v62  ;;  %v6848_v59 = vld [vmem:[%s8511_s16 + $0x60] ss:$8 sps:$4 sm:$0xff]  }
 0x75c   : > { %6248 = vmatmul.mubr.bf16.vlgmr.msra.gmra.mrb[0].mxu0 %v2489_v61  ;;  %v7121_v8 = vpop.eup %7120  ;;  %v2478_v9 = vmul.f32 %v7119_v7, %v8893_v29  ;;  %v6853_v7 = vld [vmem:[%s8511_s16 + $0x74] ss:$8 sps:$4 sm:$0xff]  }
 0x75d   : > { %6251 = vmatprep.mubr.bf16.mxu0 %v2490_v63  ;;  %v2480_v58 = vmul.f32 %v7121_v8, %v8917_v42  ;;  %v7123_v1 = vpop.eup %7122  ;;  %v6851_v8 = vld [vmem:[%s8511_s16 + $0x70] ss:$8 sps:$4 sm:$0xff]  }
 0x75e   : > { %v2491_v0 = vpack.c.bf16 %v2479_v25, %v2478_v9  ;;  %v7125_v12 = vpop.eup %7124  ;;  %v2483_v52 = vmul.f32 %v7123_v1, %v8913_v53  ;;  %v6856_v25 = vld [vmem:[%s8511_s16 + $0x84] ss:$8 sps:$4 sm:$0xff]   ;;  %v6859_v9 = vld [vmem:[%s8511_s16 + $0x94] ss:$8 sps:$4 sm:$0xff]  }
 0x75f   : > { %v2492_v32 = vpack.c.bf16 %v2481_v33, %v2480_v58  ;;  %v2482_v6 = vmul.f32 %v7125_v12, %v8911_v4  ;;  %v7127_v42 = vpop.eup %7126  ;;  %v6854_v33 = vld [vmem:[%s8511_s16 + $0x80] ss:$8 sps:$4 sm:$0xff]   ;;  %v6857_v58 = vld [vmem:[%s8511_s16 + $0x90] ss:$8 sps:$4 sm:$0xff]   ;;  %v6862_v1 = vld [vmem:[%s8511_s16 + $0xa4] ss:$8 sps:$4 sm:$0xff]  }
 0x760   : > { %v2486_v4 = vmul.f32 %v7127_v42, %v8919_v57  ;;  %v6865_v12 = vld [vmem:[%s8511_s16 + $0xb4] ss:$8 sps:$4 sm:$0xff]  }
 0x761   : > { %v2493_v10 = vpack.c.bf16 %v2483_v52, %v2482_v6  ;;  %v6868_v6 = vld [vmem:[%s8511_s16 + $0xc4] ss:$8 sps:$4 sm:$0xff]   ;;  %v6866_v52 = vld [vmem:[%s8511_s16 + $0xc0] ss:$8 sps:$4 sm:$0xff]  }
 0x764   : > { %6252 = vmatmul.mubr.bf16.gmra.mrb[4].mxu0 %v2491_v0  ;;  %v6860_v0 = vld [vmem:[%s8511_s16 + $0xa0] ss:$8 sps:$4 sm:$0xff]  }
 0x765   : > { %6255 = vmatprep.mubr.bf16.mxu0 %v2492_v32  ;;  %v6863_v32 = vld [vmem:[%s8511_s16 + $0xb0] ss:$8 sps:$4 sm:$0xff]  }
 0x76c   : > { %6256 = vmatmul.mubr.bf16.gmra.mrb[8].mxu0 %v2493_v10  ;;  %v6871_v10 = vld [vmem:[%s8511_s16 + $0xd4] ss:$8 sps:$4 sm:$0xff]  }
 0x780   : > { %v2451_v43 = vpop.xlane.xlu1 %2450 }
 0x781   : > { %7128 = vrcp.f32 %v2451_v43  ;;  %v6874_v43 = vld [vmem:[%s8511_s16 + $0xe4] ss:$8 sps:$4 sm:$0xff]  }
 0x784   : > { %v2455_v62 = vpop.xlane.xlu1 %2454  ;;  %v2449_v29 = vpop.xlane.xlu0 %2448 }
 0x785   : > { %7130 = vrcp.f32 %v2455_v62  ;;  %v6872_v62 = vld [vmem:[%s8511_s16 + $0xe0] ss:$8 sps:$4 sm:$0xff]  }
 0x786   : > { %7132 = vrcp.f32 %v2449_v29  ;;  %v6877_v29 = vld [vmem:[%s8511_s16 + $0xf4] ss:$8 sps:$4 sm:$0xff]  }
 0x78b   : > { %v7129_v41 = vpop.eup %7128 }
 0x78c   : > { %v2485_v23 = vmul.f32 %v7129_v41, %v8934_v51  ;;  %v6875_v41 = vld [vmem:[%s8511_s16 + $0xf0] ss:$8 sps:$4 sm:$0xff]  }
 0x78f   : > { %v7131_v11 = vpop.eup %7130 }
 0x790   : > { %v7133_v17 = vpop.eup %7132  ;;  %v2487_v53 = vmul.f32 %v7131_v11, %v8939_v47 }
 0x791   : > { %v2484_v21 = vmul.f32 %v7133_v17, %v8937_v34  ;;  %v6833_v34 = vld [vmem:[%s8511_s16 + $0x10] ss:$8 sps:$4 sm:$0xff]   ;;  %s9641_s16 = scalar_lea.vmem [#allocation20], %s8517_s28 }
 0x792   : > { %v2495_v24 = vpack.c.bf16 %v2487_v53, %v2486_v4  ;;  %2864 = vmatpush1.bf16.msra.mxu1 %v6833_v34 }
 0x793   : > { %v2494_v26 = vpack.c.bf16 %v2485_v23, %v2484_v21  ;;  %2865 = vmatprep.subr.bf16.mxu1 %v6838_v37 }
 0x795   : > { %6259 = vmatprep.mubr.bf16.mxu0 %v2494_v26 }
 0x796   : > { %6260 = vmatmul.mubr.bf16.gmra.mrb[12].mxu0 %v2495_v24  ;;  %2866 = vmatpush1.bf16.msra.mxu1 %v6836_v39 }
 0x797   : > { %2867 = vmatprep.subr.bf16.mxu1 %v6841_v48 }
 0x79a   : > { %2868 = vmatpush1.bf16.msra.mxu1 %v6839_v13 }
 0x79b   : > { %2869 = vmatprep.subr.bf16.mxu1 %v6844_v49 }
 0x79e   : > { %2870 = vmatpush1.bf16.msra.mxu1 %v6842_v54 }
 0x79f   : > { %2871 = vmatprep.subr.bf16.mxu1 %v6847_v55 }
 0x7a2   : > { %2872 = vmatpush1.bf16.msra.mxu1 %v6845_v31 }
 0x7a3   : > { %2873 = vmatprep.subr.bf16.mxu1 %v6850_v60 }
 0x7a6   : > { %2874 = vmatpush1.bf16.msra.mxu1 %v6848_v59 }
 0x7a7   : > { %2875 = vmatprep.subr.bf16.mxu1 %v6853_v7  ;;  %v2689_v7 = vld [vmem:[%s979_s25] sm:$0x3]  ;;  %s9642_s25 = scalar_lea.vmem [#allocation24], %s8517_s28 }
 0x7aa   : > { %2876 = vmatpush1.bf16.msra.mxu1 %v6851_v8  ;;  %v2694_v8 = vrot.slane %v2689_v7, %v8676_v3 }
 0x7ab   : > { %2877 = vmatprep.subr.bf16.mxu1 %v6856_v25 }
 0x7ae   : > { %2878 = vmatpush1.bf16.msra.mxu1 %v6854_v33 }
 0x7af   : > { %2879 = vmatprep.subr.bf16.mxu1 %v6859_v9 }
 0x7b2   : > { %2880 = vmatpush1.bf16.msra.mxu1 %v6857_v58 }
 0x7b3   : > { %2881 = vmatprep.subr.bf16.mxu1 %v6862_v1 }
 0x7b6   : > { %2882 = vmatpush1.bf16.msra.mxu1 %v6860_v0  ;;  %v7142_v0 = vld [vmem:[#allocation2] sm:$0xff] }
 0x7b7   : > { %2883 = vmatprep.subr.bf16.mxu1 %v6865_v12 }
 0x7ba   : > { %2884 = vmatpush1.bf16.msra.mxu1 %v6863_v32 }
 0x7bb   : > { %2885 = vmatprep.subr.bf16.mxu1 %v6868_v6 }
 0x7be   : > { %2886 = vmatpush1.bf16.msra.mxu1 %v6866_v52  ;;  %v7143_v52 = vld [vmem:[#allocation2 + $0x8] sm:$0xff] }
 0x7bf   : > { %2887 = vmatprep.subr.bf16.mxu1 %v6871_v10 }
 0x7c2   : > { %2888 = vmatpush1.bf16.msra.mxu1 %v6869_v15 }
 0x7c3   : > { %2889 = vmatprep.subr.bf16.mxu1 %v6874_v43  ;;  %v7144_v43 = vld [vmem:[#allocation2 + $0x10] sm:$0xff] }
 0x7c6   : > { %2890 = vmatpush1.bf16.msra.mxu1 %v6872_v62 }
 0x7c7   : > { %2891 = vmatprep.subr.bf16.mxu1 %v6877_v29  ;;  %v7145_v29 = vld [vmem:[#allocation2 + $0x18] sm:$0xff] }
 0x7ca   : > { %2892 = vmatpush1.bf16.msra.mxu1 %v6875_v41 }
 0x82f   : > { %v6249_v22 = vpop.f32.mrb[0].mxu0 }
 0x830   : > { %v8961_v57 = vpop.f32.mrb[1].mxu0 }
 0x831   : > { %v6250_v47 = vpop.f32.mrb[2].mxu0 }
 0x832   : > { %v6656_v35 = vpack.i.bf16 %v6250_v47, %v6249_v22  ;;  %v8965_v51 = vpop.f32.mrb[3].mxu0 }
 0x834   : > { %6657 = vrot.lane.b32.xlu0 %v6656_v35, %s7801_s17 }
 0x837   : > { %v8970_v45 = vpop.f32.mrb[4].mxu0 }
 0x838   : > { %v2546_v46 = vpop.f32.mrb[5].mxu0 }
 0x839   : > { %v8973_v40 = vpop.f32.mrb[6].mxu0 }
 0x83a   : > { %v6681_v14 = vpack.i.bf16 %v8973_v40, %v8970_v45  ;;  %v2549_v18 = vpop.f32.mrb[7].mxu0 }
 0x83b   : > { %v6661_v50 = vpack.i.bf16 %v2549_v18, %v2546_v46 }
 0x83d   : > { %6662 = vrot.lane.b32.xlu1 %v6661_v50, %s7803_s1 }
 0x83f   : > { %v6257_v16 = vpop.f32.mrb[8].mxu0 }
 0x840   : > { %v8983_v56 = vpop.f32.mrb[9].mxu0 }
 0x841   : > { %v6258_v61 = vpop.f32.mrb[10].mxu0 }
 0x842   : > { %v6666_v38 = vpack.i.bf16 %v6258_v61, %v6257_v16  ;;  %v8986_v63 = vpop.f32.mrb[11].mxu0 }
 0x844   : > { %6667 = vrot.lane.b32.xlu1 %v6666_v38, %s7801_s17 }
 0x869   : > { %v6261_v42 = vpop.f32.mrb[12].mxu0 }
 0x86a   : > { %v2578_v11 = vpop.f32.mrb[13].mxu0 }
 0x86b   : > { %v6262_v17 = vpop.f32.mrb[14].mxu0 }
 0x86c   : > { %v6671_v4 = vpack.i.bf16 %v6262_v17, %v6261_v42  ;;  %v2581_v53 = vpop.f32.mrb[15].mxu0  ;;  %v2975_v17 = vld [vmem:[%s8521_s7] sm:$0xff] }
 0x86d   : > { %v6676_v21 = vpack.i.bf16 %v2581_v53, %v2578_v11  ;;  %v2976_v53 = vld [vmem:[%s8521_s7 + $0x8] sm:$0xff] }
 0x86e   : > { %6672 = vrot.lane.b32.xlu1 %v6671_v4, %s7802_s29  ;;  %v2979_v4 = vld [vmem:[%s8521_s7 + $0x20] sm:$0xff] }
 0x872   : > { %6677 = vrot.lane.b32.xlu1 %v6676_v21, %s7803_s1  ;;  %v5841_v21 = vcombine.low %v2975_v17, %v2979_v4 }
 0x876   : > { %6682 = vrot.lane.b32.xlu1 %v6681_v14, %s7802_s29 }
 0x8a6   : > { %v6658_v27 = vpop.permute.xlu0 %6657 }
 0x8a7   : > { %v6660_v30 = vunpack.i.h.bf16 %v6658_v27  ;;  %v6659_v47 = vunpack.i.l.bf16 %v6658_v27  ;;  %v2987_v27 = vld [vmem:[%s8521_s7 + $0x60] sm:$0xff] }
 0x8a9   : > { %v2641_v49 = vsel %vm2198_vm2, %v8961_v57, %v6659_v47  ;;  %v2642_v16 = vsel %vm2198_vm2, %v8965_v51, %v6660_v30  ;;  %v2698_v51 = vrot.slane %v2689_v7, %v8682_v5  ;;  %v2984_v47 = vld [vmem:[%s8521_s7 + $0x48] sm:$0xff] }
 0x8af   : > { %v6663_v23 = vpop.permute.xlu1 %6662 }
 0x8b0   : > { %v6665_v35 = vunpack.i.h.bf16 %v6663_v23  ;;  %v6664_v37 = vunpack.i.l.bf16 %v6663_v23  ;;  %v5842_v23 = vcombine.high %v2975_v17, %v2979_v4  ;;  %v3031_v4 = vld [vmem:[%s8521_s7 + $0x1c0] sm:$0xff] }
 0x8b2   : > { %v2645_v61 = vsel %vm2643_vm3, %v2642_v16, %v6665_v35  ;;  %v2644_v38 = vsel %vm2643_vm3, %v2641_v49, %v6664_v37  ;;  %v2991_v35 = vld [vmem:[%s8521_s7 + $0x80] sm:$0xff]  ;;  %3785 = vmatprep.subr.bf16.mxu0 %v5842_v23  ;;  %v3036_v23 = vld [vmem:[%s8521_s7 + $0x1e8] sm:$0xff] }
 0x8b3   : > { %3786 = vmatpush1.bf16.msra.mxu0 %v5841_v21  ;;  %v3003_v49 = vld [vmem:[%s8521_s7 + $0xe0] sm:$0xff]  ;;  %v3032_v21 = vld [vmem:[%s8521_s7 + $0x1c8] sm:$0xff] }
 0x8b6   : > { %v6668_v24 = vpop.permute.xlu1 %6667 }
 0x8b7   : > { %v6670_v28 = vunpack.i.h.bf16 %v6668_v24  ;;  %v6669_v22 = vunpack.i.l.bf16 %v6668_v24  ;;  %v2980_v24 = vld [vmem:[%s8521_s7 + $0x28] sm:$0xff] }
 0x8b9   : > { %v2649_v48 = vsel %vm2198_vm2, %v8983_v56, %v6669_v22  ;;  %v2650_v45 = vsel %vm2198_vm2, %v8986_v63, %v6670_v28  ;;  %v5843_v28 = vcombine.low %v2976_v53, %v2980_v24  ;;  %v5844_v22 = vcombine.high %v2976_v53, %v2980_v24  ;;  %v3035_v53 = vld [vmem:[%s8521_s7 + $0x1e0] sm:$0xff] }
 0x8bb   : > { %3828 = vmatprep.subr.bf16.mxu1 %v5844_v22  ;;  %v3039_v22 = vld [vmem:[%s8521_s7 + $0x200] sm:$0xff] }
 0x8e0   : > { %v6673_v26 = vpop.permute.xlu1 %6672 }
 0x8e1   : > { %v6675_v40 = vunpack.i.h.bf16 %v6673_v26  ;;  %v6674_v13 = vunpack.i.l.bf16 %v6673_v26  ;;  %v2983_v26 = vld [vmem:[%s8521_s7 + $0x40] sm:$0xff] }
 0x8e2   : > { %v5850_v30 = vcombine.high %v2983_v26, %v2987_v27 }
 0x8e4   : > { %v6678_v34 = vpop.permute.xlu1 %6677  ;;  %3787 = vmatprep.subr.bf16.mxu0 %v5850_v30  ;;  %v3043_v30 = vld [vmem:[%s8521_s7 + $0x220] sm:$0xff] }
 0x8e5   : > { %v6680_v39 = vunpack.i.h.bf16 %v6678_v34  ;;  %v6679_v46 = vunpack.i.l.bf16 %v6678_v34  ;;  %v2988_v34 = vld [vmem:[%s8521_s7 + $0x68] sm:$0xff] }
 0x8e6   : > { %v5852_v37 = vcombine.high %v2984_v47, %v2988_v34 }
 0x8e7   : > { %v2652_v14 = vsel %vm2643_vm3, %v2650_v45, %v6680_v39  ;;  %v2651_v18 = vsel %vm2643_vm3, %v2649_v48, %v6679_v46  ;;  %v2995_v39 = vld [vmem:[%s8521_s7 + $0xa0] sm:$0xff]  ;;  %v2992_v46 = vld [vmem:[%s8521_s7 + $0x88] sm:$0xff]  ;;  %v5849_v45 = vcombine.low %v2983_v26, %v2987_v27  ;;  %v5898_v27 = vcombine.high %v3031_v4, %v3035_v53 }
 0x8e8   : > { %v6683_v50 = vpop.permute.xlu1 %6682  ;;  %v2653_v54 = vsel %vm2646_vm4, %v2651_v18, %v6674_v13  ;;  %v2654_v55 = vsel %vm2646_vm4, %v2652_v14, %v6675_v40  ;;  %v2996_v48 = vld [vmem:[%s8521_s7 + $0xa8] sm:$0xff]  ;;  %v5851_v40 = vcombine.low %v2984_v47, %v2988_v34  ;;  %v5858_v13 = vcombine.high %v2991_v35, %v2995_v39  ;;  %v2999_v18 = vld [vmem:[%s8521_s7 + $0xc0] sm:$0xff] }
 0x8e9   : > { %v6685_v31 = vunpack.i.h.bf16 %v6683_v50  ;;  %v6684_v56 = vunpack.i.l.bf16 %v6683_v50  ;;  %v2656_v60 = vpack.c.bf16 %v2654_v55, %v2653_v54  ;;  %v5860_v14 = vcombine.high %v2992_v46, %v2996_v48  ;;  %v3000_v50 = vld [vmem:[%s8521_s7 + $0xc8] sm:$0xff]  ;;  %3788 = vmatpush1.bf16.msra.mxu0 %v5849_v45  ;;  %v3051_v45 = vld [vmem:[%s8521_s7 + $0x260] sm:$0xff] }
 0x8ea   : > { %v3004_v54 = vld [vmem:[%s8521_s7 + $0xe8] sm:$0xff]  ;;  %v5857_v55 = vcombine.low %v2991_v35, %v2995_v39  ;;  %3789 = vmatprep.subr.bf16.mxu0 %v5858_v13  ;;  %v5859_v16 = vcombine.low %v2992_v46, %v2996_v48  ;;  %v5897_v35 = vcombine.low %v3031_v4, %v3035_v53  ;;  %v5906_v39 = vcombine.high %v3039_v22, %v3043_v30  ;;  %v3047_v48 = vld [vmem:[%s8521_s7 + $0x240] sm:$0xff] }
 0x8eb   : > { %v2648_v63 = vsel %vm2646_vm4, %v2645_v61, %v6685_v31  ;;  %v2647_v59 = vsel %vm2646_vm4, %v2644_v38, %v6684_v56  ;;  %2893 = vmatprep.mubr.bf16.mxu1 %v2656_v60  ;;  %v5866_v31 = vcombine.high %v2999_v18, %v3003_v49  ;;  %v5868_v56 = vcombine.high %v3000_v50, %v3004_v54  ;;  %v3007_v60 = vld [vmem:[%s8521_s7 + $0x100] sm:$0xff]  ;;  %v3008_v38 = vld [vmem:[%s8521_s7 + $0x108] sm:$0xff] }
 0x8ec   : > { %v2655_v57 = vpack.c.bf16 %v2648_v63, %v2647_v59  ;;  %v3011_v61 = vld [vmem:[%s8521_s7 + $0x120] sm:$0xff]  ;;  %v3012_v63 = vld [vmem:[%s8521_s7 + $0x128] sm:$0xff]  ;;  %v5865_v59 = vcombine.low %v2999_v18, %v3003_v49  ;;  %v5914_v49 = vcombine.high %v3047_v48, %v3051_v45 }
 0x8ed   : > { %3790 = vmatpush1.bf16.msra.mxu0 %v5857_v55  ;;  %v5874_v7 = vcombine.high %v3007_v60, %v3011_v61  ;;  %v3040_v47 = vld [vmem:[%s8521_s7 + $0x208] sm:$0xff]  ;;  %v3075_v4 = vld [vmem:[%s8521_s7 + $0x320] sm:$0xff] }
 0x8ee   : > { %2894 = vmatmul.mubr.bf16.vlgmr.msra.gmra.mrb[28].mxu1 %v2655_v57  ;;  %3791 = vmatprep.subr.bf16.mxu0 %v5866_v31  ;;  %v5867_v57 = vcombine.low %v3000_v50, %v3004_v54  ;;  %v3044_v34 = vld [vmem:[%s8521_s7 + $0x228] sm:$0xff]  ;;  %v5913_v54 = vcombine.low %v3047_v48, %v3051_v45  ;;  %v3091_v48 = vld [vmem:[%s8521_s7 + $0x3a0] sm:$0xff] }
 0x8ef   : > { %3829 = vmatpush1.bf16.msra.mxu1 %v5843_v28  ;;  %v5900_v28 = vcombine.high %v3032_v21, %v3036_v23  ;;  %v5908_v46 = vcombine.high %v3040_v47, %v3044_v34  ;;  %v3052_v13 = vld [vmem:[%s8521_s7 + $0x268] sm:$0xff]  ;;  %v5907_v18 = vcombine.low %v3040_v47, %v3044_v34 }
 0x8f0   : > { %3830 = vmatprep.subr.bf16.mxu1 %v5852_v37  ;;  %v5899_v37 = vcombine.low %v3032_v21, %v3036_v23  ;;  %v3072_v53 = vld [vmem:[%s8521_s7 + $0x308] sm:$0xff] }
 0x8f1   : > { %3792 = vmatpush1.bf16.msra.mxu0 %v5865_v59  ;;  %v3076_v23 = vld [vmem:[%s8521_s7 + $0x328] sm:$0xff] }
 0x8f2   : > { %3793 = vmatprep.subr.bf16.mxu0 %v5874_v7  ;;  %v3084_v34 = vld [vmem:[%s8521_s7 + $0x368] sm:$0xff] }
 0x8f3   : > { %3831 = vmatpush1.bf16.msra.mxu1 %v5851_v40  ;;  %v3048_v40 = vld [vmem:[%s8521_s7 + $0x248] sm:$0xff] }
 0x8f4   : > { %3832 = vmatprep.subr.bf16.mxu1 %v5860_v14  ;;  %v5905_v14 = vcombine.low %v3039_v22, %v3043_v30  ;;  %v5916_v50 = vcombine.high %v3048_v40, %v3052_v13  ;;  %v5915_v55 = vcombine.low %v3048_v40, %v3052_v13  ;;  %v3083_v22 = vld [vmem:[%s8521_s7 + $0x360] sm:$0xff]  ;;  %v3080_v30 = vld [vmem:[%s8521_s7 + $0x348] sm:$0xff] }
 0x8f5   : > { %v3088_v45 = vld [vmem:[%s8521_s7 + $0x388] sm:$0xff] }
 0x8f6   : > { %v3092_v13 = vld [vmem:[%s8521_s7 + $0x3a8] sm:$0xff] }
 0x8f7   : > { %3833 = vmatpush1.bf16.msra.mxu1 %v5859_v16 }
 0x8f8   : > { %3834 = vmatprep.subr.bf16.mxu1 %v5868_v56 }
 0x8fb   : > { %3835 = vmatpush1.bf16.msra.mxu1 %v5867_v57 }
 0x9c1   : > { %v2895_v25 = vpop.f32.mrb[28].mxu1 }
 0x9c2   : > { %v2896_v33 = vadd.f32 %v2895_v25, %v2694_v8  ;;  %v2897_v9 = vpop.f32.mrb[29].mxu1  ;;  %v3019_v25 = vld [vmem:[%s8521_s7 + $0x160] sm:$0xff] }
 0x9c3   : > { %v2898_v58 = vadd.f32 %v2897_v9, %v2698_v51  ;;  %v2899_v1 = vpop.f32.mrb[30].mxu1  ;;  %v3020_v9 = vld [vmem:[%s8521_s7 + $0x168] sm:$0xff] }
 0x9c4   : > { %v9034_v12 = vadd.f32 %v7142_v0, %v2896_v33  ;;  %v2900_v32 = vadd.f32 %v2899_v1, %v2694_v8  ;;  %v2901_v6 = vpop.f32.mrb[31].mxu1  ;;  %v5876_v8 = vcombine.high %v3008_v38, %v3012_v63  ;;  %v3016_v33 = vld [vmem:[%s8521_s7 + $0x148] sm:$0xff]  ;;  %v5875_v1 = vcombine.low %v3008_v38, %v3012_v63 }
 0x9c5   : > { %v9036_v10 = vadd.f32 %v7143_v52, %v2898_v58  ;;  %v2902_v15 = vadd.f32 %v2901_v6, %v2698_v51  ;;  %v3015_v51 = vld [vmem:[%s8521_s7 + $0x140] sm:$0xff]  ;;  %v5873_v58 = vcombine.low %v3007_v60, %v3011_v61 }
 0x9c6   : > { %v9038_v62 = vadd.f32 %v7144_v43, %v2900_v32  ;;  %v5882_v0 = vcombine.high %v3015_v51, %v3019_v25  ;;  %3836 = vmatprep.subr.bf16.mxu1 %v5876_v8  ;;  %v5884_v32 = vcombine.high %v3016_v33, %v3020_v9  ;;  %v3023_v6 = vld [vmem:[%s8521_s7 + $0x180] sm:$0xff]  ;;  %v3028_v43 = vld [vmem:[%s8521_s7 + $0x1a8] sm:$0xff] }
 0x9c7   : > { %v9040_v42 = vadd.f32 %v7145_v29, %v2902_v15  ;;  %v2910_v41 = vadd.f32 %v9036_v10, %v9034_v12  ;;  %v3027_v52 = vld [vmem:[%s8521_s7 + $0x1a0] sm:$0xff]  ;;  %v3024_v15 = vld [vmem:[%s8521_s7 + $0x188] sm:$0xff]  ;;  %3794 = vmatpush1.bf16.msra.mxu0 %v5873_v58  ;;  %v5881_v29 = vcombine.low %v3015_v51, %v3019_v25  ;;  %3837 = vmatpush1.bf16.msra.mxu1 %v5875_v1 }
 0x9c8   : > { %3795 = vmatprep.subr.bf16.mxu0 %v5882_v0  ;;  %3838 = vmatprep.subr.bf16.mxu1 %v5884_v32  ;;  %v5892_v17 = vcombine.high %v3024_v15, %v3028_v43  ;;  %v5889_v24 = vcombine.low %v3023_v6, %v3027_v52  ;;  %v5891_v26 = vcombine.low %v3024_v15, %v3028_v43  ;;  %v3059_v51 = vld [vmem:[%s8521_s7 + $0x2a0] sm:$0xff]  ;;  %v3056_v25 = vld [vmem:[%s8521_s7 + $0x288] sm:$0xff] }
 0x9c9   : > { %2911 = vadd.xlane.f32.xlu0 %v2910_v41  ;;  %v2913_v11 = vadd.f32 %v9040_v42, %v9038_v62  ;;  %v5883_v41 = vcombine.low %v3016_v33, %v3020_v9  ;;  %v3060_v9 = vld [vmem:[%s8521_s7 + $0x2a8] sm:$0xff]  ;;  %v3063_v32 = vld [vmem:[%s8521_s7 + $0x2c0] sm:$0xff] }
 0x9ca   : > { %v5923_v1 = vcombine.low %v3056_v25, %v3060_v9  ;;  %v5924_v0 = vcombine.high %v3056_v25, %v3060_v9  ;;  %v3068_v43 = vld [vmem:[%s8521_s7 + $0x2e8] sm:$0xff] }
 0x9cb   : > { %2914 = vadd.xlane.f32.xlu1 %v2913_v11  ;;  %v5890_v11 = vcombine.high %v3023_v6, %v3027_v52  ;;  %3796 = vmatpush1.bf16.msra.mxu0 %v5881_v29  ;;  %v3067_v6 = vld [vmem:[%s8521_s7 + $0x2e0] sm:$0xff]  ;;  %v3064_v52 = vld [vmem:[%s8521_s7 + $0x2c8] sm:$0xff] }
 0x9cc   : > { %3839 = vmatpush1.bf16.msra.mxu1 %v5883_v41  ;;  %v5930_v15 = vcombine.high %v3063_v32, %v3067_v6  ;;  %v5929_v29 = vcombine.low %v3063_v32, %v3067_v6  ;;  %v5931_v41 = vcombine.low %v3064_v52, %v3068_v43  ;;  %v2908_v6 = vld [vmem:[%s1024_s3] sm:$0x3] }
 0x9cd   : > { %3797 = vmatprep.subr.bf16.mxu0 %v5890_v11  ;;  %3840 = vmatprep.subr.bf16.mxu1 %v5892_v17  ;;  %v5932_v11 = vcombine.high %v3064_v52, %v3068_v43  ;;  %v3071_v17 = vld [vmem:[%s8521_s7 + $0x300] sm:$0xff] }
 0x9ce   : > { %v5938_v21 = vcombine.high %v3071_v17, %v3075_v4 }
 0x9cf   : > { %3798 = vmatpush1.bf16.msra.mxu0 %v5889_v24  ;;  %v5937_v24 = vcombine.low %v3071_v17, %v3075_v4 }
 0x9d0   : > { %3841 = vmatpush1.bf16.msra.mxu1 %v5891_v26  ;;  %3799 = vmatprep.subr.bf16.mxu0 %v5898_v27  ;;  %v5939_v26 = vcombine.low %v3072_v53, %v3076_v23  ;;  %v5940_v27 = vcombine.high %v3072_v53, %v3076_v23 }
 0x9d1   : > { %3842 = vmatprep.subr.bf16.mxu1 %v5900_v28  ;;  %v3079_v28 = vld [vmem:[%s8521_s7 + $0x340] sm:$0xff] }
 0x9d2   : > { %v5946_v47 = vcombine.high %v3079_v28, %v3083_v22 }
 0x9d3   : > { %3800 = vmatpush1.bf16.msra.mxu0 %v5897_v35  ;;  %v5945_v35 = vcombine.low %v3079_v28, %v3083_v22 }
 0x9d4   : > { %3843 = vmatpush1.bf16.msra.mxu1 %v5899_v37  ;;  %3801 = vmatprep.subr.bf16.mxu0 %v5906_v39  ;;  %v5947_v37 = vcombine.low %v3080_v30, %v3084_v34  ;;  %v5948_v39 = vcombine.high %v3080_v30, %v3084_v34  ;;  %v2989_v34 = vld [vmem:[%s8521_s7 + $0x70] sm:$0xff] }
 0x9d5   : > { %3844 = vmatprep.subr.bf16.mxu1 %v5908_v46  ;;  %v3087_v46 = vld [vmem:[%s8521_s7 + $0x380] sm:$0xff] }
 0x9d6   : > { %v5954_v40 = vcombine.high %v3087_v46, %v3091_v48 }
 0x9d7   : > { %3802 = vmatpush1.bf16.msra.mxu0 %v5905_v14  ;;  %v5953_v14 = vcombine.low %v3087_v46, %v3091_v48 }
 0x9d8   : > { %3845 = vmatpush1.bf16.msra.mxu1 %v5907_v18  ;;  %3803 = vmatprep.subr.bf16.mxu0 %v5914_v49  ;;  %v5955_v18 = vcombine.low %v3088_v45, %v3092_v13  ;;  %v5956_v49 = vcombine.high %v3088_v45, %v3092_v13  ;;  %v2997_v45 = vld [vmem:[%s8521_s7 + $0xb0] sm:$0xff]  ;;  %v2998_v13 = vld [vmem:[%s8521_s7 + $0xb8] sm:$0xff] }
 0x9d9   : > { %3846 = vmatprep.subr.bf16.mxu1 %v5916_v50  ;;  %v3095_v50 = vld [vmem:[%s8521_s7 + $0x3c0] sm:$0xff] }
 0x9db   : > { %3804 = vmatpush1.bf16.msra.mxu0 %v5913_v54  ;;  %v3099_v54 = vld [vmem:[%s8521_s7 + $0x3e0] sm:$0xff] }
 0x9dc   : > { %3847 = vmatpush1.bf16.msra.mxu1 %v5915_v55  ;;  %v3096_v55 = vld [vmem:[%s8521_s7 + $0x3c8] sm:$0xff] }
 0x9dd   : > { %3848 = vmatprep.subr.bf16.mxu1 %v5924_v0 }
 0x9e0   : > { %3849 = vmatpush1.bf16.msra.mxu1 %v5923_v1 }
 0x9e1   : > { %3850 = vmatprep.subr.bf16.mxu1 %v5932_v11  ;;  %v2951_v11 = vrot.slane %v2908_v6, %v8682_v5 }
 0x9e4   : > { %3851 = vmatpush1.bf16.msra.mxu1 %v5931_v41  ;;  %v2909_v41 = vld [vmem:[%s1033_s9] sm:$0x3] }
 0x9e5   : > { %3852 = vmatprep.subr.bf16.mxu1 %v5940_v27  ;;  %v2962_v4 = vrot.slane %v2909_v41, %v8676_v3  ;;  %v2966_v53 = vrot.slane %v2909_v41, %v8682_v5  ;;  %v3026_v41 = vld [vmem:[%s8521_s7 + $0x198] sm:$0xff] }
 0x9e8   : > { %3853 = vmatpush1.bf16.msra.mxu1 %v5939_v26 }
 0x9e9   : > { %3854 = vmatprep.subr.bf16.mxu1 %v5948_v39  ;;  %v2993_v39 = vld [vmem:[%s8521_s7 + $0x90] sm:$0xff] }
 0x9ec   : > { %3855 = vmatpush1.bf16.msra.mxu1 %v5947_v37 }
 0x9ed   : > { %3856 = vmatprep.subr.bf16.mxu1 %v5956_v49  ;;  %v5862_v49 = vcombine.high %v2993_v39, %v2997_v45 }
 0x9f0   : > { %3857 = vmatpush1.bf16.msra.mxu1 %v5955_v18 }
 0xa56   : > { %v2912_v16 = vpop.xlane.xlu0 %2911 }
 0xa57   : > { %v2917_v31 = vmul.f32 0.00390625, %v2912_v16  ;;  %v5961_v16 = vcombine.low %v3095_v50, %v3099_v54 }
 0xa58   : > { %v2915_v56 = vpop.xlane.xlu1 %2914 }
 0xa59   : > { %v9087_v60 = vsub.f32 %v9034_v12, %v2917_v31  ;;  %v9090_v61 = vsub.f32 %v9036_v10, %v2917_v31  ;;  %v2918_v38 = vmul.f32 0.00390625, %v2915_v56  ;;  %v5962_v31 = vcombine.high %v3095_v50, %v3099_v54  ;;  %v3100_v56 = vld [vmem:[%s8521_s7 + $0x3e8] sm:$0xff]  ;;  %v3001_v54 = vld [vmem:[%s8521_s7 + $0xd0] sm:$0xff] }
 0xa5b   : > { %v9093_v63 = vsub.f32 %v9038_v62, %v2918_v38  ;;  %v9096_v59 = vsub.f32 %v9040_v42, %v2918_v38  ;;  %v2923_v57 = vmul.f32 %v9087_v60, %v9087_v60  ;;  %v2924_v7 = vmul.f32 %v9090_v61, %v9090_v61  ;;  %v3055_v42 = vld [vmem:[%s8521_s7 + $0x280] sm:$0xff] }
 0xa5c   : > { %v5922_v33 = vcombine.high %v3055_v42, %v3059_v51  ;;  %v5921_v58 = vcombine.low %v3055_v42, %v3059_v51  ;;  %v5963_v38 = vcombine.low %v3096_v55, %v3100_v56 }
 0xa5d   : > { %v2927_v8 = vadd.f32 %v2924_v7, %v2923_v57  ;;  %v2925_v12 = vmul.f32 %v9093_v63, %v9093_v63  ;;  %v2926_v10 = vmul.f32 %v9096_v59, %v9096_v59  ;;  %v5964_v57 = vcombine.high %v3096_v55, %v3100_v56  ;;  %v2977_v7 = vld [vmem:[%s8521_s7 + $0x10] sm:$0xff] }
 0xa5e   : > { %3805 = vmatprep.subr.bf16.mxu0 %v5922_v33  ;;  %v3005_v55 = vld [vmem:[%s8521_s7 + $0xf0] sm:$0xff]  ;;  %v5861_v56 = vcombine.low %v2993_v39, %v2997_v45  ;;  %v3042_v39 = vld [vmem:[%s8521_s7 + $0x218] sm:$0xff] }
 0xa5f   : > { %2928 = vadd.xlane.f32.xlu0 %v2927_v8  ;;  %v2930_v62 = vadd.f32 %v2926_v10, %v2925_v12  ;;  %3806 = vmatpush1.bf16.msra.mxu0 %v5921_v58  ;;  %v2981_v8 = vld [vmem:[%s8521_s7 + $0x30] sm:$0xff]  ;;  %v2978_v12 = vld [vmem:[%s8521_s7 + $0x18] sm:$0xff] }
 0xa60   : > { %3807 = vmatprep.subr.bf16.mxu0 %v5930_v15  ;;  %3858 = vmatprep.subr.bf16.mxu1 %v5964_v57  ;;  %v5846_v10 = vcombine.high %v2977_v7, %v2981_v8  ;;  %v5845_v42 = vcombine.low %v2977_v7, %v2981_v8  ;;  %v2947_v15 = vrot.slane %v2908_v6, %v8676_v3  ;;  %v3009_v8 = vld [vmem:[%s8521_s7 + $0x110] sm:$0xff] }
 0xa61   : > { %3859 = vmatpush1.bf16.msra.mxu1 %v5963_v38  ;;  %v5870_v57 = vcombine.high %v3001_v54, %v3005_v55 }
 0xa63   : > { %2931 = vadd.xlane.f32.xlu0 %v2930_v62  ;;  %3808 = vmatpush1.bf16.msra.mxu0 %v5929_v29  ;;  %v2982_v62 = vld [vmem:[%s8521_s7 + $0x38] sm:$0xff] }
 0xa64   : > { %3809 = vmatprep.subr.bf16.mxu0 %v5938_v21  ;;  %v5847_v51 = vcombine.low %v2978_v12, %v2982_v62  ;;  %v5848_v25 = vcombine.high %v2978_v12, %v2982_v62  ;;  %v3013_v12 = vld [vmem:[%s8521_s7 + $0x130] sm:$0xff]  ;;  %v3014_v62 = vld [vmem:[%s8521_s7 + $0x138] sm:$0xff] }
 0xa66   : > { %3914 = vmatprep.subr.bf16.mxu1 %v5848_v25  ;;  %v5878_v25 = vcombine.high %v3009_v8, %v3013_v12 }
 0xa67   : > { %3810 = vmatpush1.bf16.msra.mxu0 %v5937_v24 }
 0xa68   : > { %3811 = vmatprep.subr.bf16.mxu0 %v5946_v47  ;;  %v2985_v47 = vld [vmem:[%s8521_s7 + $0x50] sm:$0xff] }
 0xa69   : > { %v5854_v46 = vcombine.high %v2985_v47, %v2989_v34 }
 0xa6b   : > { %3812 = vmatpush1.bf16.msra.mxu0 %v5945_v35  ;;  %v2986_v35 = vld [vmem:[%s8521_s7 + $0x58] sm:$0xff] }
 0xa6c   : > { %3813 = vmatprep.subr.bf16.mxu0 %v5954_v40  ;;  %v2994_v40 = vld [vmem:[%s8521_s7 + $0x98] sm:$0xff] }
 0xa6d   : > { %v5864_v50 = vcombine.high %v2994_v40, %v2998_v13  ;;  %v5863_v38 = vcombine.low %v2994_v40, %v2998_v13 }
 0xa6f   : > { %3814 = vmatpush1.bf16.msra.mxu0 %v5953_v14  ;;  %v5853_v14 = vcombine.low %v2985_v47, %v2989_v34 }
 0xa70   : > { %3815 = vmatprep.subr.bf16.mxu0 %v5962_v31  ;;  %v3006_v31 = vld [vmem:[%s8521_s7 + $0xf8] sm:$0xff] }
 0xa73   : > { %3816 = vmatpush1.bf16.msra.mxu0 %v5961_v16  ;;  %v3002_v16 = vld [vmem:[%s8521_s7 + $0xd8] sm:$0xff] }
 0xa74   : > { %3871 = vmatprep.subr.bf16.mxu0 %v5846_v10  ;;  %v5872_v7 = vcombine.high %v3002_v16, %v3006_v31  ;;  %v3010_v10 = vld [vmem:[%s8521_s7 + $0x118] sm:$0xff] }
 0xa75   : > { %v5879_v6 = vcombine.low %v3010_v10, %v3014_v62 }
 0xaec   : > { %v2929_v33 = vpop.xlane.xlu0 %2928 }
 0xaed   : > { %v2933_v9 = vmul.f32 0.00390625, %v2929_v33  ;;  %v5880_v33 = vcombine.high %v3010_v10, %v3014_v62 }
 0xaef   : > { %v2935_v58 = vadd.f32 1e-05, %v2933_v9  ;;  %v3017_v9 = vld [vmem:[%s8521_s7 + $0x150] sm:$0xff] }
 0xaf0   : > { %v2932_v1 = vpop.xlane.xlu0 %2931 }
 0xaf1   : > { %7134 = vrsqrt.f32 %v2935_v58  ;;  %v2934_v0 = vmul.f32 0.00390625, %v2932_v1  ;;  %v3021_v58 = vld [vmem:[%s8521_s7 + $0x170] sm:$0xff]  ;;  %v3018_v1 = vld [vmem:[%s8521_s7 + $0x158] sm:$0xff] }
 0xaf3   : > { %v2936_v32 = vadd.f32 1e-05, %v2934_v0  ;;  %v3022_v0 = vld [vmem:[%s8521_s7 + $0x178] sm:$0xff] }
 0xaf5   : > { %7136 = vrsqrt.f32 %v2936_v32  ;;  %v5877_v32 = vcombine.low %v3009_v8, %v3013_v12 }
 0xafb   : > { %v7135_v52 = vpop.eup %7134 }
 0xafc   : > { %v2939_v43 = vmul.f32 %v7135_v52, %v9087_v60  ;;  %v2940_v29 = vmul.f32 %v7135_v52, %v9090_v61  ;;  %v5886_v52 = vcombine.high %v3017_v9, %v3021_v58 }
 0xafe   : > { %v2954_v21 = vmul.f32 %v2947_v15, %v2939_v43  ;;  %v2955_v61 = vmul.f32 %v2951_v11, %v2940_v29  ;;  %v3025_v43 = vld [vmem:[%s8521_s7 + $0x190] sm:$0xff] }
 0xaff   : > { %v7137_v17 = vpop.eup %7136  ;;  %v3029_v29 = vld [vmem:[%s8521_s7 + $0x1b0] sm:$0xff] }
 0xb00   : > { %v2941_v23 = vmul.f32 %v7137_v17, %v9093_v63  ;;  %v2942_v60 = vmul.f32 %v7137_v17, %v9096_v59  ;;  %v9146_v27 = vadd.f32 %v2966_v53, %v2955_v61  ;;  %v9150_v22 = vadd.f32 %v2962_v4, %v2954_v21  ;;  %v2990_v63 = vld [vmem:[%s8521_s7 + $0x78] sm:$0xff] }
 0xb01   : > { %v5856_v48 = vcombine.high %v2986_v35, %v2990_v63  ;;  %v5855_v18 = vcombine.low %v2986_v35, %v2990_v63  ;;  %v5885_v17 = vcombine.low %v3017_v9, %v3021_v58  ;;  %v3034_v61 = vld [vmem:[%s8521_s7 + $0x1d8] sm:$0xff]  ;;  %v3041_v63 = vld [vmem:[%s8521_s7 + $0x210] sm:$0xff] }
 0xb02   : > { %v2956_v24 = vmul.f32 %v2947_v15, %v2941_v23  ;;  %v2957_v26 = vmul.f32 %v2951_v11, %v2942_v60  ;;  %v5888_v15 = vcombine.high %v3018_v1, %v3022_v0  ;;  %v3030_v11 = vld [vmem:[%s8521_s7 + $0x1b8] sm:$0xff]  ;;  %v3033_v23 = vld [vmem:[%s8521_s7 + $0x1d0] sm:$0xff] }
 0xb03   : > { %v5896_v21 = vcombine.high %v3026_v41, %v3030_v11  ;;  %v3037_v60 = vld [vmem:[%s8521_s7 + $0x1f0] sm:$0xff]  ;;  %v5895_v47 = vcombine.low %v3026_v41, %v3030_v11 }
 0xb04   : > { %v9148_v28 = vadd.f32 %v2966_v53, %v2957_v26  ;;  %v9152_v30 = vadd.f32 %v2962_v4, %v2956_v24  ;;  %v5887_v4 = vcombine.low %v3018_v1, %v3022_v0  ;;  %v5894_v53 = vcombine.high %v3025_v43, %v3029_v29  ;;  %v3038_v24 = vld [vmem:[%s8521_s7 + $0x1f8] sm:$0xff] }
 0xb05   : > { %v5893_v26 = vcombine.low %v3025_v43, %v3029_v29  ;;  %v5902_v34 = vcombine.high %v3033_v23, %v3037_v60  ;;  %v5904_v35 = vcombine.high %v3034_v61, %v3038_v24  ;;  %v5903_v45 = vcombine.low %v3034_v61, %v3038_v24 }
 0xb06   : > { %v2974_v59 = vpack.c.bf16 %v9148_v28, %v9146_v27  ;;  %v9162_v37 = vpack.c.bf16 %v9152_v30, %v9150_v22 }
 0xb08   : > { %3817 = vmatprep.mubr.bf16.mxu0 %v2974_v59  ;;  %3860 = vmatprep.mubr.bf16.mxu1 %v2974_v59 }
 0xb09   : > { %3818 = vmatmul.mubr.bf16.vlgmr.msra.gmra.mrb[16].mxu0 %v9162_v37  ;;  %3861 = vmatmul.mubr.bf16.vlgmr.msra.gmra.mrb[32].mxu1 %v9162_v37 }
 0xb0a   : > { %3872 = vmatpush1.bf16.msra.mxu0 %v5845_v42  ;;  %3915 = vmatpush1.bf16.msra.mxu1 %v5847_v51  ;;  %v5869_v42 = vcombine.low %v3001_v54, %v3005_v55  ;;  %v5871_v51 = vcombine.low %v3002_v16, %v3006_v31 }
 0xb0b   : > { %3903 = vmatprep.mubr.bf16.mxu0 %v2974_v59  ;;  %3946 = vmatprep.mubr.bf16.mxu1 %v2974_v59  ;;  %v3045_v59 = vld [vmem:[%s8521_s7 + $0x230] sm:$0xff] }
 0xb0c   : > { %3873 = vmatprep.subr.bf16.mxu0 %v5854_v46  ;;  %3916 = vmatprep.subr.bf16.mxu1 %v5856_v48  ;;  %v3046_v46 = vld [vmem:[%s8521_s7 + $0x238] sm:$0xff]  ;;  %v5901_v48 = vcombine.low %v3033_v23, %v3037_v60  ;;  %v5910_v40 = vcombine.high %v3041_v63, %v3045_v59  ;;  %v5909_v54 = vcombine.low %v3041_v63, %v3045_v59 }
 0xb0d   : > { %v5912_v13 = vcombine.high %v3042_v39, %v3046_v46  ;;  %v5911_v55 = vcombine.low %v3042_v39, %v3046_v46 }
 0xb0e   : > { %3874 = vmatpush1.bf16.msra.mxu0 %v5853_v14  ;;  %3917 = vmatpush1.bf16.msra.mxu1 %v5855_v18  ;;  %v3049_v14 = vld [vmem:[%s8521_s7 + $0x250] sm:$0xff] }
 0xb0f   : > { %3875 = vmatprep.subr.bf16.mxu0 %v5862_v49  ;;  %3918 = vmatprep.subr.bf16.mxu1 %v5864_v50  ;;  %v3053_v18 = vld [vmem:[%s8521_s7 + $0x270] sm:$0xff]  ;;  %v3050_v49 = vld [vmem:[%s8521_s7 + $0x258] sm:$0xff] }
 0xb10   : > { %v3054_v50 = vld [vmem:[%s8521_s7 + $0x278] sm:$0xff]  ;;  %v5918_v16 = vcombine.high %v3049_v14, %v3053_v18  ;;  %v5917_v8 = vcombine.low %v3049_v14, %v3053_v18 }
 0xb11   : > { %v5920_v31 = vcombine.high %v3050_v49, %v3054_v50  ;;  %v5919_v12 = vcombine.low %v3050_v49, %v3054_v50 }
 0xb12   : > { %3876 = vmatpush1.bf16.msra.mxu0 %v5861_v56  ;;  %3919 = vmatpush1.bf16.msra.mxu1 %v5863_v38  ;;  %v3057_v56 = vld [vmem:[%s8521_s7 + $0x290] sm:$0xff] }
 0xb13   : > { %3877 = vmatprep.subr.bf16.mxu0 %v5870_v57  ;;  %3920 = vmatprep.subr.bf16.mxu1 %v5872_v7  ;;  %v3061_v38 = vld [vmem:[%s8521_s7 + $0x2b0] sm:$0xff]  ;;  %v3058_v57 = vld [vmem:[%s8521_s7 + $0x298] sm:$0xff] }
 0xb14   : > { %v3062_v7 = vld [vmem:[%s8521_s7 + $0x2b8] sm:$0xff]  ;;  %v5926_v10 = vcombine.high %v3057_v56, %v3061_v38  ;;  %v5925_v9 = vcombine.low %v3057_v56, %v3061_v38  ;;  %v6883_v56 = vld [vmem:[%s8530_s8 + $0x14] ss:$8 sps:$4 sm:$0xff]   ;;  %v6881_v38 = vld [vmem:[%s8530_s8 + $0x10] ss:$8 sps:$4 sm:$0xff]  }
 0xb15   : > { %v5928_v62 = vcombine.high %v3058_v57, %v3062_v7  ;;  %v5927_v58 = vcombine.low %v3058_v57, %v3062_v7  ;;  %v6886_v57 = vld [vmem:[%s8530_s8 + $0x24] ss:$8 sps:$4 sm:$0xff]   ;;  %v6884_v7 = vld [vmem:[%s8530_s8 + $0x20] ss:$8 sps:$4 sm:$0xff]  }
 0xb16   : > { %3878 = vmatpush1.bf16.msra.mxu0 %v5869_v42  ;;  %3921 = vmatpush1.bf16.msra.mxu1 %v5871_v51  ;;  %v3065_v42 = vld [vmem:[%s8521_s7 + $0x2d0] sm:$0xff] }
 0xb17   : > { %3879 = vmatprep.subr.bf16.mxu0 %v5878_v25  ;;  %3922 = vmatprep.subr.bf16.mxu1 %v5880_v33  ;;  %v3069_v51 = vld [vmem:[%s8521_s7 + $0x2f0] sm:$0xff]  ;;  %v3066_v25 = vld [vmem:[%s8521_s7 + $0x2d8] sm:$0xff] }
 0xb18   : > { %v3070_v33 = vld [vmem:[%s8521_s7 + $0x2f8] sm:$0xff]  ;;  %v5934_v1 = vcombine.high %v3065_v42, %v3069_v51  ;;  %v5933_v43 = vcombine.low %v3065_v42, %v3069_v51  ;;  %v6893_v42 = vld [vmem:[%s8530_s8 + $0x50] ss:$8 sps:$4 sm:$0xff]  }
 0xb19   : > { %v5936_v0 = vcombine.high %v3066_v25, %v3070_v33  ;;  %v5935_v29 = vcombine.low %v3066_v25, %v3070_v33  ;;  %v6898_v51 = vld [vmem:[%s8530_s8 + $0x64] ss:$8 sps:$4 sm:$0xff]   ;;  %v6896_v25 = vld [vmem:[%s8530_s8 + $0x60] ss:$8 sps:$4 sm:$0xff]   ;;  %v6901_v33 = vld [vmem:[%s8530_s8 + $0x74] ss:$8 sps:$4 sm:$0xff]  }
 0xb1a   : > { %3880 = vmatpush1.bf16.msra.mxu0 %v5877_v32  ;;  %3923 = vmatpush1.bf16.msra.mxu1 %v5879_v6  ;;  %v3073_v32 = vld [vmem:[%s8521_s7 + $0x310] sm:$0xff] }
 0xb1b   : > { %3881 = vmatprep.subr.bf16.mxu0 %v5886_v52  ;;  %3924 = vmatprep.subr.bf16.mxu1 %v5888_v15  ;;  %v3077_v6 = vld [vmem:[%s8521_s7 + $0x330] sm:$0xff]  ;;  %v3074_v52 = vld [vmem:[%s8521_s7 + $0x318] sm:$0xff] }
 0xb1c   : > { %v3078_v15 = vld [vmem:[%s8521_s7 + $0x338] sm:$0xff]  ;;  %v5942_v41 = vcombine.high %v3073_v32, %v3077_v6  ;;  %v5941_v23 = vcombine.low %v3073_v32, %v3077_v6  ;;  %v6905_v32 = vld [vmem:[%s8530_s8 + $0x90] ss:$8 sps:$4 sm:$0xff]  }
 0xb1d   : > { %v5944_v11 = vcombine.high %v3074_v52, %v3078_v15  ;;  %v5943_v60 = vcombine.low %v3074_v52, %v3078_v15  ;;  %v6910_v6 = vld [vmem:[%s8530_s8 + $0xa4] ss:$8 sps:$4 sm:$0xff]   ;;  %v6908_v52 = vld [vmem:[%s8530_s8 + $0xa0] ss:$8 sps:$4 sm:$0xff]   ;;  %v6913_v15 = vld [vmem:[%s8530_s8 + $0xb4] ss:$8 sps:$4 sm:$0xff]  }
 0xb1e   : > { %3882 = vmatpush1.bf16.msra.mxu0 %v5885_v17  ;;  %3925 = vmatpush1.bf16.msra.mxu1 %v5887_v4  ;;  %v3081_v17 = vld [vmem:[%s8521_s7 + $0x350] sm:$0xff] }
 0xb1f   : > { %3883 = vmatprep.subr.bf16.mxu0 %v5894_v53  ;;  %3926 = vmatprep.subr.bf16.mxu1 %v5896_v21  ;;  %v3085_v4 = vld [vmem:[%s8521_s7 + $0x370] sm:$0xff]  ;;  %v3082_v53 = vld [vmem:[%s8521_s7 + $0x358] sm:$0xff] }
 0xb20   : > { %v3086_v21 = vld [vmem:[%s8521_s7 + $0x378] sm:$0xff]  ;;  %v5950_v61 = vcombine.high %v3081_v17, %v3085_v4  ;;  %v5949_v63 = vcombine.low %v3081_v17, %v3085_v4  ;;  %v6917_v17 = vld [vmem:[%s8530_s8 + $0xd0] ss:$8 sps:$4 sm:$0xff]  }
 0xb21   : > { %v5952_v24 = vcombine.high %v3082_v53, %v3086_v21  ;;  %v5951_v59 = vcombine.low %v3082_v53, %v3086_v21  ;;  %v6922_v4 = vld [vmem:[%s8530_s8 + $0xe4] ss:$8 sps:$4 sm:$0xff]   ;;  %v6920_v53 = vld [vmem:[%s8530_s8 + $0xe0] ss:$8 sps:$4 sm:$0xff]   ;;  %v6925_v21 = vld [vmem:[%s8530_s8 + $0xf4] ss:$8 sps:$4 sm:$0xff]  }
 0xb22   : > { %3884 = vmatpush1.bf16.msra.mxu0 %v5893_v26  ;;  %3927 = vmatpush1.bf16.msra.mxu1 %v5895_v47  ;;  %v3089_v26 = vld [vmem:[%s8521_s7 + $0x390] sm:$0xff] }
 0xb23   : > { %3885 = vmatprep.subr.bf16.mxu0 %v5902_v34  ;;  %3928 = vmatprep.subr.bf16.mxu1 %v5904_v35  ;;  %v3093_v47 = vld [vmem:[%s8521_s7 + $0x3b0] sm:$0xff]  ;;  %v3090_v34 = vld [vmem:[%s8521_s7 + $0x398] sm:$0xff] }
 0xb24   : > { %v3094_v35 = vld [vmem:[%s8521_s7 + $0x3b8] sm:$0xff]  ;;  %v5958_v39 = vcombine.high %v3089_v26, %v3093_v47  ;;  %v5957_v14 = vcombine.low %v3089_v26, %v3093_v47 }
 0xb25   : > { %v5960_v46 = vcombine.high %v3090_v34, %v3094_v35  ;;  %v5959_v18 = vcombine.low %v3090_v34, %v3094_v35 }
 0xb26   : > { %3886 = vmatpush1.bf16.msra.mxu0 %v5901_v48  ;;  %3929 = vmatpush1.bf16.msra.mxu1 %v5903_v45  ;;  %v3097_v48 = vld [vmem:[%s8521_s7 + $0x3d0] sm:$0xff] }
 0xb27   : > { %3887 = vmatprep.subr.bf16.mxu0 %v5910_v40  ;;  %3930 = vmatprep.subr.bf16.mxu1 %v5912_v13  ;;  %v3101_v45 = vld [vmem:[%s8521_s7 + $0x3f0] sm:$0xff]  ;;  %v3098_v40 = vld [vmem:[%s8521_s7 + $0x3d8] sm:$0xff] }
 0xb28   : > { %v3102_v13 = vld [vmem:[%s8521_s7 + $0x3f8] sm:$0xff]  ;;  %v5966_v49 = vcombine.high %v3097_v48, %v3101_v45  ;;  %s9643_s7 = scalar_lea.vmem [#allocation26], %s8517_s28  ;;  %s9644_s28 = sld [smem:[#allocation46_spill]] }
 0xb29   : > { %v5968_v50 = vcombine.high %v3098_v40, %v3102_v13 }
 0xb2a   : > { %3888 = vmatpush1.bf16.msra.mxu0 %v5909_v54  ;;  %3931 = vmatpush1.bf16.msra.mxu1 %v5911_v55  ;;  %v5965_v54 = vcombine.low %v3097_v48, %v3101_v45  ;;  %v5967_v55 = vcombine.low %v3098_v40, %v3102_v13 }
 0xb2b   : > { %3889 = vmatprep.subr.bf16.mxu0 %v5918_v16  ;;  %3932 = vmatprep.subr.bf16.mxu1 %v5920_v31  ;;  %v6880_v16 = vld [vmem:[%s8530_s8 + $0x4] ss:$8 sps:$4 sm:$0xff]   ;;  %v6878_v31 = vld [vmem:[%s8530_s8] ss:$8 sps:$4 sm:$0xff]  }
 0xb2e   : > { %3890 = vmatpush1.bf16.msra.mxu0 %v5917_v8  ;;  %3933 = vmatpush1.bf16.msra.mxu1 %v5919_v12  ;;  %v6889_v8 = vld [vmem:[%s8530_s8 + $0x34] ss:$8 sps:$4 sm:$0xff]   ;;  %v6887_v12 = vld [vmem:[%s8530_s8 + $0x30] ss:$8 sps:$4 sm:$0xff]   ;;  %p6097_p12 = scmp.ne.s32.totalorder %s9644_s28, 5 }
 0xb2f   : > { %3891 = vmatprep.subr.bf16.mxu0 %v5926_v10  ;;  %3934 = vmatprep.subr.bf16.mxu1 %v5928_v62  ;;  %v6892_v10 = vld [vmem:[%s8530_s8 + $0x44] ss:$8 sps:$4 sm:$0xff]   ;;  %v6895_v62 = vld [vmem:[%s8530_s8 + $0x54] ss:$8 sps:$4 sm:$0xff]   ;;  %s9645_s3 = sld [smem:[#allocation64_spill]] (!%p6097_p12)  ;;  %vm5010_vm5 = vcmask (!%p6097_p12), 130048  }
 0xb30   : > { %s9646_s29 = sld [smem:[#allocation66_spill]] (!%p6097_p12)  ;;  %vm7806_vm6 = vmmov (!%p6097_p12), 0   ;;  %vm5288_vm7 = vcmask (!%p6097_p12), 17408  }
 0xb32   : > { %3892 = vmatpush1.bf16.msra.mxu0 %v5925_v9  ;;  %3935 = vmatpush1.bf16.msra.mxu1 %v5927_v58  ;;  %v6899_v9 = vld [vmem:[%s8530_s8 + $0x70] ss:$8 sps:$4 sm:$0xff]   ;;  %v6904_v58 = vld [vmem:[%s8530_s8 + $0x84] ss:$8 sps:$4 sm:$0xff]  }
 0xb33   : > { %3893 = vmatprep.subr.bf16.mxu0 %v5934_v1  ;;  %3936 = vmatprep.subr.bf16.mxu1 %v5936_v0  ;;  %v6902_v1 = vld [vmem:[%s8530_s8 + $0x80] ss:$8 sps:$4 sm:$0xff]   ;;  %v6907_v0 = vld [vmem:[%s8530_s8 + $0x94] ss:$8 sps:$4 sm:$0xff]  }
 0xb36   : > { %3894 = vmatpush1.bf16.msra.mxu0 %v5933_v43  ;;  %3937 = vmatpush1.bf16.msra.mxu1 %v5935_v29  ;;  %v6911_v43 = vld [vmem:[%s8530_s8 + $0xb0] ss:$8 sps:$4 sm:$0xff]   ;;  %v6916_v29 = vld [vmem:[%s8530_s8 + $0xc4] ss:$8 sps:$4 sm:$0xff]   ;;  %s9647_s1 = smov (!%p6097_p12), %s9646_s29 }
 0xb37   : > { %3895 = vmatprep.subr.bf16.mxu0 %v5942_v41  ;;  %3938 = vmatprep.subr.bf16.mxu1 %v5944_v11  ;;  %v6914_v41 = vld [vmem:[%s8530_s8 + $0xc0] ss:$8 sps:$4 sm:$0xff]   ;;  %v6919_v11 = vld [vmem:[%s8530_s8 + $0xd4] ss:$8 sps:$4 sm:$0xff]  }
 0xb3a   : > { %3896 = vmatpush1.bf16.msra.mxu0 %v5941_v23  ;;  %3939 = vmatpush1.bf16.msra.mxu1 %v5943_v60  ;;  %v6923_v23 = vld [vmem:[%s8530_s8 + $0xf0] ss:$8 sps:$4 sm:$0xff]   ;;  %v6928_v60 = vld [vmem:[%s8530_s8 + $0x104] ss:$8 sps:$4 sm:$0xff]  }
 0xb3b   : > { %3897 = vmatprep.subr.bf16.mxu0 %v5950_v61  ;;  %3940 = vmatprep.subr.bf16.mxu1 %v5952_v24  ;;  %v9258_v61 = vld [vmem:[%s8527_s20] sm:$0xff] }
 0xb3c   : > { %v3108_v24 = vrot.slane %v9258_v61, %v8676_v3  ;;  %v3116_v26 = vrot.slane %v9258_v61, %v1409_v19  ;;  %v3112_v47 = vrot.slane %v9258_v61, %v8682_v5  ;;  %v3120_v34 = vrot.slane %v9258_v61, %v1413_v20 }
 0xb3e   : > { %3898 = vmatpush1.bf16.msra.mxu0 %v5949_v63  ;;  %3941 = vmatpush1.bf16.msra.mxu1 %v5951_v59 }
 0xb3f   : > { %3899 = vmatprep.subr.bf16.mxu0 %v5958_v39  ;;  %3942 = vmatprep.subr.bf16.mxu1 %v5960_v46 }
 0xb42   : > { %3900 = vmatpush1.bf16.msra.mxu0 %v5957_v14  ;;  %3943 = vmatpush1.bf16.msra.mxu1 %v5959_v18 }
 0xb43   : > { %3901 = vmatprep.subr.bf16.mxu0 %v5966_v49  ;;  %3944 = vmatprep.subr.bf16.mxu1 %v5968_v50 }
 0xb46   : > { %3902 = vmatpush1.bf16.msra.mxu0 %v5965_v54  ;;  %3945 = vmatpush1.bf16.msra.mxu1 %v5967_v55 }
 0xb47   : > { %4761 = vmatprep.subr.bf16.mxu0 %v6880_v16 }
 0xb49   : > { %3904 = vmatmul.mubr.bf16.vlgmr.msra.gmra.mrb[20].mxu0 %v9162_v37  ;;  %3947 = vmatmul.mubr.bf16.vlgmr.msra.gmra.mrb[36].mxu1 %v9162_v37  ;;  %v6890_v37 = vld [vmem:[%s8530_s8 + $0x40] ss:$8 sps:$4 sm:$0xff]  }
 0xb4a   : > { %4762 = vmatpush1.bf16.msra.mxu0 %v6878_v31 }
 0xb4b   : > { %4763 = vmatprep.subr.bf16.mxu0 %v6883_v56 }
 0xb4e   : > { %4764 = vmatpush1.bf16.msra.mxu0 %v6881_v38 }
 0xb4f   : > { %4765 = vmatprep.subr.bf16.mxu0 %v6886_v57 }
 0xb52   : > { %4766 = vmatpush1.bf16.msra.mxu0 %v6884_v7 }
 0xb53   : > { %4767 = vmatprep.subr.bf16.mxu0 %v6889_v8 }
 0xb56   : > { %4768 = vmatpush1.bf16.msra.mxu0 %v6887_v12 }
 0xb57   : > { %4769 = vmatprep.subr.bf16.mxu0 %v6892_v10 }
 0xb5a   : > { %4770 = vmatpush1.bf16.msra.mxu0 %v6890_v37 }
 0xb5b   : > { %4771 = vmatprep.subr.bf16.mxu0 %v6895_v62 }
 0xb5e   : > { %4772 = vmatpush1.bf16.msra.mxu0 %v6893_v42  ;;  %v6926_v42 = vld [vmem:[%s8530_s8 + $0x100] ss:$8 sps:$4 sm:$0xff]  }
 0xb5f   : > { %4773 = vmatprep.subr.bf16.mxu0 %v6898_v51  ;;  %v6931_v51 = vld [vmem:[%s8530_s8 + $0x114] ss:$8 sps:$4 sm:$0xff]  }
 0xb62   : > { %4774 = vmatpush1.bf16.msra.mxu0 %v6896_v25  ;;  %v6929_v25 = vld [vmem:[%s8530_s8 + $0x110] ss:$8 sps:$4 sm:$0xff]  }
 0xb63   : > { %4775 = vmatprep.subr.bf16.mxu0 %v6901_v33  ;;  %v6934_v33 = vld [vmem:[%s8530_s8 + $0x124] ss:$8 sps:$4 sm:$0xff]  }
 0xb66   : > { %4776 = vmatpush1.bf16.msra.mxu0 %v6899_v9  ;;  %v6932_v9 = vld [vmem:[%s8530_s8 + $0x120] ss:$8 sps:$4 sm:$0xff]  }
 0xb67   : > { %4777 = vmatprep.subr.bf16.mxu0 %v6904_v58  ;;  %v6937_v58 = vld [vmem:[%s8530_s8 + $0x134] ss:$8 sps:$4 sm:$0xff]  }
 0xb6a   : > { %4778 = vmatpush1.bf16.msra.mxu0 %v6902_v1  ;;  %v6935_v1 = vld [vmem:[%s8530_s8 + $0x130] ss:$8 sps:$4 sm:$0xff]  }
 0xb6b   : > { %4779 = vmatprep.subr.bf16.mxu0 %v6907_v0  ;;  %v6940_v0 = vld [vmem:[%s8530_s8 + $0x144] ss:$8 sps:$4 sm:$0xff]  }
 0xb6e   : > { %4780 = vmatpush1.bf16.msra.mxu0 %v6905_v32  ;;  %v6938_v32 = vld [vmem:[%s8530_s8 + $0x140] ss:$8 sps:$4 sm:$0xff]  }
 0xb6f   : > { %4781 = vmatprep.subr.bf16.mxu0 %v6910_v6  ;;  %v6943_v6 = vld [vmem:[%s8530_s8 + $0x154] ss:$8 sps:$4 sm:$0xff]  }
 0xb72   : > { %4782 = vmatpush1.bf16.msra.mxu0 %v6908_v52  ;;  %v6941_v52 = vld [vmem:[%s8530_s8 + $0x150] ss:$8 sps:$4 sm:$0xff]  }
 0xb73   : > { %4783 = vmatprep.subr.bf16.mxu0 %v6913_v15  ;;  %v6946_v15 = vld [vmem:[%s8530_s8 + $0x164] ss:$8 sps:$4 sm:$0xff]  }
 0xb76   : > { %4784 = vmatpush1.bf16.msra.mxu0 %v6911_v43  ;;  %v6944_v43 = vld [vmem:[%s8530_s8 + $0x160] ss:$8 sps:$4 sm:$0xff]  }
 0xb77   : > { %4785 = vmatprep.subr.bf16.mxu0 %v6916_v29  ;;  %v6949_v29 = vld [vmem:[%s8530_s8 + $0x174] ss:$8 sps:$4 sm:$0xff]  }
 0xb7a   : > { %4786 = vmatpush1.bf16.msra.mxu0 %v6914_v41  ;;  %v6947_v41 = vld [vmem:[%s8530_s8 + $0x170] ss:$8 sps:$4 sm:$0xff]  }
 0xb7b   : > { %4787 = vmatprep.subr.bf16.mxu0 %v6919_v11  ;;  %v6952_v11 = vld [vmem:[%s8530_s8 + $0x184] ss:$8 sps:$4 sm:$0xff]  }
 0xb7e   : > { %4788 = vmatpush1.bf16.msra.mxu0 %v6917_v17  ;;  %v6950_v17 = vld [vmem:[%s8530_s8 + $0x180] ss:$8 sps:$4 sm:$0xff]  }
 0xb7f   : > { %4789 = vmatprep.subr.bf16.mxu0 %v6922_v4  ;;  %v6955_v4 = vld [vmem:[%s8530_s8 + $0x194] ss:$8 sps:$4 sm:$0xff]  }
 0xb82   : > { %4790 = vmatpush1.bf16.msra.mxu0 %v6920_v53  ;;  %v6953_v53 = vld [vmem:[%s8530_s8 + $0x190] ss:$8 sps:$4 sm:$0xff]  }
 0xb83   : > { %4791 = vmatprep.subr.bf16.mxu0 %v6925_v21  ;;  %v6958_v21 = vld [vmem:[%s8530_s8 + $0x1a4] ss:$8 sps:$4 sm:$0xff]  }
 0xb86   : > { %4792 = vmatpush1.bf16.msra.mxu0 %v6923_v23  ;;  %v6956_v23 = vld [vmem:[%s8530_s8 + $0x1a0] ss:$8 sps:$4 sm:$0xff]  }
 0xb87   : > { %4804 = vmatprep.subr.bf16.mxu0 %v6928_v60  ;;  %v6961_v60 = vld [vmem:[%s8530_s8 + $0x1b4] ss:$8 sps:$4 sm:$0xff]  }
 0xbdc   : > { %v3819_v35 = vpop.f32.mrb[16].mxu0  ;;  %v3862_v63 = vpop.f32.mrb[32].mxu1 }
 0xbdd   : > { %v3820_v59 = vadd.f32 %v3819_v35, %v3108_v24  ;;  %v3863_v39 = vadd.f32 %v3862_v63, %v3116_v26  ;;  %v3821_v46 = vpop.f32.mrb[17].mxu0  ;;  %v3864_v48 = vpop.f32.mrb[33].mxu1  ;;  %v3131_v35 = vsub.s32 6, %v8673_v2  ;;  %v3135_v63 = vsub.s32 7, %v8673_v2 }
 0xbde   : > { %v3822_v45 = vadd.f32 %v3821_v46, %v3112_v47  ;;  %v3865_v40 = vadd.f32 %v3864_v48, %v3120_v34  ;;  %v3823_v13 = vpop.f32.mrb[18].mxu0  ;;  %v3866_v14 = vpop.f32.mrb[34].mxu1  ;;  %v6970_v48 = vld [vmem:[%s8530_s8 + $0x1e4] ss:$8 sps:$4 sm:$0xff]  }
 0xbdf   : > { %v3824_v18 = vadd.f32 %v3823_v13, %v3108_v24  ;;  %v3867_v49 = vadd.f32 %v3866_v14, %v3116_v26  ;;  %v3825_v19 = vpop.f32.mrb[19].mxu0  ;;  %v3868_v50 = vpop.f32.mrb[35].mxu1  ;;  %v3957_v16 = vmax.f32 %v3820_v59, 0.0  ;;  %v3959_v20 = vmax.f32 %v3863_v39, 0.0  ;;  %v6959_v24 = vld [vmem:[%s8530_s8 + $0x1b0] ss:$8 sps:$4 sm:$0xff]  }
 0xbe0   : > { %v3826_v54 = vadd.f32 %v3825_v19, %v3112_v47  ;;  %v3869_v55 = vadd.f32 %v3868_v50, %v3120_v34  ;;  %v3958_v38 = vmax.f32 %v3822_v45, 0.0  ;;  %v3960_v57 = vmax.f32 %v3865_v40, 0.0  ;;  %v6964_v26 = vld [vmem:[%s8530_s8 + $0x1c4] ss:$8 sps:$4 sm:$0xff]   ;;  %v6962_v47 = vld [vmem:[%s8530_s8 + $0x1c0] ss:$8 sps:$4 sm:$0xff]  }
 0xbe1   : > { %v3965_v31 = vmax.f32 %v3824_v18, 0.0  ;;  %v3967_v56 = vmax.f32 %v3867_v49, 0.0  ;;  %v6967_v34 = vld [vmem:[%s8530_s8 + $0x1d4] ss:$8 sps:$4 sm:$0xff]   ;;  %v6965_v59 = vld [vmem:[%s8530_s8 + $0x1d0] ss:$8 sps:$4 sm:$0xff]   ;;  %v3124_v39 = vrot.slane %v9258_v61, %v1417_v36  ;;  %v3132_v46 = vrot.slane %v9258_v61, %v3131_v35 }
 0xbe2   : > { %v3966_v7 = vmax.f32 %v3826_v54, 0.0  ;;  %v3968_v8 = vmax.f32 %v3869_v55, 0.0  ;;  %v3128_v45 = vrot.slane %v9258_v61, %v1421_v44  ;;  %v3136_v40 = vrot.slane %v9258_v61, %v3135_v63  ;;  %v6968_v18 = vld [vmem:[%s8530_s8 + $0x1e0] ss:$8 sps:$4 sm:$0xff]   ;;  %v6973_v36 = vld [vmem:[%s8530_s8 + $0x1f4] ss:$8 sps:$4 sm:$0xff]  }
 0xbe3   : > { %v3973_v12 = vpack.c.bf16 %v3965_v31, %v3957_v16  ;;  %v9270_v10 = vpack.c.bf16 %v3967_v56, %v3959_v20  ;;  %v7001_v35 = vld [vmem:[%s8530_s8 + $0x290] ss:$8 sps:$4 sm:$0xff]   ;;  %v7006_v63 = vld [vmem:[%s8530_s8 + $0x2a4] ss:$8 sps:$4 sm:$0xff]  }
 0xbe4   : > { %v3974_v37 = vpack.c.bf16 %v3966_v7, %v3958_v38  ;;  %v3976_v62 = vpack.c.bf16 %v3968_v8, %v3960_v57  ;;  %v6971_v7 = vld [vmem:[%s8530_s8 + $0x1f0] ss:$8 sps:$4 sm:$0xff]  }
 0xbe6   : > { %4793 = vmatprep.mubr.bf16.mxu0 %v3974_v37 }
 0xbe7   : > { %4794 = vmatmul.mubr.bf16.vlgmr.msra.gmra.mrb[24].mxu0 %v3973_v12 }
 0xbe8   : > { %4805 = vmatpush1.bf16.msra.mxu0 %v6926_v42  ;;  %4836 = vmatprep.mubr.bf16.mxu0 %v3976_v62  ;;  %v6976_v42 = vld [vmem:[%s8530_s8 + $0x204] ss:$8 sps:$4 sm:$0xff]  }
 0xbe9   : > { %4806 = vmatprep.subr.bf16.mxu0 %v6931_v51 }
 0xbec   : > { %4807 = vmatpush1.bf16.msra.mxu0 %v6929_v25 }
 0xbed   : > { %4808 = vmatprep.subr.bf16.mxu0 %v6934_v33 }
 0xbf0   : > { %4809 = vmatpush1.bf16.msra.mxu0 %v6932_v9 }
 0xbf1   : > { %4810 = vmatprep.subr.bf16.mxu0 %v6937_v58 }
 0xbf4   : > { %4811 = vmatpush1.bf16.msra.mxu0 %v6935_v1 }
 0xbf5   : > { %4812 = vmatprep.subr.bf16.mxu0 %v6940_v0 }
 0xbf8   : > { %4813 = vmatpush1.bf16.msra.mxu0 %v6938_v32 }
 0xbf9   : > { %4814 = vmatprep.subr.bf16.mxu0 %v6943_v6  ;;  %v6974_v6 = vld [vmem:[%s8530_s8 + $0x200] ss:$8 sps:$4 sm:$0xff]  }
 0xbfc   : > { %4815 = vmatpush1.bf16.msra.mxu0 %v6941_v52  ;;  %v6979_v52 = vld [vmem:[%s8530_s8 + $0x214] ss:$8 sps:$4 sm:$0xff]  }
 0xbfd   : > { %4816 = vmatprep.subr.bf16.mxu0 %v6946_v15  ;;  %v6977_v15 = vld [vmem:[%s8530_s8 + $0x210] ss:$8 sps:$4 sm:$0xff]  }
 0xc00   : > { %4817 = vmatpush1.bf16.msra.mxu0 %v6944_v43  ;;  %v6982_v43 = vld [vmem:[%s8530_s8 + $0x224] ss:$8 sps:$4 sm:$0xff]  }
 0xc01   : > { %4818 = vmatprep.subr.bf16.mxu0 %v6949_v29  ;;  %v6980_v29 = vld [vmem:[%s8530_s8 + $0x220] ss:$8 sps:$4 sm:$0xff]  }
 0xc04   : > { %4819 = vmatpush1.bf16.msra.mxu0 %v6947_v41  ;;  %v6985_v41 = vld [vmem:[%s8530_s8 + $0x234] ss:$8 sps:$4 sm:$0xff]  }
 0xc05   : > { %4820 = vmatprep.subr.bf16.mxu0 %v6952_v11  ;;  %v6983_v11 = vld [vmem:[%s8530_s8 + $0x230] ss:$8 sps:$4 sm:$0xff]  }
 0xc08   : > { %4821 = vmatpush1.bf16.msra.mxu0 %v6950_v17  ;;  %v6988_v17 = vld [vmem:[%s8530_s8 + $0x244] ss:$8 sps:$4 sm:$0xff]  }
 0xc09   : > { %4822 = vmatprep.subr.bf16.mxu0 %v6955_v4  ;;  %v6991_v4 = vld [vmem:[%s8530_s8 + $0x254] ss:$8 sps:$4 sm:$0xff]  }
 0xc0c   : > { %4823 = vmatpush1.bf16.msra.mxu0 %v6953_v53  ;;  %v6989_v53 = vld [vmem:[%s8530_s8 + $0x250] ss:$8 sps:$4 sm:$0xff]  }
 0xc0d   : > { %4824 = vmatprep.subr.bf16.mxu0 %v6958_v21  ;;  %v6994_v21 = vld [vmem:[%s8530_s8 + $0x264] ss:$8 sps:$4 sm:$0xff]  }
 0xc10   : > { %4825 = vmatpush1.bf16.msra.mxu0 %v6956_v23  ;;  %v6992_v23 = vld [vmem:[%s8530_s8 + $0x260] ss:$8 sps:$4 sm:$0xff]  }
 0xc11   : > { %4826 = vmatprep.subr.bf16.mxu0 %v6961_v60  ;;  %v6997_v60 = vld [vmem:[%s8530_s8 + $0x274] ss:$8 sps:$4 sm:$0xff]  }
 0xc14   : > { %4827 = vmatpush1.bf16.msra.mxu0 %v6959_v24  ;;  %v6995_v24 = vld [vmem:[%s8530_s8 + $0x270] ss:$8 sps:$4 sm:$0xff]  }
 0xc15   : > { %4828 = vmatprep.subr.bf16.mxu0 %v6964_v26  ;;  %v7000_v26 = vld [vmem:[%s8530_s8 + $0x284] ss:$8 sps:$4 sm:$0xff]  }
 0xc18   : > { %4829 = vmatpush1.bf16.msra.mxu0 %v6962_v47  ;;  %v6998_v47 = vld [vmem:[%s8530_s8 + $0x280] ss:$8 sps:$4 sm:$0xff]  }
 0xc19   : > { %4830 = vmatprep.subr.bf16.mxu0 %v6967_v34  ;;  %v7003_v34 = vld [vmem:[%s8530_s8 + $0x294] ss:$8 sps:$4 sm:$0xff]  }
 0xc1c   : > { %v3905_v13 = vpop.f32.mrb[20].mxu0  ;;  %v3948_v14 = vpop.f32.mrb[36].mxu1  ;;  %4831 = vmatpush1.bf16.msra.mxu0 %v6965_v59  ;;  %v7004_v59 = vld [vmem:[%s8530_s8 + $0x2a0] ss:$8 sps:$4 sm:$0xff]  }
 0xc1d   : > { %v3906_v49 = vadd.f32 %v3905_v13, %v3124_v39  ;;  %v3949_v19 = vadd.f32 %v3948_v14, %v3132_v46  ;;  %v3907_v50 = vpop.f32.mrb[21].mxu0  ;;  %v3950_v54 = vpop.f32.mrb[37].mxu1  ;;  %4832 = vmatprep.subr.bf16.mxu0 %v6970_v48  ;;  %v7012_v48 = vld [vmem:[%s8530_s8 + $0x2c4] ss:$8 sps:$4 sm:$0xff]   ;;  %v7013_v13 = vld [vmem:[%s8530_s8 + $0x2d0] ss:$8 sps:$4 sm:$0xff]  }
 0xc1e   : > { %v3908_v55 = vadd.f32 %v3907_v50, %v3128_v45  ;;  %v3951_v16 = vadd.f32 %v3950_v54, %v3136_v40  ;;  %v3909_v20 = vpop.f32.mrb[22].mxu0  ;;  %v3952_v2 = vpop.f32.mrb[38].mxu1  ;;  %v7018_v14 = vld [vmem:[%s8530_s8 + $0x2e4] ss:$8 sps:$4 sm:$0xff]   ;;  %v7022_v54 = vld [vmem:[%s8530_s8 + $0x300] ss:$8 sps:$4 sm:$0xff]  }
 0xc1f   : > { %v3910_v31 = vadd.f32 %v3909_v20, %v3124_v39  ;;  %v3953_v44 = vadd.f32 %v3952_v2, %v3132_v46  ;;  %v3911_v56 = vpop.f32.mrb[23].mxu0  ;;  %v3954_v61 = vpop.f32.mrb[39].mxu1  ;;  %v3961_v8 = vmax.f32 %v3906_v49, 0.0  ;;  %v3963_v12 = vmax.f32 %v3949_v19, 0.0  ;;  %v7009_v39 = vld [vmem:[%s8530_s8 + $0x2b4] ss:$8 sps:$4 sm:$0xff]  }
 0xc20   : > { %v3912_v38 = vadd.f32 %v3911_v56, %v3128_v45  ;;  %v3955_v57 = vadd.f32 %v3954_v61, %v3136_v40  ;;  %4833 = vmatpush1.bf16.msra.mxu0 %v6968_v18  ;;  %v3962_v51 = vmax.f32 %v3908_v55, 0.0  ;;  %v3964_v25 = vmax.f32 %v3951_v16, 0.0  ;;  %v7007_v46 = vld [vmem:[%s8530_s8 + $0x2b0] ss:$8 sps:$4 sm:$0xff]   ;;  %v7010_v45 = vld [vmem:[%s8530_s8 + $0x2c0] ss:$8 sps:$4 sm:$0xff]  }
 0xc21   : > { %v3969_v37 = vmax.f32 %v3910_v31, 0.0  ;;  %v3971_v62 = vmax.f32 %v3953_v44, 0.0  ;;  %4834 = vmatprep.subr.bf16.mxu0 %v6973_v36  ;;  %v7015_v40 = vld [vmem:[%s8530_s8 + $0x2d4] ss:$8 sps:$4 sm:$0xff]   ;;  %v7016_v18 = vld [vmem:[%s8530_s8 + $0x2e0] ss:$8 sps:$4 sm:$0xff]  }
 0xc22   : > { %v3970_v33 = vmax.f32 %v3912_v38, 0.0  ;;  %v3972_v9 = vmax.f32 %v3955_v57, 0.0  ;;  %v7021_v49 = vld [vmem:[%s8530_s8 + $0x2f4] ss:$8 sps:$4 sm:$0xff]   ;;  %v7019_v19 = vld [vmem:[%s8530_s8 + $0x2f0] ss:$8 sps:$4 sm:$0xff]  }
 0xc23   : > { %v9314_v58 = vpack.c.bf16 %v3969_v37, %v3961_v8  ;;  %v9316_v1 = vpack.c.bf16 %v3971_v62, %v3963_v12  ;;  %v7024_v50 = vld [vmem:[%s8530_s8 + $0x304] ss:$8 sps:$4 sm:$0xff]   ;;  %v7027_v36 = vld [vmem:[%s8530_s8 + $0x314] ss:$8 sps:$4 sm:$0xff]   ;;  %v7025_v55 = vld [vmem:[%s8530_s8 + $0x310] ss:$8 sps:$4 sm:$0xff]  }
 0xc24   : > { %v3978_v0 = vpack.c.bf16 %v3970_v33, %v3962_v51  ;;  %v9318_v32 = vpack.c.bf16 %v3972_v9, %v3964_v25  ;;  %4835 = vmatpush1.bf16.msra.mxu0 %v6971_v7  ;;  %v7030_v16 = vld [vmem:[%s8530_s8 + $0x324] ss:$8 sps:$4 sm:$0xff]   ;;  %v7028_v20 = vld [vmem:[%s8530_s8 + $0x320] ss:$8 sps:$4 sm:$0xff]   ;;  %v7033_v2 = vld [vmem:[%s8530_s8 + $0x334] ss:$8 sps:$4 sm:$0xff]  }
 0xc25   : > { %4847 = vmatprep.subr.bf16.mxu0 %v6976_v42  ;;  %v7031_v31 = vld [vmem:[%s8530_s8 + $0x330] ss:$8 sps:$4 sm:$0xff]   ;;  %v7036_v44 = vld [vmem:[%s8530_s8 + $0x344] ss:$8 sps:$4 sm:$0xff]   ;;  %v7034_v56 = vld [vmem:[%s8530_s8 + $0x340] ss:$8 sps:$4 sm:$0xff]  }
 0xc26   : > { %v7039_v61 = vld [vmem:[%s8530_s8 + $0x354] ss:$8 sps:$4 sm:$0xff]   ;;  %v7037_v38 = vld [vmem:[%s8530_s8 + $0x350] ss:$8 sps:$4 sm:$0xff]   ;;  %v7042_v57 = vld [vmem:[%s8530_s8 + $0x364] ss:$8 sps:$4 sm:$0xff]  }
 0xc27   : > { %4837 = vmatmul.mubr.bf16.vlgmr.msra.gmra.mrb[24].mxu0 %v9270_v10  ;;  %v6986_v10 = vld [vmem:[%s8530_s8 + $0x240] ss:$8 sps:$4 sm:$0xff]   ;;  %v7045_v8 = vld [vmem:[%s8530_s8 + $0x374] ss:$8 sps:$4 sm:$0xff]   ;;  %v7043_v12 = vld [vmem:[%s8530_s8 + $0x370] ss:$8 sps:$4 sm:$0xff]  }
 0xc28   : > { %4848 = vmatpush1.bf16.msra.mxu0 %v6974_v6  ;;  %4879 = vmatprep.mubr.bf16.mxu0 %v3978_v0  ;;  %v7040_v7 = vld [vmem:[%s8530_s8 + $0x360] ss:$8 sps:$4 sm:$0xff]   ;;  %v7048_v37 = vld [vmem:[%s8530_s8 + $0x384] ss:$8 sps:$4 sm:$0xff]   ;;  %v7051_v42 = vld [vmem:[%s8530_s8 + $0x394] ss:$8 sps:$4 sm:$0xff]  }
 0xc29   : > { %4849 = vmatprep.subr.bf16.mxu0 %v6979_v52  ;;  %v7046_v62 = vld [vmem:[%s8530_s8 + $0x380] ss:$8 sps:$4 sm:$0xff]   ;;  %v7049_v51 = vld [vmem:[%s8530_s8 + $0x390] ss:$8 sps:$4 sm:$0xff]   ;;  %v7054_v25 = vld [vmem:[%s8530_s8 + $0x3a4] ss:$8 sps:$4 sm:$0xff]  }
 0xc2a   : > { %v7052_v33 = vld [vmem:[%s8530_s8 + $0x3a0] ss:$8 sps:$4 sm:$0xff]   ;;  %v7057_v9 = vld [vmem:[%s8530_s8 + $0x3b4] ss:$8 sps:$4 sm:$0xff]   ;;  %v7060_v0 = vld [vmem:[%s8530_s8 + $0x3c4] ss:$8 sps:$4 sm:$0xff]  }
 0xc2b   : > { %v7063_v6 = vld [vmem:[%s8530_s8 + $0x3d4] ss:$8 sps:$4 sm:$0xff]   ;;  %v7061_v52 = vld [vmem:[%s8530_s8 + $0x3d0] ss:$8 sps:$4 sm:$0xff]  }
 0xc2c   : > { %4850 = vmatpush1.bf16.msra.mxu0 %v6977_v15  ;;  %v7066_v15 = vld [vmem:[%s8530_s8 + $0x3e4] ss:$8 sps:$4 sm:$0xff]  }
 0xc2d   : > { %4851 = vmatprep.subr.bf16.mxu0 %v6982_v43  ;;  %v7064_v43 = vld [vmem:[%s8530_s8 + $0x3e0] ss:$8 sps:$4 sm:$0xff]  }
 0xc30   : > { %4852 = vmatpush1.bf16.msra.mxu0 %v6980_v29  ;;  %v7069_v29 = vld [vmem:[%s8530_s8 + $0x3f4] ss:$8 sps:$4 sm:$0xff]  }
 0xc31   : > { %4853 = vmatprep.subr.bf16.mxu0 %v6985_v41  ;;  %v7067_v41 = vld [vmem:[%s8530_s8 + $0x3f0] ss:$8 sps:$4 sm:$0xff]  }
 0xc34   : > { %4854 = vmatpush1.bf16.msra.mxu0 %v6983_v11  ;;  %v4109_v11 = vld [vmem:[%s9641_s16] sm:$0x3] }
 0xc35   : > { %4855 = vmatprep.subr.bf16.mxu0 %v6988_v17  ;;  %v4114_v17 = vrot.slane %v4109_v11, %v8676_v3 }
 0xc38   : > { %4856 = vmatpush1.bf16.msra.mxu0 %v6986_v10  ;;  %v4118_v10 = vrot.slane %v4109_v11, %v8682_v5  ;;  %v5086_v11 = vld [vmem:[#allocation27 + $0x8] sm:$0xff] (!%p6097_p12) }
 0xc39   : > { %4857 = vmatprep.subr.bf16.mxu0 %v6991_v4 }
 0xc3c   : > { %4858 = vmatpush1.bf16.msra.mxu0 %v6989_v53 }
 0xc3d   : > { %4859 = vmatprep.subr.bf16.mxu0 %v6994_v21 }
 0xc40   : > { %4860 = vmatpush1.bf16.msra.mxu0 %v6992_v23 }
 0xc41   : > { %4861 = vmatprep.subr.bf16.mxu0 %v6997_v60 }
 0xc44   : > { %4862 = vmatpush1.bf16.msra.mxu0 %v6995_v24 }
 0xc45   : > { %4863 = vmatprep.subr.bf16.mxu0 %v7000_v26 }
 0xc48   : > { %4864 = vmatpush1.bf16.msra.mxu0 %v6998_v47 }
 0xc49   : > { %4865 = vmatprep.subr.bf16.mxu0 %v7003_v34 }
 0xc4c   : > { %4866 = vmatpush1.bf16.msra.mxu0 %v7001_v35 }
 0xc4d   : > { %4867 = vmatprep.subr.bf16.mxu0 %v7006_v63 }
 0xc50   : > { %4868 = vmatpush1.bf16.msra.mxu0 %v7004_v59 }
 0xc51   : > { %4869 = vmatprep.subr.bf16.mxu0 %v7009_v39 }
 0xc54   : > { %4870 = vmatpush1.bf16.msra.mxu0 %v7007_v46 }
 0xc55   : > { %4871 = vmatprep.subr.bf16.mxu0 %v7012_v48 }
 0xc58   : > { %4872 = vmatpush1.bf16.msra.mxu0 %v7010_v45 }
 0xc59   : > { %4873 = vmatprep.subr.bf16.mxu0 %v7015_v40 }
 0xc5c   : > { %4874 = vmatpush1.bf16.msra.mxu0 %v7013_v13 }
 0xc5d   : > { %4875 = vmatprep.subr.bf16.mxu0 %v7018_v14 }
 0xc60   : > { %4876 = vmatpush1.bf16.msra.mxu0 %v7016_v18 }
 0xc61   : > { %4877 = vmatprep.subr.bf16.mxu0 %v7021_v49 }
 0xc64   : > { %4878 = vmatpush1.bf16.msra.mxu0 %v7019_v19 }
 0xc65   : > { %4890 = vmatprep.subr.bf16.mxu0 %v7024_v50 }
 0xc67   : > { %4880 = vmatmul.mubr.bf16.vlgmr.msra.gmra.mrb[24].mxu0 %v9314_v58  ;;  %v7055_v58 = vld [vmem:[%s8530_s8 + $0x3b0] ss:$8 sps:$4 sm:$0xff]  }
 0xc68   : > { %4891 = vmatpush1.bf16.msra.mxu0 %v7022_v54  ;;  %4922 = vmatprep.mubr.bf16.mxu0 %v9318_v32  ;;  %v7058_v32 = vld [vmem:[%s8530_s8 + $0x3c0] ss:$8 sps:$4 sm:$0xff]  }
 0xc69   : > { %4892 = vmatprep.subr.bf16.mxu0 %v7027_v36 }
 0xc6c   : > { %4893 = vmatpush1.bf16.msra.mxu0 %v7025_v55 }
 0xc6d   : > { %4894 = vmatprep.subr.bf16.mxu0 %v7030_v16 }
 0xc70   : > { %4895 = vmatpush1.bf16.msra.mxu0 %v7028_v20 }
 0xc71   : > { %4896 = vmatprep.subr.bf16.mxu0 %v7033_v2 }
 0xc74   : > { %4897 = vmatpush1.bf16.msra.mxu0 %v7031_v31  ;;  %v4937_v31 = vld [vmem:[%s9642_s25] sm:$0x3] }
 0xc75   : > { %4898 = vmatprep.subr.bf16.mxu0 %v7036_v44  ;;  %v4938_v44 = vld [vmem:[%s9643_s7] sm:$0x3] }
 0xc78   : > { %4899 = vmatpush1.bf16.msra.mxu0 %v7034_v56  ;;  %v4975_v56 = vrot.slane %v4937_v31, %v8676_v3 }
 0xc79   : > { %4900 = vmatprep.subr.bf16.mxu0 %v7039_v61  ;;  %v4979_v61 = vrot.slane %v4937_v31, %v8682_v5  ;;  %v5098_v31 = vld [vmem:[#allocation27 + $0x68] sm:$0xff] (!%p6097_p12) }
 0xc7c   : > { %4901 = vmatpush1.bf16.msra.mxu0 %v7037_v38 }
 0xc7d   : > { %4902 = vmatprep.subr.bf16.mxu0 %v7042_v57  ;;  %v4990_v57 = vrot.slane %v4938_v44, %v8676_v3 }
 0xc80   : > { %4903 = vmatpush1.bf16.msra.mxu0 %v7040_v7  ;;  %v4994_v7 = vrot.slane %v4938_v44, %v8682_v5  ;;  %v5115_v44 = vld [vmem:[#allocation27 + $0xf0] sm:$0xff] (!%p6097_p12) }
 0xc81   : > { %4904 = vmatprep.subr.bf16.mxu0 %v7045_v8 }
 0xc84   : > { %4905 = vmatpush1.bf16.msra.mxu0 %v7043_v12 }
 0xc85   : > { %4906 = vmatprep.subr.bf16.mxu0 %v7048_v37 }
 0xc88   : > { %4907 = vmatpush1.bf16.msra.mxu0 %v7046_v62 }
 0xc89   : > { %4908 = vmatprep.subr.bf16.mxu0 %v7051_v42 }
 0xc8c   : > { %4909 = vmatpush1.bf16.msra.mxu0 %v7049_v51 }
 0xc8d   : > { %4910 = vmatprep.subr.bf16.mxu0 %v7054_v25 }
 0xc90   : > { %4911 = vmatpush1.bf16.msra.mxu0 %v7052_v33 }
 0xc91   : > { %4912 = vmatprep.subr.bf16.mxu0 %v7057_v9 }
 0xc94   : > { %4913 = vmatpush1.bf16.msra.mxu0 %v7055_v58 }
 0xc95   : > { %4914 = vmatprep.subr.bf16.mxu0 %v7060_v0 }
 0xc98   : > { %4915 = vmatpush1.bf16.msra.mxu0 %v7058_v32 }
 0xc99   : > { %4916 = vmatprep.subr.bf16.mxu0 %v7063_v6 }
 0xc9c   : > { %4917 = vmatpush1.bf16.msra.mxu0 %v7061_v52  ;;  %v5101_v52 = vld [vmem:[#allocation27 + $0x80] sm:$0xff] (!%p6097_p12) }
 0xc9d   : > { %4918 = vmatprep.subr.bf16.mxu0 %v7066_v15  ;;  %v5102_v15 = vld [vmem:[#allocation27 + $0x88] sm:$0xff] (!%p6097_p12) }
 0xca0   : > { %4919 = vmatpush1.bf16.msra.mxu0 %v7064_v43  ;;  %v7804_v43 = vmov (!%p6097_p12), 0.0  }
 0xca1   : > { %4920 = vmatprep.subr.bf16.mxu0 %v7069_v29  ;;  %v6302_v29 = vpack.c.bf16 (!%p6097_p12), %v5102_v15, %v5101_v52  ;;  %v5204_v52 = vld [vmem:[%s9647_s1 + $0x48] sm:$0xff] (!%p6097_p12) }
 0xca3   : > { %6303 = vmatprep.subr.bf16.mxu1 (!%p6097_p12), %v6302_v29  ;;  %v5205_v29 = vld [vmem:[%s9647_s1 + $0x50] sm:$0xff] (!%p6097_p12) }
 0xca4   : > { %4921 = vmatpush1.bf16.msra.mxu0 %v7067_v41  ;;  %v5085_v41 = vld [vmem:[#allocation27] sm:$0xff] (!%p6097_p12) }
 0xca7   : > { %4923 = vmatmul.mubr.bf16.vlgmr.msra.gmra.mrb[24].mxu0 %v9316_v1 }
 0xca8   : > { %5078 = vmatprep.mubr.f32.mxu0 (!%p6097_p12), %v7804_v43 }
 0xd7a   : > { %v4924_v4 = vpop.f32.mrb[24].mxu0 }
 0xd7b   : > { %v6360_v53 = vadd.f32 %v4924_v4, %v4114_v17  ;;  %v4926_v21 = vpop.f32.mrb[25].mxu0  ;;  %v5104_v4 = vld [vmem:[#allocation27 + $0x98] sm:$0xff] (!%p6097_p12) }
 0xd7c   : > { %v6361_v23 = vadd.f32 %v4926_v21, %v4118_v10  ;;  %v4928_v60 = vpop.f32.mrb[26].mxu0  ;;  %v5088_v21 = vld [vmem:[#allocation27 + $0x18] sm:$0xff] (!%p6097_p12) }
 0xd7d   : > { %v4933_v24 = vadd.f32 %v6360_v53, %v9150_v22  ;;  %v6362_v26 = vadd.f32 %v4928_v60, %v4114_v17  ;;  %v4930_v47 = vpop.f32.mrb[27].mxu0  ;;  %v5103_v17 = vld [vmem:[#allocation27 + $0x90] sm:$0xff] (!%p6097_p12) }
 0xd7e   : > { %v4934_v34 = vadd.f32 %v6361_v23, %v9146_v27  ;;  %v6363_v35 = vadd.f32 %v4930_v47, %v4118_v10  ;;  %v6304_v10 = vpack.c.bf16 (!%p6097_p12), %v5086_v11, %v5085_v41  ;;  %v5087_v53 = vld [vmem:[#allocation27 + $0x10] sm:$0xff] (!%p6097_p12)  ;;  %v6306_v60 = vpack.c.bf16 (!%p6097_p12), %v5104_v4, %v5103_v17 }
 0xd7f   : > { %v4935_v1 = vadd.f32 %v6362_v26, %v9152_v30  ;;  %v5009_v23 = vld [vmem:[%s9645_s3] sm:$0x3] (!%p6097_p12)  ;;  %v5106_v26 = vld [vmem:[#allocation27 + $0xa8] sm:$0xff] (!%p6097_p12)  ;;  %v6308_v47 = vpack.c.bf16 (!%p6097_p12), %v5088_v21, %v5087_v53  ;;  %v5208_v53 = vld [vmem:[%s9647_s1 + $0x68] sm:$0xff] (!%p6097_p12) }
 0xd80   : > { %v4936_v63 = vadd.f32 %v6363_v35, %v9148_v28  ;;  %v4939_v59 = vadd.f32 %v4934_v34, %v4933_v24  ;;  %6305 = vmatpush3.bf16.msra.mxu1 (!%p6097_p12), %v6304_v10  ;;  %v5089_v35 = vld [vmem:[#allocation27 + $0x20] sm:$0xff] (!%p6097_p12)  ;;  %v5206_v41 = vld [vmem:[%s9647_s1 + $0x58] sm:$0xff] (!%p6097_p12)  ;;  %v5207_v4 = vld [vmem:[%s9647_s1 + $0x60] sm:$0xff] (!%p6097_p12) }
 0xd81   : > { %6307 = vmatprep.subr.bf16.mxu1 (!%p6097_p12), %v6306_v60  ;;  %v6350_v11 = vpack.c.bf16 (!%p6097_p12), %v5206_v41, %v5205_v29  ;;  %v6353_v21 = vpack.c.bf16 (!%p6097_p12), %v5208_v53, %v5207_v4  ;;  %v5210_v60 = vld [vmem:[%s9647_s1 + $0x78] sm:$0xff] (!%p6097_p12) }
 0xd82   : > { %4940 = vadd.xlane.f32.xlu1 %v4939_v59  ;;  %v4942_v39 = vadd.f32 %v4936_v63, %v4935_v1  ;;  %v5108_v59 = vld [vmem:[#allocation27 + $0xb8] sm:$0xff] (!%p6097_p12) }
 0xd84   : > { %4943 = vadd.xlane.f32.xlu0 %v4942_v39  ;;  %6309 = vmatpush3.bf16.msra.mxu1 (!%p6097_p12), %v6308_v47  ;;  %v6099_v47 = vld [vmem:[#allocation29] ss:$0 sm:$0xff] (!%p6097_p12) }
 0xe0f   : > { %v4941_v46 = vpop.xlane.xlu1 %4940 }
 0xe10   : > { %v4945_v48 = vmul.f32 0.00390625, %v4941_v46 }
 0xe11   : > { %v4944_v45 = vpop.xlane.xlu0 %4943 }
 0xe12   : > { %v4947_v40 = vsub.f32 %v4933_v24, %v4945_v48  ;;  %v4948_v13 = vsub.f32 %v4934_v34, %v4945_v48  ;;  %v4946_v14 = vmul.f32 0.00390625, %v4944_v45  ;;  %v5105_v24 = vld [vmem:[#allocation27 + $0xa0] sm:$0xff] (!%p6097_p12)  ;;  %v5091_v48 = vld [vmem:[#allocation27 + $0x30] sm:$0xff] (!%p6097_p12)  ;;  %v5092_v45 = vld [vmem:[#allocation27 + $0x38] sm:$0xff] (!%p6097_p12) }
 0xe13   : > { %v6310_v34 = vpack.c.bf16 (!%p6097_p12), %v5106_v26, %v5105_v24 }
 0xe14   : > { %v4949_v22 = vsub.f32 %v4935_v1, %v4946_v14  ;;  %v4950_v18 = vsub.f32 %v4936_v63, %v4946_v14  ;;  %v4951_v49 = vmul.f32 %v4947_v40, %v4947_v40  ;;  %v4952_v27 = vmul.f32 %v4948_v13, %v4948_v13  ;;  %v5090_v1 = vld [vmem:[#allocation27 + $0x28] sm:$0xff] (!%p6097_p12)  ;;  %v5107_v63 = vld [vmem:[#allocation27 + $0xb0] sm:$0xff] (!%p6097_p12) }
 0xe15   : > { %v6312_v39 = vpack.c.bf16 (!%p6097_p12), %v5090_v1, %v5089_v35  ;;  %6311 = vmatprep.subr.bf16.mxu1 (!%p6097_p12), %v6310_v34  ;;  %v6314_v46 = vpack.c.bf16 (!%p6097_p12), %v5108_v59, %v5107_v63  ;;  %v6316_v14 = vpack.c.bf16 (!%p6097_p12), %v5092_v45, %v5091_v48  ;;  %v6100_v59 = vld [vmem:[#allocation30] ss:$0 sm:$0xff] (!%p6097_p12) }
 0xe16   : > { %v4955_v19 = vadd.f32 %v4952_v27, %v4951_v49  ;;  %v4953_v30 = vmul.f32 %v4949_v22, %v4949_v22  ;;  %v4954_v50 = vmul.f32 %v4950_v18, %v4950_v18  ;;  %v5094_v49 = vld [vmem:[#allocation27 + $0x48] sm:$0xff] (!%p6097_p12)  ;;  %v5111_v27 = vld [vmem:[#allocation27 + $0xd0] sm:$0xff] (!%p6097_p12) }
 0xe17   : > { %6313 = vmatpush3.bf16.msra.mxu1 (!%p6097_p12), %v6312_v39 }
 0xe18   : > { %4956 = vadd.xlane.f32.xlu1 %v4955_v19  ;;  %v4958_v28 = vadd.f32 %v4954_v50, %v4953_v30  ;;  %6315 = vmatprep.subr.bf16.mxu1 (!%p6097_p12), %v6314_v46  ;;  %v5112_v19 = vld [vmem:[#allocation27 + $0xd8] sm:$0xff] (!%p6097_p12) }
 0xe19   : > { %v6322_v50 = vpack.c.bf16 (!%p6097_p12), %v5112_v19, %v5111_v27 }
 0xe1a   : > { %4959 = vadd.xlane.f32.xlu0 %v4958_v28  ;;  %v5095_v28 = vld [vmem:[#allocation27 + $0x50] sm:$0xff] (!%p6097_p12) }
 0xe1b   : > { %6317 = vmatpush3.bf16.msra.mxu1 (!%p6097_p12), %v6316_v14 }
 0xea5   : > { %v4957_v54 = vpop.xlane.xlu1 %4956 }
 0xea6   : > { %v4961_v36 = vmul.f32 0.00390625, %v4957_v54  ;;  %v5096_v54 = vld [vmem:[#allocation27 + $0x58] sm:$0xff] (!%p6097_p12) }
 0xea7   : > { %v4960_v55 = vpop.xlane.xlu0 %4959 }
 0xea8   : > { %v4963_v16 = vadd.f32 1e-05, %v4961_v36  ;;  %v4962_v20 = vmul.f32 0.00390625, %v4960_v55  ;;  %v5113_v36 = vld [vmem:[#allocation27 + $0xe0] sm:$0xff] (!%p6097_p12)  ;;  %v5114_v55 = vld [vmem:[#allocation27 + $0xe8] sm:$0xff] (!%p6097_p12) }
 0xeaa   : > { %7138 = vrsqrt.f32 %v4963_v16  ;;  %v4964_v2 = vadd.f32 1e-05, %v4962_v20  ;;  %v6324_v16 = vpack.c.bf16 (!%p6097_p12), %v5096_v54, %v5095_v28  ;;  %v6326_v20 = vpack.c.bf16 (!%p6097_p12), %v5114_v55, %v5113_v36 }
 0xeac   : > { %7140 = vrsqrt.f32 %v4964_v2  ;;  %v5097_v2 = vld [vmem:[#allocation27 + $0x60] sm:$0xff] (!%p6097_p12) }
 0xeb4   : > { %v7139_v38 = vpop.eup %7138 }
 0xeb5   : > { %v4967_v8 = vmul.f32 %v7139_v38, %v4947_v40  ;;  %v4968_v12 = vmul.f32 %v7139_v38, %v4948_v13  ;;  %v5109_v40 = vld [vmem:[#allocation27 + $0xc0] sm:$0xff] (!%p6097_p12)  ;;  %v5110_v13 = vld [vmem:[#allocation27 + $0xc8] sm:$0xff] (!%p6097_p12) }
 0xeb6   : > { %v7141_v37 = vpop.eup %7140 }
 0xeb7   : > { %v4982_v62 = vmul.f32 %v4975_v56, %v4967_v8  ;;  %v4983_v42 = vmul.f32 %v4979_v61, %v4968_v12  ;;  %v4969_v51 = vmul.f32 %v7141_v37, %v4949_v22  ;;  %v4970_v25 = vmul.f32 %v7141_v37, %v4950_v18  ;;  %5008 = sbr.rel (%p6097_p12) target bundleno = 4427 (0x114b), region = 188  ;;  %v5093_v18 = vld [vmem:[#allocation27 + $0x40] sm:$0xff] (!%p6097_p12)  ;;  %v5195_v12 = vld [vmem:[%s9646_s29] sm:$0xff] (!%p6097_p12) }
 0xeb8   : > { %v6318_v22 = vpack.c.bf16 (!%p6097_p12), %v5110_v13, %v5109_v40  ;;  %v6320_v30 = vpack.c.bf16 (!%p6097_p12), %v5094_v49, %v5093_v18  ;;  %v5196_v37 = vld [vmem:[%s9647_s1 + $0x8] sm:$0xff] (!%p6097_p12) }
 0xeb9   : > { %v4997_v33 = vadd.f32 %v4990_v57, %v4982_v62  ;;  %v4998_v9 = vadd.f32 %v4994_v7, %v4983_v42  ;;  %v4984_v58 = vmul.f32 %v4975_v56, %v4969_v51  ;;  %v4985_v0 = vmul.f32 %v4979_v61, %v4970_v25  ;;  %v5116_v56 = vld [vmem:[#allocation27 + $0xf8] sm:$0xff] (!%p6097_p12)  ;;  %v5197_v62 = vld [vmem:[%s9647_s1 + $0x10] sm:$0xff] (!%p6097_p12)  ;;  %v5198_v25 = vld [vmem:[%s9647_s1 + $0x18] sm:$0xff] (!%p6097_p12) }
 0xeba   : > { %6319 = vmatprep.subr.bf16.mxu1 (!%p6097_p12), %v6318_v22  ;;  %v6328_v61 = vpack.c.bf16 (!%p6097_p12), %v5098_v31, %v5097_v2  ;;  %v6330_v38 = vpack.c.bf16 (!%p6097_p12), %v5116_v56, %v5115_v44  ;;  %v7805_v42 = vmov (!%p6097_p12), 0.0|0.0   ;;  %v6335_v51 = vpack.c.bf16 (!%p6097_p12), %v5196_v37, %v5195_v12 }
 0xebb   : > { %5001 = vst [vmem:[#allocation2] sm:$0xff] %v4997_v33  ;;  %5002 = vst [vmem:[#allocation2 + $0x8] sm:$0xff] %v4998_v9  ;;  %v4999_v32 = vadd.f32 %v4990_v57, %v4984_v58  ;;  %v5000_v6 = vadd.f32 %v4994_v7, %v4985_v0  ;;  %6321 = vmatpush3.bf16.msra.mxu1 (!%p6097_p12), %v6320_v30  ;;  %v5099_v57 = vld [vmem:[#allocation27 + $0x70] sm:$0xff] (!%p6097_p12)  ;;  %v5100_v7 = vld [vmem:[#allocation27 + $0x78] sm:$0xff] (!%p6097_p12) }
 0xebc   : > { %6323 = vmatprep.subr.bf16.mxu1 (!%p6097_p12), %v6322_v50  ;;  %v6332_v8 = vpack.c.bf16 (!%p6097_p12), %v5100_v7, %v5099_v57  ;;  %v5200_v58 = vld [vmem:[%s9647_s1 + $0x28] sm:$0xff] (!%p6097_p12) }
 0xebd   : > { %5003 = vst [vmem:[#allocation2 + $0x10] sm:$0xff] %v4999_v32  ;;  %5004 = vst [vmem:[#allocation2 + $0x18] sm:$0xff] %v5000_v6  ;;  %v6298_v3 = vpack.c.bf16 (!%p6097_p12), %v5000_v6, %v4998_v9  ;;  %v6300_v5 = vpack.c.bf16 (!%p6097_p12), %v4999_v32, %v4997_v33  ;;  %v6338_v33 = vpack.c.bf16 (!%p6097_p12), %v5198_v25, %v5197_v62  ;;  %v5199_v9 = vld [vmem:[%s9647_s1 + $0x20] sm:$0xff] (!%p6097_p12)  ;;  %v5201_v32 = vld [vmem:[%s9647_s1 + $0x30] sm:$0xff] (!%p6097_p12) }
 0xebe   : > { %v6341_v0 = vpack.c.bf16 %v5200_v58, %v5199_v9  ;;  %v5202_v6 = vld [vmem:[%s9647_s1 + $0x38] sm:$0xff] }
 0xebf   : > { %6299 = vmatprep.subr.bf16.mxu0 %v6298_v3  ;;  %6325 = vmatpush3.bf16.msra.mxu1 %v6324_v16  ;;  %v6344_v3 = vpack.c.bf16 %v5202_v6, %v5201_v32 }
 0xec0   : > { %6301 = vmatpush1.bf16.msra.mxu0 %v6300_v5  ;;  %6327 = vmatprep.subr.bf16.mxu1 %v6326_v20  ;;  %v5203_v5 = vld [vmem:[%s9647_s1 + $0x40] sm:$0xff] }
 0xec1   : > { %6334 = vmatprep.subr.bf16.mxu0 %v7805_v42  ;;  %v6347_v15 = vpack.c.bf16 %v5204_v52, %v5203_v5 }
 0xec3   : > { %6098 = vmatmul.mubr.msk.f32.vlgmr.msra.gmra.mrb[0].mxu0 %vm5010_vm5, %v5009_v23  ;;  %6329 = vmatpush3.bf16.msra.mxu1 %v6328_v61  ;;  %v5209_v23 = vld [vmem:[%s9647_s1 + $0x70] sm:$0xff] }
 0xec4   : > { %6331 = vmatprep.subr.bf16.mxu1 %v6330_v38  ;;  %6336 = vmatpush3.bf16.msra.mxu0 %v6335_v51  ;;  %v6356_v24 = vpack.c.bf16 %v5210_v60, %v5209_v23 }
 0xec5   : > { %6337 = vmatprep.subr.bf16.mxu0 %v7805_v42  ;;  %6295 = vmatprep.mubr.msk.f32.mxu0 %vm7806_vm6, %v7804_v43 }
 0xec7   : > { %6333 = vmatpush3.bf16.msra.mxu1 %v6332_v8 }
 0xec8   : > { %6339 = vmatpush3.bf16.msra.mxu0 %v6338_v33 }
 0xec9   : > { %6340 = vmatprep.subr.bf16.mxu0 %v7805_v42 }
 0xecc   : > { %6342 = vmatpush3.bf16.msra.mxu0 %v6341_v0 }
 0xecd   : > { %6343 = vmatprep.subr.bf16.mxu0 %v7805_v42 }
 0xed0   : > { %6345 = vmatpush3.bf16.msra.mxu0 %v6344_v3 }
 0xed1   : > { %6346 = vmatprep.subr.bf16.mxu0 %v7805_v42 }
 0xed4   : > { %6348 = vmatpush3.bf16.msra.mxu0 %v6347_v15 }
 0xed5   : > { %6349 = vmatprep.subr.bf16.mxu0 %v7805_v42 }
 0xed8   : > { %6351 = vmatpush3.bf16.msra.mxu0 %v6350_v11 }
 0xed9   : > { %6352 = vmatprep.subr.bf16.mxu0 %v7805_v42 }
 0xedc   : > { %6354 = vmatpush3.bf16.msra.mxu0 %v6353_v21 }
 0xedd   : > { %6355 = vmatprep.subr.bf16.mxu0 %v7805_v42 }
 0xee0   : > { %6357 = vmatpush3.bf16.msra.mxu0 %v6356_v24 }
 0xf96   : > { %v5080_v17 = vpop.f32.mrb[0].mxu0 }
 0xf97   : > { %v5082_v10 = vpop.f32.mrb[1].mxu0 }
 0xf98   : > { %5188 = vmatprep.mubr.f32.mxu1 %v5082_v10 }
 0xf99   : > { %5189 = vmatmul.mubr.f32.vlgmr.msra.gmra.mrb[0].mxu1 %v5080_v17 }
0x106c   : > { %v6179_v26 = vpop.f32.mrb[0].mxu1 }
0x106d   : > { %v6180_v34 = vpop.f32.mrb[1].mxu1 }
0x106e   : > { %v6181_v35 = vadd.f32 %v6180_v34, %v6179_v26 }
0x1070   : > { %v5191_v1 = vadd.f32 %v6181_v35, %v6099_v47 }
0x1072   : > { %v5194_v63 = vmax.f32 %v5191_v1, 0.0 }
0x1074   : > { %6296 = vmatmul.mubr.f32.vlgmr.msra.gmra.mrb[2].mxu0 %v5194_v63 }
0x1147   : > { %v5284_v39 = vpop.f32.mrb[2].mxu0 }
0x1148   : > { %v5285_v46 = vadd.f32 %v6100_v59, %v5284_v39  ;;  %v6297_v48 = vpop.f32.mrb[3].mxu0 }
0x114a   : > { %5289 = vst.msk [vmem:[#allocation32] sm:$0x3] %vm5288_vm7, %v5285_v46 }
0x114b PF: > { %s9648_s3 = sld [smem:[#allocation46_spill]]  ;;  %s7807_s9 = smov [#allocation32]  }
0x114c   : > { %s5297_s17 = sshll.u32 %s7807_s9, 4  ;;  %s5298_s17 = int_to_ptr.vmem [resolvable:$true] %s5297_s17 }
0x114d   : > { %s7674_s29 = scalar_lea.vmem %s5298_s17, 32  ;;  %p7681_p7 = scmp.lt.s32.totalorder %s5298_s17, %s5298_s17 }
0x114e   : > { %p7675_p9 = scmp.ne.s32.totalorder %s5298_s17, %s7674_s29  ;;  %p7682_p8 = scmp.lt.s32.totalorder %s7674_s29, %s7674_s29 }
0x1150   : > { %p7683_p6 = por %p7682_p8, %p7681_p7 }
0x1151   : > { %p6511_p3 = scmp.eq.s32.totalorder %s9648_s3, 5 }
0x1153   : > { %p7676_p1 = pnand %p7675_p9, %p6511_p3 }
0x1155   : > { %p7677_p4 = pneg %p7676_p1 }
0x1157   : > { %p7684_p13 = pnand %p7683_p6, %p7677_p4 }
0x1159   : > { %7687 = shalt.err (!%p7684_p13)
}
0x115a   : > { %s9649_s26 = sld [smem:[#allocation67_spill]] }
0x1160   : > { %s7688_s0 = scalar_lea.hbm %s9649_s26, 32 }
0x1161   : > { %p7689_p10 = scmp.ne.s32.totalorder %s9649_s26, %s7688_s0  ;;  %p7694_p5 = scmp.lt.u32.totalorder %s7688_s0, %s9649_s26 }
0x1163   : > { %p7690_p11 = pnand %p7689_p10, %p6511_p3 }
0x1165   : > { %p7691_p0 = pneg %p7690_p11 }
0x1167   : > { %p7696_p2 = pnand %p7694_p5, %p7691_p0 }
0x1169   : > { %7699 = shalt.err (!%p7696_p2)
}
0x116a   : > { %6439 = dma.vmem_to_hbm [thread:$0]  (%p6511_p3), %s5298_s17, 32, %s9649_s26, [#allocation5]  }
0x116b   : > { %7757 = dma.done.wait (%p6511_p3), [#allocation5], 32  }
0x116c   : > { %7759 = vsyncadd (%p6511_p3), [#allocation5], 4294967264 }
0x116d PF: > { %s9650_s30 = sld [smem:[#allocation48_spill]]  ;;  %s9651_s3 = sld [smem:[#allocation44_spill]] }
0x116e   : > { %s9652_s28 = sld [smem:[#allocation45_spill]]  ;;  %s9653_s29 = sld [smem:[#allocation49_spill]] }
0x1173   : > { %p52_p12 = scmp.ge.s32.totalorder %s9650_s30, 8  }
0x1175   :  { %54 = sbr.rel (!%p52_p12) target bundleno = 36 (0x24), region = 309 }
0x117c   :  { %5310 = vsyncpa [#allocation4], 1 }
0x117d   :  { %5312 = vsyncpa [#allocation4 + $0x1], 1 }
0x117e   :  { %5313 = vsyncpa [#allocation7], 1 }
0x117f   :  { %5314 = vsyncpa [#allocation10], 1 }
0x1180   :  { %5316 = vsyncpa [#allocation10 + $0x1], 1 }
0x1181   :  { %5317 = vsyncpa [#allocation13], 1 }
0x1182   :  { %5319 = vsyncpa [#allocation13 + $0x1], 1 }
0x1183   :  { %5320 = vsyncpa [#allocation16], 1 }
0x1184   :  { %5322 = vsyncpa [#allocation16 + $0x1], 1 }
0x1185   :  { %5323 = vsyncpa [#allocation19], 1 }
0x1186   :  { %5325 = vsyncpa [#allocation19 + $0x1], 1 }
0x1187   :  { %5326 = vsyncpa [#allocation22], 1 }
0x1188   :  { %5328 = vsyncpa [#allocation22 + $0x1], 1 }
0x1189   :  { %5329 = vsyncpa [#allocation25], 1 }
0x118a   :  { %5331 = vsyncpa [#allocation25 + $0x1], 1 }
0x118b   :  { %5332 = vsyncpa [#allocation28], 1 }
0x118c   :  { %5333 = vsyncpa [#allocation31], 1 }
0x118d   :  { %5334 = vsyncpa [#allocation5], 1 }
0x118e   :  { %5336 = vsyncpa [#allocation5 + $0x1], 1 }

</bundles_post_ra>
